<compile_context>
chip_gen: v7x
topology: tpu7x:2x2x1
jax: 0.10.0
libtpu: 0.0.40
codegen_flags: <defaults>
</compile_context>

<pallas_src>
import functools

import jax
import jax.numpy as jnp
from jax.experimental import pallas as pl
from jax.experimental.pallas import tpu as pltpu

EPS = 1e-5
LANE = 128
# upsam flags for layer1, upsam1, layer2, upsam2, layer3, upsam3, layer4
_UPSAM_FLAGS = (True, True, False, True, False, True, False)


def _round_up(n, m):
    return ((n + m - 1) // m) * m


def _vmem_limit_bytes():
    """Generation-aware scoped-VMEM limit: ~3/4 of physical VMEM
    (128 MiB v5e/v6e -> 96 MiB, 64 MiB v7x -> 48 MiB)."""
    try:
        phys = pltpu.get_tpu_info().vmem_capacity_bytes
    except Exception:
        phys = 64 * 1024 * 1024            # conservative (v7x per-core)
    return int(min(max(32 * 1024 * 1024, (phys * 3) // 4), 128 * 1024 * 1024))


def _choose_tb(batch):
    """Batch tile: bf16-sublane (16) aligned; >=128 rows to feed the MXU when
    the batch allows; up to 1024 rows to amortize the ~0.35us/grid-step
    overhead; and >=2 tiles for large batches so v7x's 2nd TC gets work."""
    if batch <= 128:
        return _round_up(batch, 16)
    if batch <= 256:
        return 128
    return min(1024, _round_up(pl.cdiv(batch, 2), 128))


# ---------------------------------------------------------------------------
# Fused kernel: entire BaseBlock stack + final linear for one batch tile.
# ---------------------------------------------------------------------------
def _fused_mlp_kernel(upsam_flags, bias_slices, *refs):
    x_ref, b_ref, o_ref = refs[0], refs[1], refs[-1]
    w_refs = refs[2:-1]

    def bias(j):
        off, size = bias_slices[j]                  # static, 128-aligned
        return b_ref[:, off:off + size]             # (1, size) f32, broadcasts

    h = x_ref[...]                                  # bf16 [tb, din_pad]
    wi = bi = 0
    for up in upsam_flags:
        hb = h.astype(jnp.bfloat16)                 # no-op after block 0
        # layer1 (+ folded bn1) -> relu
        a = jnp.dot(hb, w_refs[wi][...],
                    preferred_element_type=jnp.float32) + bias(bi)
        a = jnp.maximum(a, 0.0)
        # layer2 (+ folded bn2)
        z = jnp.dot(a.astype(jnp.bfloat16), w_refs[wi + 1][...],
                    preferred_element_type=jnp.float32) + bias(bi + 1)
        wi += 2
        bi += 2
        # residual / upsample path
        if up:
            skip = jnp.dot(hb, w_refs[wi][...],
                           preferred_element_type=jnp.float32) + bias(bi)
            wi += 1
            bi += 1
        else:
            skip = h
        h = jnp.maximum(z + skip, 0.0)              # f32

    out = jnp.dot(h.astype(jnp.bfloat16), w_refs[wi][...],
                  preferred_element_type=jnp.float32) + bias(bi)
    o_ref[...] = out.astype(o_ref.dtype)


# ---------------------------------------------------------------------------
# pallas_call wrapper
# ---------------------------------------------------------------------------
def _fused_call(x, weights, bias_slab, bias_slices, dout_pad, tb,
                single_buffer):
    B, din_pad = x.shape                            # B already padded to tb
    grid = (B // tb,)
    vmem_limit = _vmem_limit_bytes()

    buf = 1 if single_buffer else 2
    weight_bytes = buf * sum(w.size * w.dtype.itemsize for w in weights)
    if weight_bytes > (vmem_limit * 3) // 4:
        # TODO(synk): switch the tail matmuls to a K-tiled pltpu.emit_pipeline
        # path instead of keeping all weights resident.
        raise NotImplementedError(
            f"resident bf16 weights ({weight_bytes} B) exceed the VMEM budget "
            f"({vmem_limit} B); reduce dim_model or K-tile the tail matmuls")

    def const_spec(shape):
        # constant block index -> DMA'd once, resident in VMEM across the grid
        if single_buffer:
            return pl.BlockSpec(shape, lambda i: (0, 0),
                                pipeline_mode=pl.Buffered(1))
        return pl.BlockSpec(shape, lambda i: (0, 0))

    in_specs = [pl.BlockSpec((tb, din_pad), lambda i: (i, 0)),
                const_spec(bias_slab.shape)]
    in_specs += [const_spec(w.shape) for w in weights]

    # advisory cost estimate for XLA's scheduler
    mm_flops = sum(2 * w.shape[0] * w.shape[1] for w in weights)
    bytes_accessed = (x.size * x.dtype.itemsize
                      + bias_slab.size * bias_slab.dtype.itemsize
                      + sum(w.size * w.dtype.itemsize for w in weights)
                      + B * dout_pad * 2)
    cost = pl.CostEstimate(flops=B * mm_flops, transcendentals=0,
                           bytes_accessed=bytes_accessed)

    return pl.pallas_call(
        functools.partial(_fused_mlp_kernel, _UPSAM_FLAGS, bias_slices),
        out_shape=jax.ShapeDtypeStruct((B, dout_pad), jnp.bfloat16),
        grid=grid,
        in_specs=in_specs,
        out_specs=pl.BlockSpec((tb, dout_pad), lambda i: (i, 0)),
        compiler_params=pltpu.CompilerParams(
            dimension_semantics=("parallel",),
            vmem_limit_bytes=vmem_limit),
        cost_estimate=cost,
    )(x, bias_slab, *weights)


# ---------------------------------------------------------------------------
# Parameter construction (PyTorch default inits, BN folded, padded, bf16)
# ---------------------------------------------------------------------------
def _init_linear(key, din, dout):
    k1, k2 = jax.random.split(key)
    bound = 1.0 / (din ** 0.5)
    w = jax.random.uniform(k1, (din, dout), jnp.float32, -bound, bound)
    b = jax.random.uniform(k2, (1, dout), jnp.float32, -bound, bound)
    return w, b


def _bn_eval_affine(dim):
    # fresh BatchNorm1d in eval mode: gamma=1, beta=0, running_mean=0, var=1
    gamma = jnp.ones((1, dim), jnp.float32)
    beta = jnp.zeros((1, dim), jnp.float32)
    mean = jnp.zeros((1, dim), jnp.float32)
    var = jnp.ones((1, dim), jnp.float32)
    scale = gamma / jnp.sqrt(var + EPS)
    shift = beta - mean * scale
    return scale, shift


def _pad_w(w, rows, cols):
    return jnp.pad(w, ((0, rows - w.shape[0]), (0, cols - w.shape[1])))


def _pad_b(b, cols):
    return jnp.pad(b, ((0, 0), (0, cols - b.shape[1])))


def _make_block_params(key, din, dh, dout, upsam):
    """One BaseBlock: BN folded into linears, zero-padded to 128, weights bf16.
    Returns (weights, biases) in the kernel's consumption order."""
    din_p, dh_p, dout_p = (_round_up(d, LANE) for d in (din, dh, dout))
    ks = jax.random.split(key, 3)
    w1, b1 = _init_linear(ks[0], din, dh)
    w2, b2 = _init_linear(ks[1], dh, dout)
    s1, t1 = _bn_eval_affine(dh)
    s2, t2 = _bn_eval_affine(dout)
    w1, b1 = w1 * s1, b1 * s1 + t1                  # fold eval-mode BN
    w2, b2 = w2 * s2, b2 * s2 + t2
    ws = [_pad_w(w1, din_p, dh_p).astype(jnp.bfloat16),
          _pad_w(w2, dh_p, dout_p).astype(jnp.bfloat16)]
    bs = [_pad_b(b1, dh_p), _pad_b(b2, dout_p)]
    if upsam:
        wu, bu = _init_linear(ks[2], din, dout)
        ws.append(_pad_w(wu, din_p, dout_p).astype(jnp.bfloat16))
        bs.append(_pad_b(bu, dout_p))
    return ws, bs


def init_mlp(key, dim_emb, dim_model, dim_out):
    dm = dim_model
    block_dims = [
        (dim_emb, dm, dm),            # layer1
        (dm, dm, 2 * dm),             # upsam1
        (2 * dm, 2 * dm, 2 * dm),     # layer2
        (2 * dm, 2 * dm, 4 * dm),     # upsam2
        (4 * dm, 4 * dm, 4 * dm),     # layer3
        (4 * dm, 4 * dm, 8 * dm),     # upsam3
        (8 * dm, 8 * dm, 8 * dm),     # layer4
    ]
    ks = jax.random.split(key, len(block_dims) + 3)

    emb_pad = _round_up(dim_emb, LANE)
    cell = jax.random.normal(ks[0], (6, dim_emb), jnp.float32)
    comp = jax.random.normal(ks[1], (146, dim_emb), jnp.float32)
    cell = jnp.pad(cell, ((0, 0), (0, emb_pad - dim_emb)))
    comp = jnp.pad(comp, ((0, 0), (0, emb_pad - dim_emb)))

    weights, biases = [], []
    for kk, dims, up in zip(ks[2:2 + len(block_dims)], block_dims,
                            _UPSAM_FLAGS):
        ws, bs = _make_block_params(kk, *dims, up)
        weights += ws
        biases += bs

    w5, b5 = _init_linear(ks[-1], 8 * dm, dim_out)
    din5_p = _round_up(8 * dm, LANE)
    dout_p = _round_up(dim_out, LANE)
    weights.append(_pad_w(w5, din5_p, dout_p).astype(jnp.bfloat16))
    biases.append(_pad_b(b5, dout_p))

    # Pack all (1, N) biases into one lane-aligned f32 slab (single ref/DMA);
    # offsets are static multiples of 128 -> cheap in-kernel slices.
    bias_slices, off = [], 0
    for b in biases:
        bias_slices.append((off, b.shape[1]))
        off += b.shape[1]
    bias_slab = jnp.concatenate(biases, axis=1)

    return {"cell_embed": cell, "comp_embed": comp,
            "weights": weights, "bias_slab": bias_slab,
            "bias_slices": tuple(bias_slices),
            "dim_out": dim_out, "dout_pad": dout_p}


# ---------------------------------------------------------------------------
# Forward pass
# ---------------------------------------------------------------------------
def mlp_forward(params, x_idx):
    # Embedding gathers are data-dependent row lookups -> plain JAX glue.
    cell_emb = params["cell_embed"][x_idx[:, 0]]
    comp_emb = params["comp_embed"][x_idx[:, 1]]
    # Block 1 has upsam=True, so the input is only ever consumed as bf16:
    # feeding bf16 halves the per-tile input DMA and drops one VPU cast.
    h = (cell_emb + comp_emb).astype(jnp.bfloat16)    # [B, emb_pad]

    B = h.shape[0]
    tb = _choose_tb(B)
    B_pad = _round_up(B, tb)                          # no silent truncation
    if B_pad != B:
        h = jnp.pad(h, ((0, B_pad - B), (0, 0)))

    args = (h, params["weights"], params["bias_slab"],
            params["bias_slices"], params["dout_pad"], tb)
    try:
        out = _fused_call(*args, single_buffer=True)
    except NotImplementedError:
        raise
    except Exception:
        # pipeline_mode=pl.Buffered(1) not accepted by this jax build ->
        # fall back to default (double-buffered) constant specs.
        out = _fused_call(*args, single_buffer=False)

    # slice off batch/feature padding, upcast to f32 for downstream use
    return out[:B, :params["dim_out"]].astype(jnp.float32)


if __name__ == "__main__":
    dim_emb, dim_model, dim_out = 32, 32, 64
    B = 8

    key = jax.random.PRNGKey(0)
    k_params, k_cell, k_comp = jax.random.split(key, 3)

    params = init_mlp(k_params, dim_emb, dim_model, dim_out)

    cell_ids = jax.random.randint(k_cell, (B, 1), 0, 6, dtype=jnp.int32)
    comp_ids = jax.random.randint(k_comp, (B, 1), 0, 146, dtype=jnp.int32)
    x = jnp.concatenate([cell_ids, comp_ids], axis=1)  # [B, 2] int32 indices

    out = mlp_forward(params, x)
    jax.block_until_ready(out)
    assert out.shape == (B, dim_out)
    assert out.dtype == jnp.float32
    print("KERNEL_OK")
</pallas_src>

<mosaic_0001>
module attributes {stable_mosaic.version = 11 : i64} {
  func.func @_fused_mlp_kernel(%arg0: i32, %arg1: memref<16x128xbf16, #tpu.memory_space<vmem>>, %arg2: memref<1x2944xf32, #tpu.memory_space<vmem>>, %arg3: memref<128x128xbf16, #tpu.memory_space<vmem>>, %arg4: memref<128x128xbf16, #tpu.memory_space<vmem>>, %arg5: memref<128x128xbf16, #tpu.memory_space<vmem>>, %arg6: memref<128x128xbf16, #tpu.memory_space<vmem>>, %arg7: memref<128x128xbf16, #tpu.memory_space<vmem>>, %arg8: memref<128x128xbf16, #tpu.memory_space<vmem>>, %arg9: memref<128x128xbf16, #tpu.memory_space<vmem>>, %arg10: memref<128x128xbf16, #tpu.memory_space<vmem>>, %arg11: memref<128x128xbf16, #tpu.memory_space<vmem>>, %arg12: memref<128x128xbf16, #tpu.memory_space<vmem>>, %arg13: memref<128x128xbf16, #tpu.memory_space<vmem>>, %arg14: memref<128x128xbf16, #tpu.memory_space<vmem>>, %arg15: memref<128x128xbf16, #tpu.memory_space<vmem>>, %arg16: memref<128x128xbf16, #tpu.memory_space<vmem>>, %arg17: memref<128x256xbf16, #tpu.memory_space<vmem>>, %arg18: memref<128x256xbf16, #tpu.memory_space<vmem>>, %arg19: memref<256x256xbf16, #tpu.memory_space<vmem>>, %arg20: memref<256x256xbf16, #tpu.memory_space<vmem>>, %arg21: memref<256x128xbf16, #tpu.memory_space<vmem>>, %arg22: memref<16x128xbf16, #tpu.memory_space<vmem>>) attributes {dimension_semantics = [#tpu.dimension_semantics<parallel>], iteration_bounds = array<i64: 1>, scalar_prefetch = 0 : i64, scratch_operands = 0 : i64, tpu.core_type = #tpu.core_type<tc>, window_params = [{transform_indices = @transform_0, window_bounds = array<i64: 16, 128>}, {pipeline_mode = #tpu.pipeline_mode<synchronous>, transform_indices = @transform_1, window_bounds = array<i64: 1, 2944>}, {pipeline_mode = #tpu.pipeline_mode<synchronous>, transform_indices = @transform_2, window_bounds = array<i64: 128, 128>}, {pipeline_mode = #tpu.pipeline_mode<synchronous>, transform_indices = @transform_3, window_bounds = array<i64: 128, 128>}, {pipeline_mode = #tpu.pipeline_mode<synchronous>, transform_indices = @transform_4, window_bounds = array<i64: 128, 128>}, {pipeline_mode = #tpu.pipeline_mode<synchronous>, transform_indices = @transform_5, window_bounds = array<i64: 128, 128>}, {pipeline_mode = #tpu.pipeline_mode<synchronous>, transform_indices = @transform_6, window_bounds = array<i64: 128, 128>}, {pipeline_mode = #tpu.pipeline_mode<synchronous>, transform_indices = @transform_7, window_bounds = array<i64: 128, 128>}, {pipeline_mode = #tpu.pipeline_mode<synchronous>, transform_indices = @transform_8, window_bounds = array<i64: 128, 128>}, {pipeline_mode = #tpu.pipeline_mode<synchronous>, transform_indices = @transform_9, window_bounds = array<i64: 128, 128>}, {pipeline_mode = #tpu.pipeline_mode<synchronous>, transform_indices = @transform_10, window_bounds = array<i64: 128, 128>}, {pipeline_mode = #tpu.pipeline_mode<synchronous>, transform_indices = @transform_11, window_bounds = array<i64: 128, 128>}, {pipeline_mode = #tpu.pipeline_mode<synchronous>, transform_indices = @transform_12, window_bounds = array<i64: 128, 128>}, {pipeline_mode = #tpu.pipeline_mode<synchronous>, transform_indices = @transform_13, window_bounds = array<i64: 128, 128>}, {pipeline_mode = #tpu.pipeline_mode<synchronous>, transform_indices = @transform_14, window_bounds = array<i64: 128, 128>}, {pipeline_mode = #tpu.pipeline_mode<synchronous>, transform_indices = @transform_15, window_bounds = array<i64: 128, 128>}, {pipeline_mode = #tpu.pipeline_mode<synchronous>, transform_indices = @transform_16, window_bounds = array<i64: 128, 256>}, {pipeline_mode = #tpu.pipeline_mode<synchronous>, transform_indices = @transform_17, window_bounds = array<i64: 128, 256>}, {pipeline_mode = #tpu.pipeline_mode<synchronous>, transform_indices = @transform_18, window_bounds = array<i64: 256, 256>}, {pipeline_mode = #tpu.pipeline_mode<synchronous>, transform_indices = @transform_19, window_bounds = array<i64: 256, 256>}, {pipeline_mode = #tpu.pipeline_mode<synchronous>, transform_indices = @transform_20, window_bounds = array<i64: 256, 128>}, {transform_indices = @transform_21, window_bounds = array<i64: 16, 128>}]} {
    %c0 = arith.constant 0 : index
    %c0_0 = arith.constant 0 : index
    %0 = vector.load %arg1[%c0, %c0_0] : memref<16x128xbf16, #tpu.memory_space<vmem>>, vector<16x128xbf16>
    %c0_1 = arith.constant 0 : index
    %c0_2 = arith.constant 0 : index
    %1 = vector.load %arg3[%c0_1, %c0_2] : memref<128x128xbf16, #tpu.memory_space<vmem>>, vector<128x128xbf16>
    %cst = arith.constant dense<0.000000e+00> : vector<16x128xf32>
    %2 = tpu.matmul %0, %1, %cst {dimension_numbers = #tpu.dot_dimension_numbers<[1], [0], [0], [1], [0, 0, 1, 1], [], []>} : vector<16x128xbf16>, vector<128x128xbf16>, vector<16x128xf32> -> vector<16x128xf32>
    %c0_3 = arith.constant 0 : index
    %c0_4 = arith.constant 0 : index
    %3 = vector.load %arg2[%c0_3, %c0_4] : memref<1x2944xf32, #tpu.memory_space<vmem>>, vector<1x128xf32>
    %4 = vector.broadcast %3 : vector<1x128xf32> to vector<16x128xf32>
    %5 = arith.addf %2, %4 : vector<16x128xf32>
    %cst_5 = arith.constant 0.000000e+00 : f32
    %6 = vector.broadcast %cst_5 : f32 to vector<16x128xf32>
    %7 = arith.maximumf %5, %6 : vector<16x128xf32>
    %8 = arith.truncf %7 : vector<16x128xf32> to vector<16x128xbf16>
    %c0_6 = arith.constant 0 : index
    %c0_7 = arith.constant 0 : index
    %9 = vector.load %arg4[%c0_6, %c0_7] : memref<128x128xbf16, #tpu.memory_space<vmem>>, vector<128x128xbf16>
    %cst_8 = arith.constant dense<0.000000e+00> : vector<16x128xf32>
    %10 = tpu.matmul %8, %9, %cst_8 {dimension_numbers = #tpu.dot_dimension_numbers<[1], [0], [0], [1], [0, 0, 1, 1], [], []>} : vector<16x128xbf16>, vector<128x128xbf16>, vector<16x128xf32> -> vector<16x128xf32>
    %c0_9 = arith.constant 0 : index
    %c128 = arith.constant 128 : index
    %11 = vector.load %arg2[%c0_9, %c128] : memref<1x2944xf32, #tpu.memory_space<vmem>>, vector<1x128xf32>
    %12 = vector.broadcast %11 : vector<1x128xf32> to vector<16x128xf32>
    %13 = arith.addf %10, %12 : vector<16x128xf32>
    %c0_10 = arith.constant 0 : index
    %c0_11 = arith.constant 0 : index
    %14 = vector.load %arg5[%c0_10, %c0_11] : memref<128x128xbf16, #tpu.memory_space<vmem>>, vector<128x128xbf16>
    %cst_12 = arith.constant dense<0.000000e+00> : vector<16x128xf32>
    %15 = tpu.matmul %0, %14, %cst_12 {dimension_numbers = #tpu.dot_dimension_numbers<[1], [0], [0], [1], [0, 0, 1, 1], [], []>} : vector<16x128xbf16>, vector<128x128xbf16>, vector<16x128xf32> -> vector<16x128xf32>
    %c0_13 = arith.constant 0 : index
    %c256 = arith.constant 256 : index
    %16 = vector.load %arg2[%c0_13, %c256] : memref<1x2944xf32, #tpu.memory_space<vmem>>, vector<1x128xf32>
    %17 = vector.broadcast %16 : vector<1x128xf32> to vector<16x128xf32>
    %18 = arith.addf %15, %17 : vector<16x128xf32>
    %19 = arith.addf %13, %18 : vector<16x128xf32>
    %cst_14 = arith.constant 0.000000e+00 : f32
    %20 = vector.broadcast %cst_14 : f32 to vector<16x128xf32>
    %21 = arith.maximumf %19, %20 : vector<16x128xf32>
    %22 = arith.truncf %21 : vector<16x128xf32> to vector<16x128xbf16>
    %c0_15 = arith.constant 0 : index
    %c0_16 = arith.constant 0 : index
    %23 = vector.load %arg6[%c0_15, %c0_16] : memref<128x128xbf16, #tpu.memory_space<vmem>>, vector<128x128xbf16>
    %cst_17 = arith.constant dense<0.000000e+00> : vector<16x128xf32>
    %24 = tpu.matmul %22, %23, %cst_17 {dimension_numbers = #tpu.dot_dimension_numbers<[1], [0], [0], [1], [0, 0, 1, 1], [], []>} : vector<16x128xbf16>, vector<128x128xbf16>, vector<16x128xf32> -> vector<16x128xf32>
    %c0_18 = arith.constant 0 : index
    %c384 = arith.constant 384 : index
    %25 = vector.load %arg2[%c0_18, %c384] : memref<1x2944xf32, #tpu.memory_space<vmem>>, vector<1x128xf32>
    %26 = vector.broadcast %25 : vector<1x128xf32> to vector<16x128xf32>
    %27 = arith.addf %24, %26 : vector<16x128xf32>
    %cst_19 = arith.constant 0.000000e+00 : f32
    %28 = vector.broadcast %cst_19 : f32 to vector<16x128xf32>
    %29 = arith.maximumf %27, %28 : vector<16x128xf32>
    %30 = arith.truncf %29 : vector<16x128xf32> to vector<16x128xbf16>
    %c0_20 = arith.constant 0 : index
    %c0_21 = arith.constant 0 : index
    %31 = vector.load %arg7[%c0_20, %c0_21] : memref<128x128xbf16, #tpu.memory_space<vmem>>, vector<128x128xbf16>
    %cst_22 = arith.constant dense<0.000000e+00> : vector<16x128xf32>
    %32 = tpu.matmul %30, %31, %cst_22 {dimension_numbers = #tpu.dot_dimension_numbers<[1], [0], [0], [1], [0, 0, 1, 1], [], []>} : vector<16x128xbf16>, vector<128x128xbf16>, vector<16x128xf32> -> vector<16x128xf32>
    %c0_23 = arith.constant 0 : index
    %c512 = arith.constant 512 : index
    %33 = vector.load %arg2[%c0_23, %c512] : memref<1x2944xf32, #tpu.memory_space<vmem>>, vector<1x128xf32>
    %34 = vector.broadcast %33 : vector<1x128xf32> to vector<16x128xf32>
    %35 = arith.addf %32, %34 : vector<16x128xf32>
    %c0_24 = arith.constant 0 : index
    %c0_25 = arith.constant 0 : index
    %36 = vector.load %arg8[%c0_24, %c0_25] : memref<128x128xbf16, #tpu.memory_space<vmem>>, vector<128x128xbf16>
    %cst_26 = arith.constant dense<0.000000e+00> : vector<16x128xf32>
    %37 = tpu.matmul %22, %36, %cst_26 {dimension_numbers = #tpu.dot_dimension_numbers<[1], [0], [0], [1], [0, 0, 1, 1], [], []>} : vector<16x128xbf16>, vector<128x128xbf16>, vector<16x128xf32> -> vector<16x128xf32>
    %c0_27 = arith.constant 0 : index
    %c640 = arith.constant 640 : index
    %38 = vector.load %arg2[%c0_27, %c640] : memref<1x2944xf32, #tpu.memory_space<vmem>>, vector<1x128xf32>
    %39 = vector.broadcast %38 : vector<1x128xf32> to vector<16x128xf32>
    %40 = arith.addf %37, %39 : vector<16x128xf32>
    %41 = arith.addf %35, %40 : vector<16x128xf32>
    %cst_28 = arith.constant 0.000000e+00 : f32
    %42 = vector.broadcast %cst_28 : f32 to vector<16x128xf32>
    %43 = arith.maximumf %41, %42 : vector<16x128xf32>
    %44 = arith.truncf %43 : vector<16x128xf32> to vector<16x128xbf16>
    %c0_29 = arith.constant 0 : index
    %c0_30 = arith.constant 0 : index
    %45 = vector.load %arg9[%c0_29, %c0_30] : memref<128x128xbf16, #tpu.memory_space<vmem>>, vector<128x128xbf16>
    %cst_31 = arith.constant dense<0.000000e+00> : vector<16x128xf32>
    %46 = tpu.matmul %44, %45, %cst_31 {dimension_numbers = #tpu.dot_dimension_numbers<[1], [0], [0], [1], [0, 0, 1, 1], [], []>} : vector<16x128xbf16>, vector<128x128xbf16>, vector<16x128xf32> -> vector<16x128xf32>
    %c0_32 = arith.constant 0 : index
    %c768 = arith.constant 768 : index
    %47 = vector.load %arg2[%c0_32, %c768] : memref<1x2944xf32, #tpu.memory_space<vmem>>, vector<1x128xf32>
    %48 = vector.broadcast %47 : vector<1x128xf32> to vector<16x128xf32>
    %49 = arith.addf %46, %48 : vector<16x128xf32>
    %cst_33 = arith.constant 0.000000e+00 : f32
    %50 = vector.broadcast %cst_33 : f32 to vector<16x128xf32>
    %51 = arith.maximumf %49, %50 : vector<16x128xf32>
    %52 = arith.truncf %51 : vector<16x128xf32> to vector<16x128xbf16>
    %c0_34 = arith.constant 0 : index
    %c0_35 = arith.constant 0 : index
    %53 = vector.load %arg10[%c0_34, %c0_35] : memref<128x128xbf16, #tpu.memory_space<vmem>>, vector<128x128xbf16>
    %cst_36 = arith.constant dense<0.000000e+00> : vector<16x128xf32>
    %54 = tpu.matmul %52, %53, %cst_36 {dimension_numbers = #tpu.dot_dimension_numbers<[1], [0], [0], [1], [0, 0, 1, 1], [], []>} : vector<16x128xbf16>, vector<128x128xbf16>, vector<16x128xf32> -> vector<16x128xf32>
    %c0_37 = arith.constant 0 : index
    %c896 = arith.constant 896 : index
    %55 = vector.load %arg2[%c0_37, %c896] : memref<1x2944xf32, #tpu.memory_space<vmem>>, vector<1x128xf32>
    %56 = vector.broadcast %55 : vector<1x128xf32> to vector<16x128xf32>
    %57 = arith.addf %54, %56 : vector<16x128xf32>
    %58 = arith.addf %57, %43 : vector<16x128xf32>
    %cst_38 = arith.constant 0.000000e+00 : f32
    %59 = vector.broadcast %cst_38 : f32 to vector<16x128xf32>
    %60 = arith.maximumf %58, %59 : vector<16x128xf32>
    %61 = arith.truncf %60 : vector<16x128xf32> to vector<16x128xbf16>
    %c0_39 = arith.constant 0 : index
    %c0_40 = arith.constant 0 : index
    %62 = vector.load %arg11[%c0_39, %c0_40] : memref<128x128xbf16, #tpu.memory_space<vmem>>, vector<128x128xbf16>
    %cst_41 = arith.constant dense<0.000000e+00> : vector<16x128xf32>
    %63 = tpu.matmul %61, %62, %cst_41 {dimension_numbers = #tpu.dot_dimension_numbers<[1], [0], [0], [1], [0, 0, 1, 1], [], []>} : vector<16x128xbf16>, vector<128x128xbf16>, vector<16x128xf32> -> vector<16x128xf32>
    %c0_42 = arith.constant 0 : index
    %c1024 = arith.constant 1024 : index
    %64 = vector.load %arg2[%c0_42, %c1024] : memref<1x2944xf32, #tpu.memory_space<vmem>>, vector<1x128xf32>
    %65 = vector.broadcast %64 : vector<1x128xf32> to vector<16x128xf32>
    %66 = arith.addf %63, %65 : vector<16x128xf32>
    %cst_43 = arith.constant 0.000000e+00 : f32
    %67 = vector.broadcast %cst_43 : f32 to vector<16x128xf32>
    %68 = arith.maximumf %66, %67 : vector<16x128xf32>
    %69 = arith.truncf %68 : vector<16x128xf32> to vector<16x128xbf16>
    %c0_44 = arith.constant 0 : index
    %c0_45 = arith.constant 0 : index
    %70 = vector.load %arg12[%c0_44, %c0_45] : memref<128x128xbf16, #tpu.memory_space<vmem>>, vector<128x128xbf16>
    %cst_46 = arith.constant dense<0.000000e+00> : vector<16x128xf32>
    %71 = tpu.matmul %69, %70, %cst_46 {dimension_numbers = #tpu.dot_dimension_numbers<[1], [0], [0], [1], [0, 0, 1, 1], [], []>} : vector<16x128xbf16>, vector<128x128xbf16>, vector<16x128xf32> -> vector<16x128xf32>
    %c0_47 = arith.constant 0 : index
    %c1152 = arith.constant 1152 : index
    %72 = vector.load %arg2[%c0_47, %c1152] : memref<1x2944xf32, #tpu.memory_space<vmem>>, vector<1x128xf32>
    %73 = vector.broadcast %72 : vector<1x128xf32> to vector<16x128xf32>
    %74 = arith.addf %71, %73 : vector<16x128xf32>
    %c0_48 = arith.constant 0 : index
    %c0_49 = arith.constant 0 : index
    %75 = vector.load %arg13[%c0_48, %c0_49] : memref<128x128xbf16, #tpu.memory_space<vmem>>, vector<128x128xbf16>
    %cst_50 = arith.constant dense<0.000000e+00> : vector<16x128xf32>
    %76 = tpu.matmul %61, %75, %cst_50 {dimension_numbers = #tpu.dot_dimension_numbers<[1], [0], [0], [1], [0, 0, 1, 1], [], []>} : vector<16x128xbf16>, vector<128x128xbf16>, vector<16x128xf32> -> vector<16x128xf32>
    %c0_51 = arith.constant 0 : index
    %c1280 = arith.constant 1280 : index
    %77 = vector.load %arg2[%c0_51, %c1280] : memref<1x2944xf32, #tpu.memory_space<vmem>>, vector<1x128xf32>
    %78 = vector.broadcast %77 : vector<1x128xf32> to vector<16x128xf32>
    %79 = arith.addf %76, %78 : vector<16x128xf32>
    %80 = arith.addf %74, %79 : vector<16x128xf32>
    %cst_52 = arith.constant 0.000000e+00 : f32
    %81 = vector.broadcast %cst_52 : f32 to vector<16x128xf32>
    %82 = arith.maximumf %80, %81 : vector<16x128xf32>
    %83 = arith.truncf %82 : vector<16x128xf32> to vector<16x128xbf16>
    %c0_53 = arith.constant 0 : index
    %c0_54 = arith.constant 0 : index
    %84 = vector.load %arg14[%c0_53, %c0_54] : memref<128x128xbf16, #tpu.memory_space<vmem>>, vector<128x128xbf16>
    %cst_55 = arith.constant dense<0.000000e+00> : vector<16x128xf32>
    %85 = tpu.matmul %83, %84, %cst_55 {dimension_numbers = #tpu.dot_dimension_numbers<[1], [0], [0], [1], [0, 0, 1, 1], [], []>} : vector<16x128xbf16>, vector<128x128xbf16>, vector<16x128xf32> -> vector<16x128xf32>
    %c0_56 = arith.constant 0 : index
    %c1408 = arith.constant 1408 : index
    %86 = vector.load %arg2[%c0_56, %c1408] : memref<1x2944xf32, #tpu.memory_space<vmem>>, vector<1x128xf32>
    %87 = vector.broadcast %86 : vector<1x128xf32> to vector<16x128xf32>
    %88 = arith.addf %85, %87 : vector<16x128xf32>
    %cst_57 = arith.constant 0.000000e+00 : f32
    %89 = vector.broadcast %cst_57 : f32 to vector<16x128xf32>
    %90 = arith.maximumf %88, %89 : vector<16x128xf32>
    %91 = arith.truncf %90 : vector<16x128xf32> to vector<16x128xbf16>
    %c0_58 = arith.constant 0 : index
    %c0_59 = arith.constant 0 : index
    %92 = vector.load %arg15[%c0_58, %c0_59] : memref<128x128xbf16, #tpu.memory_space<vmem>>, vector<128x128xbf16>
    %cst_60 = arith.constant dense<0.000000e+00> : vector<16x128xf32>
    %93 = tpu.matmul %91, %92, %cst_60 {dimension_numbers = #tpu.dot_dimension_numbers<[1], [0], [0], [1], [0, 0, 1, 1], [], []>} : vector<16x128xbf16>, vector<128x128xbf16>, vector<16x128xf32> -> vector<16x128xf32>
    %c0_61 = arith.constant 0 : index
    %c1536 = arith.constant 1536 : index
    %94 = vector.load %arg2[%c0_61, %c1536] : memref<1x2944xf32, #tpu.memory_space<vmem>>, vector<1x128xf32>
    %95 = vector.broadcast %94 : vector<1x128xf32> to vector<16x128xf32>
    %96 = arith.addf %93, %95 : vector<16x128xf32>
    %97 = arith.addf %96, %82 : vector<16x128xf32>
    %cst_62 = arith.constant 0.000000e+00 : f32
    %98 = vector.broadcast %cst_62 : f32 to vector<16x128xf32>
    %99 = arith.maximumf %97, %98 : vector<16x128xf32>
    %100 = arith.truncf %99 : vector<16x128xf32> to vector<16x128xbf16>
    %c0_63 = arith.constant 0 : index
    %c0_64 = arith.constant 0 : index
    %101 = vector.load %arg16[%c0_63, %c0_64] : memref<128x128xbf16, #tpu.memory_space<vmem>>, vector<128x128xbf16>
    %cst_65 = arith.constant dense<0.000000e+00> : vector<16x128xf32>
    %102 = tpu.matmul %100, %101, %cst_65 {dimension_numbers = #tpu.dot_dimension_numbers<[1], [0], [0], [1], [0, 0, 1, 1], [], []>} : vector<16x128xbf16>, vector<128x128xbf16>, vector<16x128xf32> -> vector<16x128xf32>
    %c0_66 = arith.constant 0 : index
    %c1664 = arith.constant 1664 : index
    %103 = vector.load %arg2[%c0_66, %c1664] : memref<1x2944xf32, #tpu.memory_space<vmem>>, vector<1x128xf32>
    %104 = vector.broadcast %103 : vector<1x128xf32> to vector<16x128xf32>
    %105 = arith.addf %102, %104 : vector<16x128xf32>
    %cst_67 = arith.constant 0.000000e+00 : f32
    %106 = vector.broadcast %cst_67 : f32 to vector<16x128xf32>
    %107 = arith.maximumf %105, %106 : vector<16x128xf32>
    %108 = arith.truncf %107 : vector<16x128xf32> to vector<16x128xbf16>
    %c0_68 = arith.constant 0 : index
    %c0_69 = arith.constant 0 : index
    %109 = vector.load %arg17[%c0_68, %c0_69] : memref<128x256xbf16, #tpu.memory_space<vmem>>, vector<128x256xbf16>
    %cst_70 = arith.constant dense<0.000000e+00> : vector<16x256xf32>
    %110 = tpu.matmul %108, %109, %cst_70 {dimension_numbers = #tpu.dot_dimension_numbers<[1], [0], [0], [1], [0, 0, 1, 1], [], []>} : vector<16x128xbf16>, vector<128x256xbf16>, vector<16x256xf32> -> vector<16x256xf32>
    %c0_71 = arith.constant 0 : index
    %c1792 = arith.constant 1792 : index
    %111 = vector.load %arg2[%c0_71, %c1792] : memref<1x2944xf32, #tpu.memory_space<vmem>>, vector<1x256xf32>
    %112 = vector.broadcast %111 : vector<1x256xf32> to vector<16x256xf32>
    %113 = arith.addf %110, %112 : vector<16x256xf32>
    %c0_72 = arith.constant 0 : index
    %c0_73 = arith.constant 0 : index
    %114 = vector.load %arg18[%c0_72, %c0_73] : memref<128x256xbf16, #tpu.memory_space<vmem>>, vector<128x256xbf16>
    %cst_74 = arith.constant dense<0.000000e+00> : vector<16x256xf32>
    %115 = tpu.matmul %100, %114, %cst_74 {dimension_numbers = #tpu.dot_dimension_numbers<[1], [0], [0], [1], [0, 0, 1, 1], [], []>} : vector<16x128xbf16>, vector<128x256xbf16>, vector<16x256xf32> -> vector<16x256xf32>
    %c0_75 = arith.constant 0 : index
    %c2048 = arith.constant 2048 : index
    %116 = vector.load %arg2[%c0_75, %c2048] : memref<1x2944xf32, #tpu.memory_space<vmem>>, vector<1x256xf32>
    %117 = vector.broadcast %116 : vector<1x256xf32> to vector<16x256xf32>
    %118 = arith.addf %115, %117 : vector<16x256xf32>
    %119 = arith.addf %113, %118 : vector<16x256xf32>
    %cst_76 = arith.constant 0.000000e+00 : f32
    %120 = vector.broadcast %cst_76 : f32 to vector<16x256xf32>
    %121 = arith.maximumf %119, %120 : vector<16x256xf32>
    %122 = arith.truncf %121 : vector<16x256xf32> to vector<16x256xbf16>
    %c0_77 = arith.constant 0 : index
    %c0_78 = arith.constant 0 : index
    %123 = vector.load %arg19[%c0_77, %c0_78] : memref<256x256xbf16, #tpu.memory_space<vmem>>, vector<256x256xbf16>
    %cst_79 = arith.constant dense<0.000000e+00> : vector<16x256xf32>
    %124 = tpu.matmul %122, %123, %cst_79 {dimension_numbers = #tpu.dot_dimension_numbers<[1], [0], [0], [1], [0, 0, 1, 1], [], []>} : vector<16x256xbf16>, vector<256x256xbf16>, vector<16x256xf32> -> vector<16x256xf32>
    %c0_80 = arith.constant 0 : index
    %c2304 = arith.constant 2304 : index
    %125 = vector.load %arg2[%c0_80, %c2304] : memref<1x2944xf32, #tpu.memory_space<vmem>>, vector<1x256xf32>
    %126 = vector.broadcast %125 : vector<1x256xf32> to vector<16x256xf32>
    %127 = arith.addf %124, %126 : vector<16x256xf32>
    %cst_81 = arith.constant 0.000000e+00 : f32
    %128 = vector.broadcast %cst_81 : f32 to vector<16x256xf32>
    %129 = arith.maximumf %127, %128 : vector<16x256xf32>
    %130 = arith.truncf %129 : vector<16x256xf32> to vector<16x256xbf16>
    %c0_82 = arith.constant 0 : index
    %c0_83 = arith.constant 0 : index
    %131 = vector.load %arg20[%c0_82, %c0_83] : memref<256x256xbf16, #tpu.memory_space<vmem>>, vector<256x256xbf16>
    %cst_84 = arith.constant dense<0.000000e+00> : vector<16x256xf32>
    %132 = tpu.matmul %130, %131, %cst_84 {dimension_numbers = #tpu.dot_dimension_numbers<[1], [0], [0], [1], [0, 0, 1, 1], [], []>} : vector<16x256xbf16>, vector<256x256xbf16>, vector<16x256xf32> -> vector<16x256xf32>
    %c0_85 = arith.constant 0 : index
    %c2560 = arith.constant 2560 : index
    %133 = vector.load %arg2[%c0_85, %c2560] : memref<1x2944xf32, #tpu.memory_space<vmem>>, vector<1x256xf32>
    %134 = vector.broadcast %133 : vector<1x256xf32> to vector<16x256xf32>
    %135 = arith.addf %132, %134 : vector<16x256xf32>
    %136 = arith.addf %135, %121 : vector<16x256xf32>
    %cst_86 = arith.constant 0.000000e+00 : f32
    %137 = vector.broadcast %cst_86 : f32 to vector<16x256xf32>
    %138 = arith.maximumf %136, %137 : vector<16x256xf32>
    %139 = arith.truncf %138 : vector<16x256xf32> to vector<16x256xbf16>
    %c0_87 = arith.constant 0 : index
    %c0_88 = arith.constant 0 : index
    %140 = vector.load %arg21[%c0_87, %c0_88] : memref<256x128xbf16, #tpu.memory_space<vmem>>, vector<256x128xbf16>
    %cst_89 = arith.constant dense<0.000000e+00> : vector<16x128xf32>
    %141 = tpu.matmul %139, %140, %cst_89 {dimension_numbers = #tpu.dot_dimension_numbers<[1], [0], [0], [1], [0, 0, 1, 1], [], []>} : vector<16x256xbf16>, vector<256x128xbf16>, vector<16x128xf32> -> vector<16x128xf32>
    %c0_90 = arith.constant 0 : index
    %c2816 = arith.constant 2816 : index
    %142 = vector.load %arg2[%c0_90, %c2816] : memref<1x2944xf32, #tpu.memory_space<vmem>>, vector<1x128xf32>
    %143 = vector.broadcast %142 : vector<1x128xf32> to vector<16x128xf32>
    %144 = arith.addf %141, %143 : vector<16x128xf32>
    %145 = arith.truncf %144 : vector<16x128xf32> to vector<16x128xbf16>
    %c0_91 = arith.constant 0 : index
    %c0_92 = arith.constant 0 : index
    %146 = vector.load %arg22[%c0_91, %c0_92] : memref<16x128xbf16, #tpu.memory_space<vmem>>, vector<16x128xbf16>
    tpu.vector_store %arg22[%c0_91, %c0_92], %145 {strides = array<i32>} : memref<16x128xbf16, #tpu.memory_space<vmem>>, vector<16x128xbf16>,
    return
  }
  func.func @transform_0(%arg0: i32) -> (i32, i32) {
    %c0_i32 = arith.constant 0 : i32
    %c0_i32_0 = arith.constant 0 : i32
    return %arg0, %c0_i32 : i32, i32
  }
  func.func @transform_1(%arg0: i32) -> (i32, i32) {
    %c0_i32 = arith.constant 0 : i32
    %c0_i32_0 = arith.constant 0 : i32
    %c0_i32_1 = arith.constant 0 : i32
    return %c0_i32, %c0_i32_0 : i32, i32
  }
  func.func @transform_2(%arg0: i32) -> (i32, i32) {
    %c0_i32 = arith.constant 0 : i32
    %c0_i32_0 = arith.constant 0 : i32
    %c0_i32_1 = arith.constant 0 : i32
    return %c0_i32, %c0_i32_0 : i32, i32
  }
  func.func @transform_3(%arg0: i32) -> (i32, i32) {
    %c0_i32 = arith.constant 0 : i32
    %c0_i32_0 = arith.constant 0 : i32
    %c0_i32_1 = arith.constant 0 : i32
    return %c0_i32, %c0_i32_0 : i32, i32
  }
  func.func @transform_4(%arg0: i32) -> (i32, i32) {
    %c0_i32 = arith.constant 0 : i32
    %c0_i32_0 = arith.constant 0 : i32
    %c0_i32_1 = arith.constant 0 : i32
    return %c0_i32, %c0_i32_0 : i32, i32
  }
  func.func @transform_5(%arg0: i32) -> (i32, i32) {
    %c0_i32 = arith.constant 0 : i32
    %c0_i32_0 = arith.constant 0 : i32
    %c0_i32_1 = arith.constant 0 : i32
    return %c0_i32, %c0_i32_0 : i32, i32
  }
  func.func @transform_6(%arg0: i32) -> (i32, i32) {
    %c0_i32 = arith.constant 0 : i32
    %c0_i32_0 = arith.constant 0 : i32
    %c0_i32_1 = arith.constant 0 : i32
    return %c0_i32, %c0_i32_0 : i32, i32
  }
  func.func @transform_7(%arg0: i32) -> (i32, i32) {
    %c0_i32 = arith.constant 0 : i32
    %c0_i32_0 = arith.constant 0 : i32
    %c0_i32_1 = arith.constant 0 : i32
    return %c0_i32, %c0_i32_0 : i32, i32
  }
  func.func @transform_8(%arg0: i32) -> (i32, i32) {
    %c0_i32 = arith.constant 0 : i32
    %c0_i32_0 = arith.constant 0 : i32
    %c0_i32_1 = arith.constant 0 : i32
    return %c0_i32, %c0_i32_0 : i32, i32
  }
  func.func @transform_9(%arg0: i32) -> (i32, i32) {
    %c0_i32 = arith.constant 0 : i32
    %c0_i32_0 = arith.constant 0 : i32
    %c0_i32_1 = arith.constant 0 : i32
    return %c0_i32, %c0_i32_0 : i32, i32
  }
  func.func @transform_10(%arg0: i32) -> (i32, i32) {
    %c0_i32 = arith.constant 0 : i32
    %c0_i32_0 = arith.constant 0 : i32
    %c0_i32_1 = arith.constant 0 : i32
    return %c0_i32, %c0_i32_0 : i32, i32
  }
  func.func @transform_11(%arg0: i32) -> (i32, i32) {
    %c0_i32 = arith.constant 0 : i32
    %c0_i32_0 = arith.constant 0 : i32
    %c0_i32_1 = arith.constant 0 : i32
    return %c0_i32, %c0_i32_0 : i32, i32
  }
  func.func @transform_12(%arg0: i32) -> (i32, i32) {
    %c0_i32 = arith.constant 0 : i32
    %c0_i32_0 = arith.constant 0 : i32
    %c0_i32_1 = arith.constant 0 : i32
    return %c0_i32, %c0_i32_0 : i32, i32
  }
  func.func @transform_13(%arg0: i32) -> (i32, i32) {
    %c0_i32 = arith.constant 0 : i32
    %c0_i32_0 = arith.constant 0 : i32
    %c0_i32_1 = arith.constant 0 : i32
    return %c0_i32, %c0_i32_0 : i32, i32
  }
  func.func @transform_14(%arg0: i32) -> (i32, i32) {
    %c0_i32 = arith.constant 0 : i32
    %c0_i32_0 = arith.constant 0 : i32
    %c0_i32_1 = arith.constant 0 : i32
    return %c0_i32, %c0_i32_0 : i32, i32
  }
  func.func @transform_15(%arg0: i32) -> (i32, i32) {
    %c0_i32 = arith.constant 0 : i32
    %c0_i32_0 = arith.constant 0 : i32
    %c0_i32_1 = arith.constant 0 : i32
    return %c0_i32, %c0_i32_0 : i32, i32
  }
  func.func @transform_16(%arg0: i32) -> (i32, i32) {
    %c0_i32 = arith.constant 0 : i32
    %c0_i32_0 = arith.constant 0 : i32
    %c0_i32_1 = arith.constant 0 : i32
    return %c0_i32, %c0_i32_0 : i32, i32
  }
  func.func @transform_17(%arg0: i32) -> (i32, i32) {
    %c0_i32 = arith.constant 0 : i32
    %c0_i32_0 = arith.constant 0 : i32
    %c0_i32_1 = arith.constant 0 : i32
    return %c0_i32, %c0_i32_0 : i32, i32
  }
  func.func @transform_18(%arg0: i32) -> (i32, i32) {
    %c0_i32 = arith.constant 0 : i32
    %c0_i32_0 = arith.constant 0 : i32
    %c0_i32_1 = arith.constant 0 : i32
    return %c0_i32, %c0_i32_0 : i32, i32
  }
  func.func @transform_19(%arg0: i32) -> (i32, i32) {
    %c0_i32 = arith.constant 0 : i32
    %c0_i32_0 = arith.constant 0 : i32
    %c0_i32_1 = arith.constant 0 : i32
    return %c0_i32, %c0_i32_0 : i32, i32
  }
  func.func @transform_20(%arg0: i32) -> (i32, i32) {
    %c0_i32 = arith.constant 0 : i32
    %c0_i32_0 = arith.constant 0 : i32
    %c0_i32_1 = arith.constant 0 : i32
    return %c0_i32, %c0_i32_0 : i32, i32
  }
  func.func @transform_21(%arg0: i32) -> (i32, i32) {
    %c0_i32 = arith.constant 0 : i32
    %c0_i32_0 = arith.constant 0 : i32
    return %arg0, %c0_i32 : i32, i32
  }
}

module attributes {stable_mosaic.version = 11 : i64} {
  func.func @_fused_mlp_kernel(%arg0: i32, %arg1: memref<16x128xbf16, #tpu.memory_space<vmem>>, %arg2: memref<1x2944xf32, #tpu.memory_space<vmem>>, %arg3: memref<128x128xbf16, #tpu.memory_space<vmem>>, %arg4: memref<128x128xbf16, #tpu.memory_space<vmem>>, %arg5: memref<128x128xbf16, #tpu.memory_space<vmem>>, %arg6: memref<128x128xbf16, #tpu.memory_space<vmem>>, %arg7: memref<128x128xbf16, #tpu.memory_space<vmem>>, %arg8: memref<128x128xbf16, #tpu.memory_space<vmem>>, %arg9: memref<128x128xbf16, #tpu.memory_space<vmem>>, %arg10: memref<128x128xbf16, #tpu.memory_space<vmem>>, %arg11: memref<128x128xbf16, #tpu.memory_space<vmem>>, %arg12: memref<128x128xbf16, #tpu.memory_space<vmem>>, %arg13: memref<128x128xbf16, #tpu.memory_space<vmem>>, %arg14: memref<128x128xbf16, #tpu.memory_space<vmem>>, %arg15: memref<128x128xbf16, #tpu.memory_space<vmem>>, %arg16: memref<128x128xbf16, #tpu.memory_space<vmem>>, %arg17: memref<128x256xbf16, #tpu.memory_space<vmem>>, %arg18: memref<128x256xbf16, #tpu.memory_space<vmem>>, %arg19: memref<256x256xbf16, #tpu.memory_space<vmem>>, %arg20: memref<256x256xbf16, #tpu.memory_space<vmem>>, %arg21: memref<256x128xbf16, #tpu.memory_space<vmem>>, %arg22: memref<16x128xbf16, #tpu.memory_space<vmem>>) attributes {dimension_semantics = [#tpu.dimension_semantics<parallel>], iteration_bounds = array<i64: 1>, scalar_prefetch = 0 : i64, scratch_operands = 0 : i64, tpu.core_type = #tpu.core_type<tc>, window_params = [{transform_indices = @transform_0, window_bounds = array<i64: 16, 128>}, {pipeline_mode = #tpu.pipeline_mode<synchronous>, transform_indices = @transform_1, window_bounds = array<i64: 1, 2944>}, {pipeline_mode = #tpu.pipeline_mode<synchronous>, transform_indices = @transform_2, window_bounds = array<i64: 128, 128>}, {pipeline_mode = #tpu.pipeline_mode<synchronous>, transform_indices = @transform_3, window_bounds = array<i64: 128, 128>}, {pipeline_mode = #tpu.pipeline_mode<synchronous>, transform_indices = @transform_4, window_bounds = array<i64: 128, 128>}, {pipeline_mode = #tpu.pipeline_mode<synchronous>, transform_indices = @transform_5, window_bounds = array<i64: 128, 128>}, {pipeline_mode = #tpu.pipeline_mode<synchronous>, transform_indices = @transform_6, window_bounds = array<i64: 128, 128>}, {pipeline_mode = #tpu.pipeline_mode<synchronous>, transform_indices = @transform_7, window_bounds = array<i64: 128, 128>}, {pipeline_mode = #tpu.pipeline_mode<synchronous>, transform_indices = @transform_8, window_bounds = array<i64: 128, 128>}, {pipeline_mode = #tpu.pipeline_mode<synchronous>, transform_indices = @transform_9, window_bounds = array<i64: 128, 128>}, {pipeline_mode = #tpu.pipeline_mode<synchronous>, transform_indices = @transform_10, window_bounds = array<i64: 128, 128>}, {pipeline_mode = #tpu.pipeline_mode<synchronous>, transform_indices = @transform_11, window_bounds = array<i64: 128, 128>}, {pipeline_mode = #tpu.pipeline_mode<synchronous>, transform_indices = @transform_12, window_bounds = array<i64: 128, 128>}, {pipeline_mode = #tpu.pipeline_mode<synchronous>, transform_indices = @transform_13, window_bounds = array<i64: 128, 128>}, {pipeline_mode = #tpu.pipeline_mode<synchronous>, transform_indices = @transform_14, window_bounds = array<i64: 128, 128>}, {pipeline_mode = #tpu.pipeline_mode<synchronous>, transform_indices = @transform_15, window_bounds = array<i64: 128, 128>}, {pipeline_mode = #tpu.pipeline_mode<synchronous>, transform_indices = @transform_16, window_bounds = array<i64: 128, 256>}, {pipeline_mode = #tpu.pipeline_mode<synchronous>, transform_indices = @transform_17, window_bounds = array<i64: 128, 256>}, {pipeline_mode = #tpu.pipeline_mode<synchronous>, transform_indices = @transform_18, window_bounds = array<i64: 256, 256>}, {pipeline_mode = #tpu.pipeline_mode<synchronous>, transform_indices = @transform_19, window_bounds = array<i64: 256, 256>}, {pipeline_mode = #tpu.pipeline_mode<synchronous>, transform_indices = @transform_20, window_bounds = array<i64: 256, 128>}, {transform_indices = @transform_21, window_bounds = array<i64: 16, 128>}]} {
    %c0 = arith.constant 0 : index
    %c0_0 = arith.constant 0 : index
    %0 = vector.load %arg1[%c0, %c0_0] : memref<16x128xbf16, #tpu.memory_space<vmem>>, vector<16x128xbf16>
    %c0_1 = arith.constant 0 : index
    %c0_2 = arith.constant 0 : index
    %1 = vector.load %arg3[%c0_1, %c0_2] : memref<128x128xbf16, #tpu.memory_space<vmem>>, vector<128x128xbf16>
    %cst = arith.constant dense<0.000000e+00> : vector<16x128xf32>
    %2 = tpu.matmul %0, %1, %cst {dimension_numbers = #tpu.dot_dimension_numbers<[1], [0], [0], [1], [0, 0, 1, 1], [], []>} : vector<16x128xbf16>, vector<128x128xbf16>, vector<16x128xf32> -> vector<16x128xf32>
    %c0_3 = arith.constant 0 : index
    %c0_4 = arith.constant 0 : index
    %3 = vector.load %arg2[%c0_3, %c0_4] : memref<1x2944xf32, #tpu.memory_space<vmem>>, vector<1x128xf32>
    %4 = vector.broadcast %3 : vector<1x128xf32> to vector<16x128xf32>
    %5 = arith.addf %2, %4 : vector<16x128xf32>
    %cst_5 = arith.constant 0.000000e+00 : f32
    %6 = vector.broadcast %cst_5 : f32 to vector<16x128xf32>
    %7 = arith.maximumf %5, %6 : vector<16x128xf32>
    %8 = arith.truncf %7 : vector<16x128xf32> to vector<16x128xbf16>
    %c0_6 = arith.constant 0 : index
    %c0_7 = arith.constant 0 : index
    %9 = vector.load %arg4[%c0_6, %c0_7] : memref<128x128xbf16, #tpu.memory_space<vmem>>, vector<128x128xbf16>
    %cst_8 = arith.constant dense<0.000000e+00> : vector<16x128xf32>
    %10 = tpu.matmul %8, %9, %cst_8 {dimension_numbers = #tpu.dot_dimension_numbers<[1], [0], [0], [1], [0, 0, 1, 1], [], []>} : vector<16x128xbf16>, vector<128x128xbf16>, vector<16x128xf32> -> vector<16x128xf32>
    %c0_9 = arith.constant 0 : index
    %c128 = arith.constant 128 : index
    %11 = vector.load %arg2[%c0_9, %c128] : memref<1x2944xf32, #tpu.memory_space<vmem>>, vector<1x128xf32>
    %12 = vector.broadcast %11 : vector<1x128xf32> to vector<16x128xf32>
    %13 = arith.addf %10, %12 : vector<16x128xf32>
    %c0_10 = arith.constant 0 : index
    %c0_11 = arith.constant 0 : index
    %14 = vector.load %arg5[%c0_10, %c0_11] : memref<128x128xbf16, #tpu.memory_space<vmem>>, vector<128x128xbf16>
    %cst_12 = arith.constant dense<0.000000e+00> : vector<16x128xf32>
    %15 = tpu.matmul %0, %14, %cst_12 {dimension_numbers = #tpu.dot_dimension_numbers<[1], [0], [0], [1], [0, 0, 1, 1], [], []>} : vector<16x128xbf16>, vector<128x128xbf16>, vector<16x128xf32> -> vector<16x128xf32>
    %c0_13 = arith.constant 0 : index
    %c256 = arith.constant 256 : index
    %16 = vector.load %arg2[%c0_13, %c256] : memref<1x2944xf32, #tpu.memory_space<vmem>>, vector<1x128xf32>
    %17 = vector.broadcast %16 : vector<1x128xf32> to vector<16x128xf32>
    %18 = arith.addf %15, %17 : vector<16x128xf32>
    %19 = arith.addf %13, %18 : vector<16x128xf32>
    %cst_14 = arith.constant 0.000000e+00 : f32
    %20 = vector.broadcast %cst_14 : f32 to vector<16x128xf32>
    %21 = arith.maximumf %19, %20 : vector<16x128xf32>
    %22 = arith.truncf %21 : vector<16x128xf32> to vector<16x128xbf16>
    %c0_15 = arith.constant 0 : index
    %c0_16 = arith.constant 0 : index
    %23 = vector.load %arg6[%c0_15, %c0_16] : memref<128x128xbf16, #tpu.memory_space<vmem>>, vector<128x128xbf16>
    %cst_17 = arith.constant dense<0.000000e+00> : vector<16x128xf32>
    %24 = tpu.matmul %22, %23, %cst_17 {dimension_numbers = #tpu.dot_dimension_numbers<[1], [0], [0], [1], [0, 0, 1, 1], [], []>} : vector<16x128xbf16>, vector<128x128xbf16>, vector<16x128xf32> -> vector<16x128xf32>
    %c0_18 = arith.constant 0 : index
    %c384 = arith.constant 384 : index
    %25 = vector.load %arg2[%c0_18, %c384] : memref<1x2944xf32, #tpu.memory_space<vmem>>, vector<1x128xf32>
    %26 = vector.broadcast %25 : vector<1x128xf32> to vector<16x128xf32>
    %27 = arith.addf %24, %26 : vector<16x128xf32>
    %cst_19 = arith.constant 0.000000e+00 : f32
    %28 = vector.broadcast %cst_19 : f32 to vector<16x128xf32>
    %29 = arith.maximumf %27, %28 : vector<16x128xf32>
    %30 = arith.truncf %29 : vector<16x128xf32> to vector<16x128xbf16>
    %c0_20 = arith.constant 0 : index
    %c0_21 = arith.constant 0 : index
    %31 = vector.load %arg7[%c0_20, %c0_21] : memref<128x128xbf16, #tpu.memory_space<vmem>>, vector<128x128xbf16>
    %cst_22 = arith.constant dense<0.000000e+00> : vector<16x128xf32>
    %32 = tpu.matmul %30, %31, %cst_22 {dimension_numbers = #tpu.dot_dimension_numbers<[1], [0], [0], [1], [0, 0, 1, 1], [], []>} : vector<16x128xbf16>, vector<128x128xbf16>, vector<16x128xf32> -> vector<16x128xf32>
    %c0_23 = arith.constant 0 : index
    %c512 = arith.constant 512 : index
    %33 = vector.load %arg2[%c0_23, %c512] : memref<1x2944xf32, #tpu.memory_space<vmem>>, vector<1x128xf32>
    %34 = vector.broadcast %33 : vector<1x128xf32> to vector<16x128xf32>
    %35 = arith.addf %32, %34 : vector<16x128xf32>
    %c0_24 = arith.constant 0 : index
    %c0_25 = arith.constant 0 : index
    %36 = vector.load %arg8[%c0_24, %c0_25] : memref<128x128xbf16, #tpu.memory_space<vmem>>, vector<128x128xbf16>
    %cst_26 = arith.constant dense<0.000000e+00> : vector<16x128xf32>
    %37 = tpu.matmul %22, %36, %cst_26 {dimension_numbers = #tpu.dot_dimension_numbers<[1], [0], [0], [1], [0, 0, 1, 1], [], []>} : vector<16x128xbf16>, vector<128x128xbf16>, vector<16x128xf32> -> vector<16x128xf32>
    %c0_27 = arith.constant 0 : index
    %c640 = arith.constant 640 : index
    %38 = vector.load %arg2[%c0_27, %c640] : memref<1x2944xf32, #tpu.memory_space<vmem>>, vector<1x128xf32>
    %39 = vector.broadcast %38 : vector<1x128xf32> to vector<16x128xf32>
    %40 = arith.addf %37, %39 : vector<16x128xf32>
    %41 = arith.addf %35, %40 : vector<16x128xf32>
    %cst_28 = arith.constant 0.000000e+00 : f32
    %42 = vector.broadcast %cst_28 : f32 to vector<16x128xf32>
    %43 = arith.maximumf %41, %42 : vector<16x128xf32>
    %44 = arith.truncf %43 : vector<16x128xf32> to vector<16x128xbf16>
    %c0_29 = arith.constant 0 : index
    %c0_30 = arith.constant 0 : index
    %45 = vector.load %arg9[%c0_29, %c0_30] : memref<128x128xbf16, #tpu.memory_space<vmem>>, vector<128x128xbf16>
    %cst_31 = arith.constant dense<0.000000e+00> : vector<16x128xf32>
    %46 = tpu.matmul %44, %45, %cst_31 {dimension_numbers = #tpu.dot_dimension_numbers<[1], [0], [0], [1], [0, 0, 1, 1], [], []>} : vector<16x128xbf16>, vector<128x128xbf16>, vector<16x128xf32> -> vector<16x128xf32>
    %c0_32 = arith.constant 0 : index
    %c768 = arith.constant 768 : index
    %47 = vector.load %arg2[%c0_32, %c768] : memref<1x2944xf32, #tpu.memory_space<vmem>>, vector<1x128xf32>
    %48 = vector.broadcast %47 : vector<1x128xf32> to vector<16x128xf32>
    %49 = arith.addf %46, %48 : vector<16x128xf32>
    %cst_33 = arith.constant 0.000000e+00 : f32
    %50 = vector.broadcast %cst_33 : f32 to vector<16x128xf32>
    %51 = arith.maximumf %49, %50 : vector<16x128xf32>
    %52 = arith.truncf %51 : vector<16x128xf32> to vector<16x128xbf16>
    %c0_34 = arith.constant 0 : index
    %c0_35 = arith.constant 0 : index
    %53 = vector.load %arg10[%c0_34, %c0_35] : memref<128x128xbf16, #tpu.memory_space<vmem>>, vector<128x128xbf16>
    %cst_36 = arith.constant dense<0.000000e+00> : vector<16x128xf32>
    %54 = tpu.matmul %52, %53, %cst_36 {dimension_numbers = #tpu.dot_dimension_numbers<[1], [0], [0], [1], [0, 0, 1, 1], [], []>} : vector<16x128xbf16>, vector<128x128xbf16>, vector<16x128xf32> -> vector<16x128xf32>
    %c0_37 = arith.constant 0 : index
    %c896 = arith.constant 896 : index
    %55 = vector.load %arg2[%c0_37, %c896] : memref<1x2944xf32, #tpu.memory_space<vmem>>, vector<1x128xf32>
    %56 = vector.broadcast %55 : vector<1x128xf32> to vector<16x128xf32>
    %57 = arith.addf %54, %56 : vector<16x128xf32>
    %58 = arith.addf %57, %43 : vector<16x128xf32>
    %cst_38 = arith.constant 0.000000e+00 : f32
    %59 = vector.broadcast %cst_38 : f32 to vector<16x128xf32>
    %60 = arith.maximumf %58, %59 : vector<16x128xf32>
    %61 = arith.truncf %60 : vector<16x128xf32> to vector<16x128xbf16>
    %c0_39 = arith.constant 0 : index
    %c0_40 = arith.constant 0 : index
    %62 = vector.load %arg11[%c0_39, %c0_40] : memref<128x128xbf16, #tpu.memory_space<vmem>>, vector<128x128xbf16>
    %cst_41 = arith.constant dense<0.000000e+00> : vector<16x128xf32>
    %63 = tpu.matmul %61, %62, %cst_41 {dimension_numbers = #tpu.dot_dimension_numbers<[1], [0], [0], [1], [0, 0, 1, 1], [], []>} : vector<16x128xbf16>, vector<128x128xbf16>, vector<16x128xf32> -> vector<16x128xf32>
    %c0_42 = arith.constant 0 : index
    %c1024 = arith.constant 1024 : index
    %64 = vector.load %arg2[%c0_42, %c1024] : memref<1x2944xf32, #tpu.memory_space<vmem>>, vector<1x128xf32>
    %65 = vector.broadcast %64 : vector<1x128xf32> to vector<16x128xf32>
    %66 = arith.addf %63, %65 : vector<16x128xf32>
    %cst_43 = arith.constant 0.000000e+00 : f32
    %67 = vector.broadcast %cst_43 : f32 to vector<16x128xf32>
    %68 = arith.maximumf %66, %67 : vector<16x128xf32>
    %69 = arith.truncf %68 : vector<16x128xf32> to vector<16x128xbf16>
    %c0_44 = arith.constant 0 : index
    %c0_45 = arith.constant 0 : index
    %70 = vector.load %arg12[%c0_44, %c0_45] : memref<128x128xbf16, #tpu.memory_space<vmem>>, vector<128x128xbf16>
    %cst_46 = arith.constant dense<0.000000e+00> : vector<16x128xf32>
    %71 = tpu.matmul %69, %70, %cst_46 {dimension_numbers = #tpu.dot_dimension_numbers<[1], [0], [0], [1], [0, 0, 1, 1], [], []>} : vector<16x128xbf16>, vector<128x128xbf16>, vector<16x128xf32> -> vector<16x128xf32>
    %c0_47 = arith.constant 0 : index
    %c1152 = arith.constant 1152 : index
    %72 = vector.load %arg2[%c0_47, %c1152] : memref<1x2944xf32, #tpu.memory_space<vmem>>, vector<1x128xf32>
    %73 = vector.broadcast %72 : vector<1x128xf32> to vector<16x128xf32>
    %74 = arith.addf %71, %73 : vector<16x128xf32>
    %c0_48 = arith.constant 0 : index
    %c0_49 = arith.constant 0 : index
    %75 = vector.load %arg13[%c0_48, %c0_49] : memref<128x128xbf16, #tpu.memory_space<vmem>>, vector<128x128xbf16>
    %cst_50 = arith.constant dense<0.000000e+00> : vector<16x128xf32>
    %76 = tpu.matmul %61, %75, %cst_50 {dimension_numbers = #tpu.dot_dimension_numbers<[1], [0], [0], [1], [0, 0, 1, 1], [], []>} : vector<16x128xbf16>, vector<128x128xbf16>, vector<16x128xf32> -> vector<16x128xf32>
    %c0_51 = arith.constant 0 : index
    %c1280 = arith.constant 1280 : index
    %77 = vector.load %arg2[%c0_51, %c1280] : memref<1x2944xf32, #tpu.memory_space<vmem>>, vector<1x128xf32>
    %78 = vector.broadcast %77 : vector<1x128xf32> to vector<16x128xf32>
    %79 = arith.addf %76, %78 : vector<16x128xf32>
    %80 = arith.addf %74, %79 : vector<16x128xf32>
    %cst_52 = arith.constant 0.000000e+00 : f32
    %81 = vector.broadcast %cst_52 : f32 to vector<16x128xf32>
    %82 = arith.maximumf %80, %81 : vector<16x128xf32>
    %83 = arith.truncf %82 : vector<16x128xf32> to vector<16x128xbf16>
    %c0_53 = arith.constant 0 : index
    %c0_54 = arith.constant 0 : index
    %84 = vector.load %arg14[%c0_53, %c0_54] : memref<128x128xbf16, #tpu.memory_space<vmem>>, vector<128x128xbf16>
    %cst_55 = arith.constant dense<0.000000e+00> : vector<16x128xf32>
    %85 = tpu.matmul %83, %84, %cst_55 {dimension_numbers = #tpu.dot_dimension_numbers<[1], [0], [0], [1], [0, 0, 1, 1], [], []>} : vector<16x128xbf16>, vector<128x128xbf16>, vector<16x128xf32> -> vector<16x128xf32>
    %c0_56 = arith.constant 0 : index
    %c1408 = arith.constant 1408 : index
    %86 = vector.load %arg2[%c0_56, %c1408] : memref<1x2944xf32, #tpu.memory_space<vmem>>, vector<1x128xf32>
    %87 = vector.broadcast %86 : vector<1x128xf32> to vector<16x128xf32>
    %88 = arith.addf %85, %87 : vector<16x128xf32>
    %cst_57 = arith.constant 0.000000e+00 : f32
    %89 = vector.broadcast %cst_57 : f32 to vector<16x128xf32>
    %90 = arith.maximumf %88, %89 : vector<16x128xf32>
    %91 = arith.truncf %90 : vector<16x128xf32> to vector<16x128xbf16>
    %c0_58 = arith.constant 0 : index
    %c0_59 = arith.constant 0 : index
    %92 = vector.load %arg15[%c0_58, %c0_59] : memref<128x128xbf16, #tpu.memory_space<vmem>>, vector<128x128xbf16>
    %cst_60 = arith.constant dense<0.000000e+00> : vector<16x128xf32>
    %93 = tpu.matmul %91, %92, %cst_60 {dimension_numbers = #tpu.dot_dimension_numbers<[1], [0], [0], [1], [0, 0, 1, 1], [], []>} : vector<16x128xbf16>, vector<128x128xbf16>, vector<16x128xf32> -> vector<16x128xf32>
    %c0_61 = arith.constant 0 : index
    %c1536 = arith.constant 1536 : index
    %94 = vector.load %arg2[%c0_61, %c1536] : memref<1x2944xf32, #tpu.memory_space<vmem>>, vector<1x128xf32>
    %95 = vector.broadcast %94 : vector<1x128xf32> to vector<16x128xf32>
    %96 = arith.addf %93, %95 : vector<16x128xf32>
    %97 = arith.addf %96, %82 : vector<16x128xf32>
    %cst_62 = arith.constant 0.000000e+00 : f32
    %98 = vector.broadcast %cst_62 : f32 to vector<16x128xf32>
    %99 = arith.maximumf %97, %98 : vector<16x128xf32>
    %100 = arith.truncf %99 : vector<16x128xf32> to vector<16x128xbf16>
    %c0_63 = arith.constant 0 : index
    %c0_64 = arith.constant 0 : index
    %101 = vector.load %arg16[%c0_63, %c0_64] : memref<128x128xbf16, #tpu.memory_space<vmem>>, vector<128x128xbf16>
    %cst_65 = arith.constant dense<0.000000e+00> : vector<16x128xf32>
    %102 = tpu.matmul %100, %101, %cst_65 {dimension_numbers = #tpu.dot_dimension_numbers<[1], [0], [0], [1], [0, 0, 1, 1], [], []>} : vector<16x128xbf16>, vector<128x128xbf16>, vector<16x128xf32> -> vector<16x128xf32>
    %c0_66 = arith.constant 0 : index
    %c1664 = arith.constant 1664 : index
    %103 = vector.load %arg2[%c0_66, %c1664] : memref<1x2944xf32, #tpu.memory_space<vmem>>, vector<1x128xf32>
    %104 = vector.broadcast %103 : vector<1x128xf32> to vector<16x128xf32>
    %105 = arith.addf %102, %104 : vector<16x128xf32>
    %cst_67 = arith.constant 0.000000e+00 : f32
    %106 = vector.broadcast %cst_67 : f32 to vector<16x128xf32>
    %107 = arith.maximumf %105, %106 : vector<16x128xf32>
    %108 = arith.truncf %107 : vector<16x128xf32> to vector<16x128xbf16>
    %c0_68 = arith.constant 0 : index
    %c0_69 = arith.constant 0 : index
    %109 = vector.load %arg17[%c0_68, %c0_69] : memref<128x256xbf16, #tpu.memory_space<vmem>>, vector<128x256xbf16>
    %cst_70 = arith.constant dense<0.000000e+00> : vector<16x256xf32>
    %110 = tpu.matmul %108, %109, %cst_70 {dimension_numbers = #tpu.dot_dimension_numbers<[1], [0], [0], [1], [0, 0, 1, 1], [], []>} : vector<16x128xbf16>, vector<128x256xbf16>, vector<16x256xf32> -> vector<16x256xf32>
    %c0_71 = arith.constant 0 : index
    %c1792 = arith.constant 1792 : index
    %111 = vector.load %arg2[%c0_71, %c1792] : memref<1x2944xf32, #tpu.memory_space<vmem>>, vector<1x256xf32>
    %112 = vector.broadcast %111 : vector<1x256xf32> to vector<16x256xf32>
    %113 = arith.addf %110, %112 : vector<16x256xf32>
    %c0_72 = arith.constant 0 : index
    %c0_73 = arith.constant 0 : index
    %114 = vector.load %arg18[%c0_72, %c0_73] : memref<128x256xbf16, #tpu.memory_space<vmem>>, vector<128x256xbf16>
    %cst_74 = arith.constant dense<0.000000e+00> : vector<16x256xf32>
    %115 = tpu.matmul %100, %114, %cst_74 {dimension_numbers = #tpu.dot_dimension_numbers<[1], [0], [0], [1], [0, 0, 1, 1], [], []>} : vector<16x128xbf16>, vector<128x256xbf16>, vector<16x256xf32> -> vector<16x256xf32>
    %c0_75 = arith.constant 0 : index
    %c2048 = arith.constant 2048 : index
    %116 = vector.load %arg2[%c0_75, %c2048] : memref<1x2944xf32, #tpu.memory_space<vmem>>, vector<1x256xf32>
    %117 = vector.broadcast %116 : vector<1x256xf32> to vector<16x256xf32>
    %118 = arith.addf %115, %117 : vector<16x256xf32>
    %119 = arith.addf %113, %118 : vector<16x256xf32>
    %cst_76 = arith.constant 0.000000e+00 : f32
    %120 = vector.broadcast %cst_76 : f32 to vector<16x256xf32>
    %121 = arith.maximumf %119, %120 : vector<16x256xf32>
    %122 = arith.truncf %121 : vector<16x256xf32> to vector<16x256xbf16>
    %c0_77 = arith.constant 0 : index
    %c0_78 = arith.constant 0 : index
    %123 = vector.load %arg19[%c0_77, %c0_78] : memref<256x256xbf16, #tpu.memory_space<vmem>>, vector<256x256xbf16>
    %cst_79 = arith.constant dense<0.000000e+00> : vector<16x256xf32>
    %124 = tpu.matmul %122, %123, %cst_79 {dimension_numbers = #tpu.dot_dimension_numbers<[1], [0], [0], [1], [0, 0, 1, 1], [], []>} : vector<16x256xbf16>, vector<256x256xbf16>, vector<16x256xf32> -> vector<16x256xf32>
    %c0_80 = arith.constant 0 : index
    %c2304 = arith.constant 2304 : index
    %125 = vector.load %arg2[%c0_80, %c2304] : memref<1x2944xf32, #tpu.memory_space<vmem>>, vector<1x256xf32>
    %126 = vector.broadcast %125 : vector<1x256xf32> to vector<16x256xf32>
    %127 = arith.addf %124, %126 : vector<16x256xf32>
    %cst_81 = arith.constant 0.000000e+00 : f32
    %128 = vector.broadcast %cst_81 : f32 to vector<16x256xf32>
    %129 = arith.maximumf %127, %128 : vector<16x256xf32>
    %130 = arith.truncf %129 : vector<16x256xf32> to vector<16x256xbf16>
    %c0_82 = arith.constant 0 : index
    %c0_83 = arith.constant 0 : index
    %131 = vector.load %arg20[%c0_82, %c0_83] : memref<256x256xbf16, #tpu.memory_space<vmem>>, vector<256x256xbf16>
    %cst_84 = arith.constant dense<0.000000e+00> : vector<16x256xf32>
    %132 = tpu.matmul %130, %131, %cst_84 {dimension_numbers = #tpu.dot_dimension_numbers<[1], [0], [0], [1], [0, 0, 1, 1], [], []>} : vector<16x256xbf16>, vector<256x256xbf16>, vector<16x256xf32> -> vector<16x256xf32>
    %c0_85 = arith.constant 0 : index
    %c2560 = arith.constant 2560 : index
    %133 = vector.load %arg2[%c0_85, %c2560] : memref<1x2944xf32, #tpu.memory_space<vmem>>, vector<1x256xf32>
    %134 = vector.broadcast %133 : vector<1x256xf32> to vector<16x256xf32>
    %135 = arith.addf %132, %134 : vector<16x256xf32>
    %136 = arith.addf %135, %121 : vector<16x256xf32>
    %cst_86 = arith.constant 0.000000e+00 : f32
    %137 = vector.broadcast %cst_86 : f32 to vector<16x256xf32>
    %138 = arith.maximumf %136, %137 : vector<16x256xf32>
    %139 = arith.truncf %138 : vector<16x256xf32> to vector<16x256xbf16>
    %c0_87 = arith.constant 0 : index
    %c0_88 = arith.constant 0 : index
    %140 = vector.load %arg21[%c0_87, %c0_88] : memref<256x128xbf16, #tpu.memory_space<vmem>>, vector<256x128xbf16>
    %cst_89 = arith.constant dense<0.000000e+00> : vector<16x128xf32>
    %141 = tpu.matmul %139, %140, %cst_89 {dimension_numbers = #tpu.dot_dimension_numbers<[1], [0], [0], [1], [0, 0, 1, 1], [], []>} : vector<16x256xbf16>, vector<256x128xbf16>, vector<16x128xf32> -> vector<16x128xf32>
    %c0_90 = arith.constant 0 : index
    %c2816 = arith.constant 2816 : index
    %142 = vector.load %arg2[%c0_90, %c2816] : memref<1x2944xf32, #tpu.memory_space<vmem>>, vector<1x128xf32>
    %143 = vector.broadcast %142 : vector<1x128xf32> to vector<16x128xf32>
    %144 = arith.addf %141, %143 : vector<16x128xf32>
    %145 = arith.truncf %144 : vector<16x128xf32> to vector<16x128xbf16>
    %c0_91 = arith.constant 0 : index
    %c0_92 = arith.constant 0 : index
    %146 = vector.load %arg22[%c0_91, %c0_92] : memref<16x128xbf16, #tpu.memory_space<vmem>>, vector<16x128xbf16>
    tpu.vector_store %arg22[%c0_91, %c0_92], %145 {strides = array<i32>} : memref<16x128xbf16, #tpu.memory_space<vmem>>, vector<16x128xbf16>,
    return
  }
  func.func @transform_0(%arg0: i32) -> (i32, i32) {
    %c0_i32 = arith.constant 0 : i32
    %c0_i32_0 = arith.constant 0 : i32
    return %arg0, %c0_i32 : i32, i32
  }
  func.func @transform_1(%arg0: i32) -> (i32, i32) {
    %c0_i32 = arith.constant 0 : i32
    %c0_i32_0 = arith.constant 0 : i32
    %c0_i32_1 = arith.constant 0 : i32
    return %c0_i32, %c0_i32_0 : i32, i32
  }
  func.func @transform_2(%arg0: i32) -> (i32, i32) {
    %c0_i32 = arith.constant 0 : i32
    %c0_i32_0 = arith.constant 0 : i32
    %c0_i32_1 = arith.constant 0 : i32
    return %c0_i32, %c0_i32_0 : i32, i32
  }
  func.func @transform_3(%arg0: i32) -> (i32, i32) {
    %c0_i32 = arith.constant 0 : i32
    %c0_i32_0 = arith.constant 0 : i32
    %c0_i32_1 = arith.constant 0 : i32
    return %c0_i32, %c0_i32_0 : i32, i32
  }
  func.func @transform_4(%arg0: i32) -> (i32, i32) {
    %c0_i32 = arith.constant 0 : i32
    %c0_i32_0 = arith.constant 0 : i32
    %c0_i32_1 = arith.constant 0 : i32
    return %c0_i32, %c0_i32_0 : i32, i32
  }
  func.func @transform_5(%arg0: i32) -> (i32, i32) {
    %c0_i32 = arith.constant 0 : i32
    %c0_i32_0 = arith.constant 0 : i32
    %c0_i32_1 = arith.constant 0 : i32
    return %c0_i32, %c0_i32_0 : i32, i32
  }
  func.func @transform_6(%arg0: i32) -> (i32, i32) {
    %c0_i32 = arith.constant 0 : i32
    %c0_i32_0 = arith.constant 0 : i32
    %c0_i32_1 = arith.constant 0 : i32
    return %c0_i32, %c0_i32_0 : i32, i32
  }
  func.func @transform_7(%arg0: i32) -> (i32, i32) {
    %c0_i32 = arith.constant 0 : i32
    %c0_i32_0 = arith.constant 0 : i32
    %c0_i32_1 = arith.constant 0 : i32
    return %c0_i32, %c0_i32_0 : i32, i32
  }
  func.func @transform_8(%arg0: i32) -> (i32, i32) {
    %c0_i32 = arith.constant 0 : i32
    %c0_i32_0 = arith.constant 0 : i32
    %c0_i32_1 = arith.constant 0 : i32
    return %c0_i32, %c0_i32_0 : i32, i32
  }
  func.func @transform_9(%arg0: i32) -> (i32, i32) {
    %c0_i32 = arith.constant 0 : i32
    %c0_i32_0 = arith.constant 0 : i32
    %c0_i32_1 = arith.constant 0 : i32
    return %c0_i32, %c0_i32_0 : i32, i32
  }
  func.func @transform_10(%arg0: i32) -> (i32, i32) {
    %c0_i32 = arith.constant 0 : i32
    %c0_i32_0 = arith.constant 0 : i32
    %c0_i32_1 = arith.constant 0 : i32
    return %c0_i32, %c0_i32_0 : i32, i32
  }
  func.func @transform_11(%arg0: i32) -> (i32, i32) {
    %c0_i32 = arith.constant 0 : i32
    %c0_i32_0 = arith.constant 0 : i32
    %c0_i32_1 = arith.constant 0 : i32
    return %c0_i32, %c0_i32_0 : i32, i32
  }
  func.func @transform_12(%arg0: i32) -> (i32, i32) {
    %c0_i32 = arith.constant 0 : i32
    %c0_i32_0 = arith.constant 0 : i32
    %c0_i32_1 = arith.constant 0 : i32
    return %c0_i32, %c0_i32_0 : i32, i32
  }
  func.func @transform_13(%arg0: i32) -> (i32, i32) {
    %c0_i32 = arith.constant 0 : i32
    %c0_i32_0 = arith.constant 0 : i32
    %c0_i32_1 = arith.constant 0 : i32
    return %c0_i32, %c0_i32_0 : i32, i32
  }
  func.func @transform_14(%arg0: i32) -> (i32, i32) {
    %c0_i32 = arith.constant 0 : i32
    %c0_i32_0 = arith.constant 0 : i32
    %c0_i32_1 = arith.constant 0 : i32
    return %c0_i32, %c0_i32_0 : i32, i32
  }
  func.func @transform_15(%arg0: i32) -> (i32, i32) {
    %c0_i32 = arith.constant 0 : i32
    %c0_i32_0 = arith.constant 0 : i32
    %c0_i32_1 = arith.constant 0 : i32
    return %c0_i32, %c0_i32_0 : i32, i32
  }
  func.func @transform_16(%arg0: i32) -> (i32, i32) {
    %c0_i32 = arith.constant 0 : i32
    %c0_i32_0 = arith.constant 0 : i32
    %c0_i32_1 = arith.constant 0 : i32
    return %c0_i32, %c0_i32_0 : i32, i32
  }
  func.func @transform_17(%arg0: i32) -> (i32, i32) {
    %c0_i32 = arith.constant 0 : i32
    %c0_i32_0 = arith.constant 0 : i32
    %c0_i32_1 = arith.constant 0 : i32
    return %c0_i32, %c0_i32_0 : i32, i32
  }
  func.func @transform_18(%arg0: i32) -> (i32, i32) {
    %c0_i32 = arith.constant 0 : i32
    %c0_i32_0 = arith.constant 0 : i32
    %c0_i32_1 = arith.constant 0 : i32
    return %c0_i32, %c0_i32_0 : i32, i32
  }
  func.func @transform_19(%arg0: i32) -> (i32, i32) {
    %c0_i32 = arith.constant 0 : i32
    %c0_i32_0 = arith.constant 0 : i32
    %c0_i32_1 = arith.constant 0 : i32
    return %c0_i32, %c0_i32_0 : i32, i32
  }
  func.func @transform_20(%arg0: i32) -> (i32, i32) {
    %c0_i32 = arith.constant 0 : i32
    %c0_i32_0 = arith.constant 0 : i32
    %c0_i32_1 = arith.constant 0 : i32
    return %c0_i32, %c0_i32_0 : i32, i32
  }
  func.func @transform_21(%arg0: i32) -> (i32, i32) {
    %c0_i32 = arith.constant 0 : i32
    %c0_i32_0 = arith.constant 0 : i32
    return %arg0, %c0_i32 : i32, i32
  }
}

</mosaic_0001>

<bundles_post_ra>
// kernel: tpu_custom_call.1
= control target key start
LH: loop header
LB: loop body
LE: loop exit
PB: predicated region body
PF: predicated region fallthrough
CT: control target
= control target key end

     0   :  { %s5259_s0 = inlined_call_operand.hbm [shape: bf16[16,128], index: 0, kind: input, shape index: {}]   ;;  %s5260_s1 = inlined_call_operand.hbm [shape: f32[1,2944], index: 1, kind: input, shape index: {}]   ;;  %s5261_s2 = inlined_call_operand.hbm [shape: bf16[128,128], index: 2, kind: input, shape index: {}]   ;;  %s5262_s3 = inlined_call_operand.hbm [shape: bf16[128,128], index: 3, kind: input, shape index: {}]   ;;  %s5263_s4 = inlined_call_operand.hbm [shape: bf16[128,128], index: 4, kind: input, shape index: {}]   ;;  %s5264_s5 = inlined_call_operand.hbm [shape: bf16[128,128], index: 5, kind: input, shape index: {}]   ;;  %s5265_s6 = inlined_call_operand.hbm [shape: bf16[128,128], index: 6, kind: input, shape index: {}]   ;;  %s5266_s7 = inlined_call_operand.hbm [shape: bf16[128,128], index: 7, kind: input, shape index: {}]   ;;  %s5267_s8 = inlined_call_operand.hbm [shape: bf16[128,128], index: 8, kind: input, shape index: {}]   ;;  %s5268_s9 = inlined_call_operand.hbm [shape: bf16[128,128], index: 9, kind: input, shape index: {}]   ;;  %s5269_s10 = inlined_call_operand.hbm [shape: bf16[128,128], index: 10, kind: input, shape index: {}]   ;;  %s5270_s11 = inlined_call_operand.hbm [shape: bf16[128,128], index: 11, kind: input, shape index: {}]   ;;  %s5271_s12 = inlined_call_operand.hbm [shape: bf16[128,128], index: 12, kind: input, shape index: {}]   ;;  %s5272_s13 = inlined_call_operand.hbm [shape: bf16[128,128], index: 13, kind: input, shape index: {}]   ;;  %s5273_s14 = inlined_call_operand.hbm [shape: bf16[128,128], index: 14, kind: input, shape index: {}]   ;;  %s5274_s15 = inlined_call_operand.hbm [shape: bf16[128,128], index: 15, kind: input, shape index: {}]   ;;  %s5275_s16 = inlined_call_operand.hbm [shape: bf16[128,256], index: 16, kind: input, shape index: {}]   ;;  %s5276_s17 = inlined_call_operand.hbm [shape: bf16[128,256], index: 17, kind: input, shape index: {}]   ;;  %s5277_s18 = inlined_call_operand.hbm [shape: bf16[256,256], index: 18, kind: input, shape index: {}]   ;;  %s5278_s19 = inlined_call_operand.hbm [shape: bf16[256,256], index: 19, kind: input, shape index: {}]   ;;  %s5279_s20 = inlined_call_operand.hbm [shape: bf16[256,128], index: 20, kind: input, shape index: {}]   ;;  %s5280_s21 = inlined_call_operand.hbm [shape: bf16[16,128], index: 21, kind: output, shape index: {}]  }
   0x1   :  { %5289 = sst [smem:[#allocation48_spill]] %s5259_s0 }
   0x2   :  { %5290 = sst [smem:[#allocation49_spill]] %s5260_s1 }
   0x3   :  { %5291 = sst [smem:[#allocation50_spill]] %s5261_s2 }
   0x4   :  { %5292 = sst [smem:[#allocation51_spill]] %s5262_s3 }
   0x5   :  { %5293 = sst [smem:[#allocation52_spill]] %s5263_s4 }
   0x6   :  { %5294 = sst [smem:[#allocation53_spill]] %s5264_s5 }
   0x7   :  { %5295 = sst [smem:[#allocation54_spill]] %s5279_s20 }
   0x8   :  { %5296 = sst [smem:[#allocation55_spill]] %s5280_s21 }
   0x9   :  { %26 = vsyncpa [#allocation3], 0 }
   0xa   :  { %27 = vsyncpa [#allocation6], 0 }
   0xb   :  { %28 = vsyncpa [#allocation9], 0 }
   0xc   :  { %29 = vsyncpa [#allocation12], 0 }
   0xd   :  { %30 = vsyncpa [#allocation15], 0 }
   0xe   :  { %31 = vsyncpa [#allocation18], 0 }
   0xf   :  { %32 = vsyncpa [#allocation21], 0 }
  0x10   :  { %33 = vsyncpa [#allocation24], 0 }
  0x11   :  { %34 = vsyncpa [#allocation27], 0 }
  0x12   :  { %35 = vsyncpa [#allocation30], 0 }
  0x13   :  { %36 = vsyncpa [#allocation33], 0 }
  0x14   :  { %37 = vsyncpa [#allocation4], 0  ;;  %s4529_s2 = smov [#allocation5]   ;;  %s5297_s3 = sld [smem:[#allocation49_spill]] }
  0x15   :  { %s56_s25 = sshll.u32 %s4529_s2, 4  ;;  %s57_s25 = int_to_ptr.vmem [resolvable:$true] %s56_s25 }
  0x1a   :  { %s4021_s28 = scalar_lea.hbm %s5297_s3, 368 }
  0x1b   :  { %p4022_p0 = scmp.ne.s32.totalorder %s5297_s3, %s4021_s28  ;;  %p4025_p1 = scmp.lt.u32.totalorder %s4021_s28, %s5297_s3 }
  0x1d   :  { %p4027_p2 = pnand %p4025_p1, %p4022_p0 }
  0x1f   :  { %4030 = shalt.err (!%p4027_p2)
}
  0x20   :  { %s4031_s5 = scalar_lea.vmem %s57_s25, 368  ;;  %s4035_s22 = scalar_lea.vmem %s57_s25, 384 }
  0x21   :  { %p4032_p3 = scmp.ne.s32.totalorder %s57_s25, %s4031_s5  ;;  %p4036_p4 = scmp.lt.s32.totalorder %s57_s25, %s57_s25 }
  0x22   :  { %p4037_p5 = scmp.lt.s32.totalorder %s4035_s22, %s4031_s5 }
  0x24   :  { %p4038_p6 = por %p4037_p5, %p4036_p4 }
  0x26   :  { %p4039_p7 = pnand %p4038_p6, %p4032_p3 }
  0x28   :  { %4042 = shalt.err (!%p4039_p7)
}
  0x29   :  { %59 = dma.hbm_to_vmem [thread:$0]  %s5297_s3, 368, %s57_s25, [#allocation6]  }
  0x2a   :  { %s4530_s24 = smov [#allocation8]   ;;  %s4531_s26 = smov [#allocation11]  }
  0x2b   :  { %s77_s2 = sshll.u32 %s4530_s24, 4  ;;  %s101_s27 = sshll.u32 %s4531_s26, 4  ;;  %s78_s2 = int_to_ptr.vmem [resolvable:$true] %s77_s2  ;;  %s102_s27 = int_to_ptr.vmem [resolvable:$true] %s101_s27 }
  0x2c   :  { %s5298_s0 = sld [smem:[#allocation51_spill]] }
  0x32   :  { %s4043_s4 = scalar_lea.hbm %s5298_s0, 1024 }
  0x33   :  { %p4044_p8 = scmp.ne.s32.totalorder %s5298_s0, %s4043_s4  ;;  %p4047_p9 = scmp.lt.u32.totalorder %s4043_s4, %s5298_s0 }
  0x35   :  { %p4049_p10 = pnand %p4047_p9, %p4044_p8 }
  0x37   :  { %4052 = shalt.err (!%p4049_p10)
}
  0x38   :  { %s4053_s25 = scalar_lea.vmem %s78_s2, 1024  ;;  %p4058_p12 = scmp.lt.s32.totalorder %s78_s2, %s78_s2 }
  0x39   :  { %p4054_p11 = scmp.ne.s32.totalorder %s78_s2, %s4053_s25  ;;  %p4059_p13 = scmp.lt.s32.totalorder %s4053_s25, %s4053_s25 }
  0x3b   :  { %p4060_p0 = por %p4059_p13, %p4058_p12 }
  0x3d   :  { %p4061_p1 = pnand %p4060_p0, %p4054_p11 }
  0x3f   :  { %4064 = shalt.err (!%p4061_p1)
}
  0x40   :  { %s4532_s3 = smov 64   ;;  %s4533_s23 = smov 4  }
  0x41   :  { %83 = dma.hbm_to_vmem [thread:$0]  %s5298_s0, 1024, %s78_s2, [#allocation9], %s4532_s3, %s4532_s3, %s4533_s23  }
  0x42   :  { %s5299_s28 = sld [smem:[#allocation53_spill]] }
  0x48   :  { %s4065_s29 = scalar_lea.hbm %s5299_s28, 1024 }
  0x49   :  { %p4066_p2 = scmp.ne.s32.totalorder %s5299_s28, %s4065_s29  ;;  %p4069_p3 = scmp.lt.u32.totalorder %s4065_s29, %s5299_s28 }
  0x4b   :  { %p4071_p4 = pnand %p4069_p3, %p4066_p2 }
  0x4d   :  { %4074 = shalt.err (!%p4071_p4)
}
  0x4e   :  { %s4075_s25 = scalar_lea.vmem %s102_s27, 1024  ;;  %p4080_p6 = scmp.lt.s32.totalorder %s102_s27, %s102_s27 }
  0x4f   :  { %p4076_p5 = scmp.ne.s32.totalorder %s102_s27, %s4075_s25  ;;  %p4081_p7 = scmp.lt.s32.totalorder %s4075_s25, %s4075_s25 }
  0x51   :  { %p4082_p8 = por %p4081_p7, %p4080_p6 }
  0x53   :  { %p4083_p9 = pnand %p4082_p8, %p4076_p5 }
  0x55   :  { %4086 = shalt.err (!%p4083_p9)
}
  0x56   :  { %107 = dma.hbm_to_vmem [thread:$0]  %s5299_s28, 1024, %s102_s27, [#allocation12], %s4532_s3, %s4532_s3, %s4533_s23  }
  0x57   :  { %s4534_s21 = smov [#allocation14]   ;;  %s4535_s24 = smov [#allocation17]  }
  0x58   :  { %s125_s1 = sshll.u32 %s4534_s21, 4  ;;  %s149_s26 = sshll.u32 %s4535_s24, 4  ;;  %s126_s1 = int_to_ptr.vmem [resolvable:$true] %s125_s1  ;;  %s150_s26 = int_to_ptr.vmem [resolvable:$true] %s149_s26 }
  0x59   :  { %s4087_s30 = scalar_lea.hbm %s5266_s7, 1024 }
  0x5a   :  { %p4088_p10 = scmp.ne.s32.totalorder %s5266_s7, %s4087_s30  ;;  %p4091_p11 = scmp.lt.u32.totalorder %s4087_s30, %s5266_s7 }
  0x5c   :  { %p4093_p12 = pnand %p4091_p11, %p4088_p10 }
  0x5e   :  { %4096 = shalt.err (!%p4093_p12)
}
  0x5f   :  { %s4097_s27 = scalar_lea.vmem %s126_s1, 1024  ;;  %p4102_p0 = scmp.lt.s32.totalorder %s126_s1, %s126_s1 }
  0x60   :  { %p4098_p13 = scmp.ne.s32.totalorder %s126_s1, %s4097_s27  ;;  %p4103_p1 = scmp.lt.s32.totalorder %s4097_s27, %s4097_s27 }
  0x62   :  { %p4104_p2 = por %p4103_p1, %p4102_p0 }
  0x64   :  { %p4105_p3 = pnand %p4104_p2, %p4098_p13 }
  0x66   :  { %4108 = shalt.err (!%p4105_p3)
}
  0x67   :  { %131 = dma.hbm_to_vmem [thread:$0]  %s5266_s7, 1024, %s126_s1, [#allocation15], %s4532_s3, %s4532_s3, %s4533_s23  }
  0x68   :  { %s4109_s21 = scalar_lea.hbm %s5268_s9, 1024 }
  0x69   :  { %p4110_p4 = scmp.ne.s32.totalorder %s5268_s9, %s4109_s21  ;;  %p4113_p5 = scmp.lt.u32.totalorder %s4109_s21, %s5268_s9 }
  0x6b   :  { %p4115_p6 = pnand %p4113_p5, %p4110_p4 }
  0x6d   :  { %4118 = shalt.err (!%p4115_p6)
}
  0x6e   :  { %s4119_s5 = scalar_lea.vmem %s150_s26, 1024  ;;  %p4124_p8 = scmp.lt.s32.totalorder %s150_s26, %s150_s26 }
  0x6f   :  { %p4120_p7 = scmp.ne.s32.totalorder %s150_s26, %s4119_s5  ;;  %p4125_p9 = scmp.lt.s32.totalorder %s4119_s5, %s4119_s5 }
  0x71   :  { %p4126_p10 = por %p4125_p9, %p4124_p8 }
  0x73   :  { %p4127_p11 = pnand %p4126_p10, %p4120_p7 }
  0x75   :  { %4130 = shalt.err (!%p4127_p11)
}
  0x76   :  { %155 = dma.hbm_to_vmem [thread:$0]  %s5268_s9, 1024, %s150_s26, [#allocation18], %s4532_s3, %s4532_s3, %s4533_s23  }
  0x77   :  { %s4536_s22 = smov [#allocation20]   ;;  %s4537_s27 = smov [#allocation23]  }
  0x78   :  { %s173_s25 = sshll.u32 %s4536_s22, 4  ;;  %s197_s28 = sshll.u32 %s4537_s27, 4  ;;  %s174_s25 = int_to_ptr.vmem [resolvable:$true] %s173_s25  ;;  %s198_s28 = int_to_ptr.vmem [resolvable:$true] %s197_s28 }
  0x79   :  { %s4131_s20 = scalar_lea.hbm %s5270_s11, 1024 }
  0x7a   :  { %p4132_p12 = scmp.ne.s32.totalorder %s5270_s11, %s4131_s20  ;;  %p4135_p13 = scmp.lt.u32.totalorder %s4131_s20, %s5270_s11 }
  0x7c   :  { %p4137_p0 = pnand %p4135_p13, %p4132_p12 }
  0x7e   :  { %4140 = shalt.err (!%p4137_p0)
}
  0x7f   :  { %s4141_s9 = scalar_lea.vmem %s174_s25, 1024  ;;  %p4146_p2 = scmp.lt.s32.totalorder %s174_s25, %s174_s25 }
  0x80   :  { %p4142_p1 = scmp.ne.s32.totalorder %s174_s25, %s4141_s9  ;;  %p4147_p3 = scmp.lt.s32.totalorder %s4141_s9, %s4141_s9 }
  0x82   :  { %p4148_p4 = por %p4147_p3, %p4146_p2 }
  0x84   :  { %p4149_p5 = pnand %p4148_p4, %p4142_p1 }
  0x86   :  { %4152 = shalt.err (!%p4149_p5)
}
  0x87   :  { %179 = dma.hbm_to_vmem [thread:$0]  %s5270_s11, 1024, %s174_s25, [#allocation21], %s4532_s3, %s4532_s3, %s4533_s23  }
  0x88   :  { %s4153_s1 = scalar_lea.hbm %s5272_s13, 1024 }
  0x89   :  { %p4154_p6 = scmp.ne.s32.totalorder %s5272_s13, %s4153_s1  ;;  %p4157_p7 = scmp.lt.u32.totalorder %s4153_s1, %s5272_s13 }
  0x8b   :  { %p4159_p8 = pnand %p4157_p7, %p4154_p6 }
  0x8d   :  { %4162 = shalt.err (!%p4159_p8)
}
  0x8e   :  { %s4163_s20 = scalar_lea.vmem %s198_s28, 1024  ;;  %p4168_p10 = scmp.lt.s32.totalorder %s198_s28, %s198_s28 }
  0x8f   :  { %p4164_p9 = scmp.ne.s32.totalorder %s198_s28, %s4163_s20  ;;  %p4169_p11 = scmp.lt.s32.totalorder %s4163_s20, %s4163_s20 }
  0x91   :  { %p4170_p12 = por %p4169_p11, %p4168_p10 }
  0x93   :  { %p4171_p13 = pnand %p4170_p12, %p4164_p9 }
  0x95   :  { %4174 = shalt.err (!%p4171_p13)
}
  0x96   :  { %203 = dma.hbm_to_vmem [thread:$0]  %s5272_s13, 1024, %s198_s28, [#allocation24], %s4532_s3, %s4532_s3, %s4533_s23  }
  0x97   :  { %s4538_s21 = smov [#allocation26]   ;;  %s4175_s9 = scalar_lea.hbm %s5274_s15, 1024 }
  0x98   :  { %s221_s24 = sshll.u32 %s4538_s21, 4  ;;  %p4176_p0 = scmp.ne.s32.totalorder %s5274_s15, %s4175_s9  ;;  %s222_s24 = int_to_ptr.vmem [resolvable:$true] %s221_s24 }
  0x99   :  { %p4179_p1 = scmp.lt.u32.totalorder %s4175_s9, %s5274_s15 }
  0x9b   :  { %p4181_p2 = pnand %p4179_p1, %p4176_p0 }
  0x9d   :  { %4184 = shalt.err (!%p4181_p2)
}
  0x9e   :  { %s4185_s1 = scalar_lea.vmem %s222_s24, 1024  ;;  %p4190_p4 = scmp.lt.s32.totalorder %s222_s24, %s222_s24 }
  0x9f   :  { %p4186_p3 = scmp.ne.s32.totalorder %s222_s24, %s4185_s1  ;;  %p4191_p5 = scmp.lt.s32.totalorder %s4185_s1, %s4185_s1 }
  0xa1   :  { %p4192_p6 = por %p4191_p5, %p4190_p4 }
  0xa3   :  { %p4193_p7 = pnand %p4192_p6, %p4186_p3 }
  0xa5   :  { %4196 = shalt.err (!%p4193_p7)
}
  0xa6   :  { %227 = dma.hbm_to_vmem [thread:$0]  %s5274_s15, 1024, %s222_s24, [#allocation27], %s4532_s3, %s4532_s3, %s4533_s23  }
  0xa7   :  { %s4539_s22 = smov [#allocation29]   ;;  %s4540_s2 = smov [#allocation32]  }
  0xa8   :  { %s245_s27 = sshll.u32 %s4539_s22, 4  ;;  %s269_s0 = sshll.u32 %s4540_s2, 4  ;;  %s246_s27 = int_to_ptr.vmem [resolvable:$true] %s245_s27  ;;  %s4785_s0 = int_to_ptr.vmem [resolvable:$true] %s269_s0 }
  0xa9   :  { %s4197_s25 = scalar_lea.hbm %s5276_s17, 2048 }
  0xaa   :  { %p4198_p8 = scmp.ne.s32.totalorder %s5276_s17, %s4197_s25  ;;  %p4201_p9 = scmp.lt.u32.totalorder %s4197_s25, %s5276_s17 }
  0xac   :  { %p4203_p10 = pnand %p4201_p9, %p4198_p8 }
  0xae   :  { %4206 = shalt.err (!%p4203_p10)
}
  0xaf   :  { %s4207_s15 = scalar_lea.vmem %s246_s27, 2048  ;;  %p4212_p12 = scmp.lt.s32.totalorder %s246_s27, %s246_s27 }
  0xb0   :  { %p4208_p11 = scmp.ne.s32.totalorder %s246_s27, %s4207_s15  ;;  %p4213_p13 = scmp.lt.s32.totalorder %s4207_s15, %s4207_s15 }
  0xb2   :  { %p4214_p0 = por %p4213_p13, %p4212_p12 }
  0xb4   :  { %p4215_p1 = pnand %p4214_p0, %p4208_p11 }
  0xb6   :  { %4218 = shalt.err (!%p4215_p1)
}
  0xb7   :  { %s4541_s24 = smov 128   ;;  %s4542_s26 = smov 8  }
  0xb8   :  { %251 = dma.hbm_to_vmem [thread:$0]  %s5276_s17, 2048, %s246_s27, [#allocation30], %s4541_s24, %s4541_s24, %s4542_s26  }
  0xb9   :  { %s4219_s13 = scalar_lea.hbm %s5278_s19, 4096 }
  0xba   :  { %p4220_p2 = scmp.ne.s32.totalorder %s5278_s19, %s4219_s13  ;;  %p4223_p3 = scmp.lt.u32.totalorder %s4219_s13, %s5278_s19 }
  0xbc   :  { %p4225_p4 = pnand %p4223_p3, %p4220_p2 }
  0xbe   :  { %4228 = shalt.err (!%p4225_p4)
}
  0xbf   :  { %s4229_s11 = scalar_lea.vmem %s4785_s0, 4096  ;;  %p4234_p6 = scmp.lt.s32.totalorder %s4785_s0, %s4785_s0 }
  0xc0   :  { %p4230_p5 = scmp.ne.s32.totalorder %s4785_s0, %s4229_s11  ;;  %p4235_p7 = scmp.lt.s32.totalorder %s4229_s11, %s4229_s11 }
  0xc2   :  { %p4236_p8 = por %p4235_p7, %p4234_p6 }
  0xc4   :  { %p4237_p9 = pnand %p4236_p8, %p4230_p5 }
  0xc6   :  { %4240 = shalt.err (!%p4237_p9)
}
  0xc7   :  { %275 = dma.hbm_to_vmem [thread:$0]  %s5278_s19, 4096, %s4785_s0, [#allocation33], %s4541_s24, %s4541_s24, %s4542_s26  }
  0xc8   :  { %s4543_s25 = smov [#allocation2]   ;;  %s4544_s29 = smov [#allocation7]  }
  0xc9   :  { %s43_s21 = sshll.u32 %s4543_s25, 4  ;;  %s65_s4 = sshll.u32 %s4544_s29, 4  ;;  %s44_s21 = int_to_ptr.vmem [resolvable:$true] %s43_s21  ;;  %s4822_s4 = int_to_ptr.vmem [resolvable:$true] %s65_s4 }
  0xca   :  { %s5300_s30 = sld [smem:[#allocation48_spill]] }
  0xd0   :  { %s4241_s5 = scalar_lea.hbm %s5300_s30, 128 }
  0xd1   :  { %p4242_p10 = scmp.ne.s32.totalorder %s5300_s30, %s4241_s5  ;;  %p4245_p11 = scmp.lt.u32.totalorder %s4241_s5, %s5300_s30 }
  0xd3   :  { %p4247_p12 = pnand %p4245_p11, %p4242_p10 }
  0xd5   :  { %4250 = shalt.err (!%p4247_p12)
}
  0xd6   :  { %s4251_s19 = scalar_lea.vmem %s44_s21, 128  ;;  %p4256_p0 = scmp.lt.s32.totalorder %s44_s21, %s44_s21 }
  0xd7   :  { %p4252_p13 = scmp.ne.s32.totalorder %s44_s21, %s4251_s19  ;;  %p4257_p1 = scmp.lt.s32.totalorder %s4251_s19, %s4251_s19 }
  0xd9   :  { %p4258_p2 = por %p4257_p1, %p4256_p0 }
  0xdb   :  { %p4259_p3 = pnand %p4258_p2, %p4252_p13 }
  0xdd   :  { %4262 = shalt.err (!%p4259_p3)
}
  0xde   :  { %49 = dma.hbm_to_vmem [thread:$0]  %s5300_s30, 128, %s44_s21, [#allocation3], %s4532_s3, %s4532_s3, %s4533_s23  }
  0xdf   :  { %s5301_s11 = sld [smem:[#allocation50_spill]] }
  0xe5   :  { %s4263_s17 = scalar_lea.hbm %s5301_s11, 1024 }
  0xe6   :  { %p4264_p4 = scmp.ne.s32.totalorder %s5301_s11, %s4263_s17  ;;  %p4267_p5 = scmp.lt.u32.totalorder %s4263_s17, %s5301_s11 }
  0xe8   :  { %p4269_p6 = pnand %p4267_p5, %p4264_p4 }
  0xea   :  { %4272 = shalt.err (!%p4269_p6)
}
  0xeb   :  { %s4273_s15 = scalar_lea.vmem %s4822_s4, 1024  ;;  %p4278_p8 = scmp.lt.s32.totalorder %s4822_s4, %s4822_s4 }
  0xec   :  { %p4274_p7 = scmp.ne.s32.totalorder %s4822_s4, %s4273_s15  ;;  %p4279_p9 = scmp.lt.s32.totalorder %s4273_s15, %s4273_s15 }
  0xee   :  { %p4280_p10 = por %p4279_p9, %p4278_p8 }
  0xf0   :  { %p4281_p11 = pnand %p4280_p10, %p4274_p7 }
  0xf2   :  { %4284 = shalt.err (!%p4281_p11)
}
  0xf3   :  { %71 = dma.hbm_to_vmem [thread:$0]  %s5301_s11, 1024, %s4822_s4, [#allocation6], %s4532_s3, %s4532_s3, %s4533_s23  }
  0xf4   :  { %s4545_s5 = smov [#allocation10]   ;;  %s4546_s1 = smov [#allocation13]  }
  0xf5   :  { %s89_s7 = sshll.u32 %s4545_s5, 4  ;;  %s113_s13 = sshll.u32 %s4546_s1, 4  ;;  %s90_s7 = int_to_ptr.vmem [resolvable:$true] %s89_s7  ;;  %s4859_s13 = int_to_ptr.vmem [resolvable:$true] %s113_s13 }
  0xf6   :  { %s5302_s0 = sld [smem:[#allocation52_spill]] }
  0xfc   :  { %s4285_s22 = scalar_lea.hbm %s5302_s0, 1024 }
  0xfd   :  { %p4286_p12 = scmp.ne.s32.totalorder %s5302_s0, %s4285_s22  ;;  %p4289_p13 = scmp.lt.u32.totalorder %s4285_s22, %s5302_s0 }
  0xff   :  { %p4291_p0 = pnand %p4289_p13, %p4286_p12 }
 0x101   :  { %4294 = shalt.err (!%p4291_p0)
}
 0x102   :  { %s4295_s4 = scalar_lea.vmem %s90_s7, 1024  ;;  %p4300_p2 = scmp.lt.s32.totalorder %s90_s7, %s90_s7 }
 0x103   :  { %p4296_p1 = scmp.ne.s32.totalorder %s90_s7, %s4295_s4  ;;  %p4301_p3 = scmp.lt.s32.totalorder %s4295_s4, %s4295_s4 }
 0x105   :  { %p4302_p4 = por %p4301_p3, %p4300_p2 }
 0x107   :  { %p4303_p5 = pnand %p4302_p4, %p4296_p1 }
 0x109   :  { %4306 = shalt.err (!%p4303_p5)
}
 0x10a   :  { %95 = dma.hbm_to_vmem [thread:$0]  %s5302_s0, 1024, %s90_s7, [#allocation9], %s4532_s3, %s4532_s3, %s4533_s23  }
 0x10b   :  { %s4307_s15 = scalar_lea.hbm %s5265_s6, 1024 }
 0x10c   :  { %p4308_p6 = scmp.ne.s32.totalorder %s5265_s6, %s4307_s15  ;;  %p4311_p7 = scmp.lt.u32.totalorder %s4307_s15, %s5265_s6 }
 0x10e   :  { %p4313_p8 = pnand %p4311_p7, %p4308_p6 }
 0x110   :  { %4316 = shalt.err (!%p4313_p8)
}
 0x111   :  { %s4317_s28 = scalar_lea.vmem %s4859_s13, 1024  ;;  %p4322_p10 = scmp.lt.s32.totalorder %s4859_s13, %s4859_s13 }
 0x112   :  { %p4318_p9 = scmp.ne.s32.totalorder %s4859_s13, %s4317_s28  ;;  %p4323_p11 = scmp.lt.s32.totalorder %s4317_s28, %s4317_s28 }
 0x114   :  { %p4324_p12 = por %p4323_p11, %p4322_p10 }
 0x116   :  { %p4325_p13 = pnand %p4324_p12, %p4318_p9 }
 0x118   :  { %4328 = shalt.err (!%p4325_p13)
}
 0x119   :  { %119 = dma.hbm_to_vmem [thread:$0]  %s5265_s6, 1024, %s4859_s13, [#allocation12], %s4532_s3, %s4532_s3, %s4533_s23  }
 0x11a   :  { %s4547_s0 = smov [#allocation16]   ;;  %s4548_s2 = smov [#allocation19]  }
 0x11b   :  { %s137_s22 = sshll.u32 %s4547_s0, 4  ;;  %s161_s20 = sshll.u32 %s4548_s2, 4  ;;  %s138_s22 = int_to_ptr.vmem [resolvable:$true] %s137_s22  ;;  %s4896_s20 = int_to_ptr.vmem [resolvable:$true] %s161_s20 }
 0x11c   :  { %s4329_s4 = scalar_lea.hbm %s5267_s8, 1024 }
 0x11d   :  { %p4330_p0 = scmp.ne.s32.totalorder %s5267_s8, %s4329_s4  ;;  %p4333_p1 = scmp.lt.u32.totalorder %s4329_s4, %s5267_s8 }
 0x11f   :  { %p4335_p2 = pnand %p4333_p1, %p4330_p0 }
 0x121   :  { %4338 = shalt.err (!%p4335_p2)
}
 0x122   :  { %s4339_s6 = scalar_lea.vmem %s138_s22, 1024  ;;  %p4344_p4 = scmp.lt.s32.totalorder %s138_s22, %s138_s22 }
 0x123   :  { %p4340_p3 = scmp.ne.s32.totalorder %s138_s22, %s4339_s6  ;;  %p4345_p5 = scmp.lt.s32.totalorder %s4339_s6, %s4339_s6 }
 0x125   :  { %p4346_p6 = por %p4345_p5, %p4344_p4 }
 0x127   :  { %p4347_p7 = pnand %p4346_p6, %p4340_p3 }
 0x129   :  { %4350 = shalt.err (!%p4347_p7)
}
 0x12a   :  { %143 = dma.hbm_to_vmem [thread:$0]  %s5267_s8, 1024, %s138_s22, [#allocation15], %s4532_s3, %s4532_s3, %s4533_s23  }
 0x12b   :  { %s4351_s5 = scalar_lea.hbm %s5269_s10, 1024 }
 0x12c   :  { %p4352_p8 = scmp.ne.s32.totalorder %s5269_s10, %s4351_s5  ;;  %p4355_p9 = scmp.lt.u32.totalorder %s4351_s5, %s5269_s10 }
 0x12e   :  { %p4357_p10 = pnand %p4355_p9, %p4352_p8 }
 0x130   :  { %4360 = shalt.err (!%p4357_p10)
}
 0x131   :  { %s4361_s0 = scalar_lea.vmem %s4896_s20, 1024  ;;  %p4366_p12 = scmp.lt.s32.totalorder %s4896_s20, %s4896_s20 }
 0x132   :  { %p4362_p11 = scmp.ne.s32.totalorder %s4896_s20, %s4361_s0  ;;  %p4367_p13 = scmp.lt.s32.totalorder %s4361_s0, %s4361_s0 }
 0x134   :  { %p4368_p0 = por %p4367_p13, %p4366_p12 }
 0x136   :  { %p4369_p1 = pnand %p4368_p0, %p4362_p11 }
 0x138   :  { %4372 = shalt.err (!%p4369_p1)
}
 0x139   :  { %167 = dma.hbm_to_vmem [thread:$0]  %s5269_s10, 1024, %s4896_s20, [#allocation18], %s4532_s3, %s4532_s3, %s4533_s23  }
 0x13a   :  { %s4549_s2 = smov [#allocation22]   ;;  %s4550_s27 = smov [#allocation25]  }
 0x13b   :  { %s185_s17 = sshll.u32 %s4549_s2, 4  ;;  %s209_s4 = sshll.u32 %s4550_s27, 4  ;;  %s186_s17 = int_to_ptr.vmem [resolvable:$true] %s185_s17  ;;  %s4933_s4 = int_to_ptr.vmem [resolvable:$true] %s209_s4 }
 0x13c   :  { %s4373_s29 = scalar_lea.hbm %s5271_s12, 1024 }
 0x13d   :  { %p4374_p2 = scmp.ne.s32.totalorder %s5271_s12, %s4373_s29  ;;  %p4377_p3 = scmp.lt.u32.totalorder %s4373_s29, %s5271_s12 }
 0x13f   :  { %p4379_p4 = pnand %p4377_p3, %p4374_p2 }
 0x141   :  { %4382 = shalt.err (!%p4379_p4)
}
 0x142   :  { %s4383_s10 = scalar_lea.vmem %s186_s17, 1024  ;;  %p4388_p6 = scmp.lt.s32.totalorder %s186_s17, %s186_s17 }
 0x143   :  { %p4384_p5 = scmp.ne.s32.totalorder %s186_s17, %s4383_s10  ;;  %p4389_p7 = scmp.lt.s32.totalorder %s4383_s10, %s4383_s10 }
 0x145   :  { %p4390_p8 = por %p4389_p7, %p4388_p6 }
 0x147   :  { %p4391_p9 = pnand %p4390_p8, %p4384_p5 }
 0x149   :  { %4394 = shalt.err (!%p4391_p9)
}
 0x14a   :  { %191 = dma.hbm_to_vmem [thread:$0]  %s5271_s12, 1024, %s186_s17, [#allocation21], %s4532_s3, %s4532_s3, %s4533_s23  }
 0x14b   :  { %s4395_s1 = scalar_lea.hbm %s5273_s14, 1024 }
 0x14c   :  { %p4396_p10 = scmp.ne.s32.totalorder %s5273_s14, %s4395_s1  ;;  %p4399_p11 = scmp.lt.u32.totalorder %s4395_s1, %s5273_s14 }
 0x14e   :  { %p4401_p12 = pnand %p4399_p11, %p4396_p10 }
 0x150   :  { %4404 = shalt.err (!%p4401_p12)
}
 0x151   :  { %s4405_s8 = scalar_lea.vmem %s4933_s4, 1024  ;;  %p4410_p0 = scmp.lt.s32.totalorder %s4933_s4, %s4933_s4 }
 0x152   :  { %p4406_p13 = scmp.ne.s32.totalorder %s4933_s4, %s4405_s8  ;;  %p4411_p1 = scmp.lt.s32.totalorder %s4405_s8, %s4405_s8 }
 0x154   :  { %p4412_p2 = por %p4411_p1, %p4410_p0 }
 0x156   :  { %p4413_p3 = pnand %p4412_p2, %p4406_p13 }
 0x158   :  { %4416 = shalt.err (!%p4413_p3)
}
 0x159   :  { %215 = dma.hbm_to_vmem [thread:$0]  %s5273_s14, 1024, %s4933_s4, [#allocation24], %s4532_s3, %s4532_s3, %s4533_s23  }
 0x15a   :  { %s4551_s2 = smov [#allocation28]   ;;  %s4552_s27 = smov [#allocation31]  }
 0x15b   :  { %s233_s17 = sshll.u32 %s4551_s2, 4  ;;  %s257_s11 = sshll.u32 %s4552_s27, 4  ;;  %s234_s17 = int_to_ptr.vmem [resolvable:$true] %s233_s17  ;;  %s4970_s11 = int_to_ptr.vmem [resolvable:$true] %s257_s11 }
 0x15c   :  { %s4417_s9 = scalar_lea.hbm %s5275_s16, 2048 }
 0x15d   :  { %p4418_p4 = scmp.ne.s32.totalorder %s5275_s16, %s4417_s9  ;;  %p4421_p5 = scmp.lt.u32.totalorder %s4417_s9, %s5275_s16 }
 0x15f   :  { %p4423_p6 = pnand %p4421_p5, %p4418_p4 }
 0x161   :  { %4426 = shalt.err (!%p4423_p6)
}
 0x162   :  { %s4427_s14 = scalar_lea.vmem %s234_s17, 2048  ;;  %p4432_p8 = scmp.lt.s32.totalorder %s234_s17, %s234_s17 }
 0x163   :  { %p4428_p7 = scmp.ne.s32.totalorder %s234_s17, %s4427_s14  ;;  %p4433_p9 = scmp.lt.s32.totalorder %s4427_s14, %s4427_s14 }
 0x165   :  { %p4434_p10 = por %p4433_p9, %p4432_p8 }
 0x167   :  { %p4435_p11 = pnand %p4434_p10, %p4428_p7 }
 0x169   :  { %4438 = shalt.err (!%p4435_p11)
}
 0x16a   :  { %239 = dma.hbm_to_vmem [thread:$0]  %s5275_s16, 2048, %s234_s17, [#allocation27], %s4541_s24, %s4541_s24, %s4542_s26  }
 0x16b   :  { %s4439_s5 = scalar_lea.hbm %s5277_s18, 4096 }
 0x16c   :  { %p4440_p12 = scmp.ne.s32.totalorder %s5277_s18, %s4439_s5  ;;  %p4443_p13 = scmp.lt.u32.totalorder %s4439_s5, %s5277_s18 }
 0x16e   :  { %p4445_p0 = pnand %p4443_p13, %p4440_p12 }
 0x170   :  { %4448 = shalt.err (!%p4445_p0)
}
 0x171   :  { %s4449_s0 = scalar_lea.vmem %s4970_s11, 4096  ;;  %p4454_p2 = scmp.lt.s32.totalorder %s4970_s11, %s4970_s11 }
 0x172   :  { %p4450_p1 = scmp.ne.s32.totalorder %s4970_s11, %s4449_s0  ;;  %p4455_p3 = scmp.lt.s32.totalorder %s4449_s0, %s4449_s0 }
 0x174   :  { %p4456_p4 = por %p4455_p3, %p4454_p2 }
 0x176   :  { %p4457_p5 = pnand %p4456_p4, %p4450_p1 }
 0x178   :  { %4460 = shalt.err (!%p4457_p5)
}
 0x179   :  { %263 = dma.hbm_to_vmem [thread:$0]  %s5277_s18, 4096, %s4970_s11, [#allocation30], %s4541_s24, %s4541_s24, %s4542_s26  }
 0x17a   :  { %s4553_s12 = smov [#allocation34]   ;;  %s5303_s27 = sld [smem:[#allocation54_spill]] }
 0x17b   :  { %s281_s22 = sshll.u32 %s4553_s12, 4  ;;  %s282_s22 = int_to_ptr.vmem [resolvable:$true] %s281_s22 }
 0x180   :  { %s4461_s25 = scalar_lea.hbm %s5303_s27, 2048 }
 0x181   :  { %p4462_p6 = scmp.ne.s32.totalorder %s5303_s27, %s4461_s25  ;;  %p4465_p7 = scmp.lt.u32.totalorder %s4461_s25, %s5303_s27 }
 0x183   :  { %p4467_p8 = pnand %p4465_p7, %p4462_p6 }
 0x185   :  { %4470 = shalt.err (!%p4467_p8)
}
 0x186   :  { %s4471_s15 = scalar_lea.vmem %s282_s22, 2048  ;;  %p4476_p10 = scmp.lt.s32.totalorder %s282_s22, %s282_s22 }
 0x187   :  { %p4472_p9 = scmp.ne.s32.totalorder %s282_s22, %s4471_s15  ;;  %p4477_p11 = scmp.lt.s32.totalorder %s4471_s15, %s4471_s15 }
 0x189   :  { %p4478_p12 = por %p4477_p11, %p4476_p10 }
 0x18b   :  { %p4479_p13 = pnand %p4478_p12, %p4472_p9 }
 0x18d   :  { %4482 = shalt.err (!%p4479_p13)
}
 0x18e   :  { %287 = dma.hbm_to_vmem [thread:$0]  %s5303_s27, 2048, %s282_s22, [#allocation33], %s4532_s3, %s4532_s3, %s4533_s23  }
 0x18f   :  { %4505 = dma.done.wait [#allocation3], 128  }
 0x190   :  { %4506 = vsyncadd [#allocation3], 4294967168 }
 0x191   :  { %4507 = dma.done.wait [#allocation6], 1392  }
 0x192   :  { %4508 = vsyncadd [#allocation6], 4294965904 }
 0x193   :  { %4509 = dma.done.wait [#allocation9], 2048  }
 0x194   :  { %4510 = vsyncadd [#allocation9], 4294965248 }
 0x195   :  { %4511 = dma.done.wait [#allocation12], 2048  }
 0x196   :  { %4512 = vsyncadd [#allocation12], 4294965248 }
 0x197   :  { %4513 = dma.done.wait [#allocation15], 2048  }
 0x198   :  { %4514 = vsyncadd [#allocation15], 4294965248 }
 0x199   :  { %4515 = dma.done.wait [#allocation18], 2048  }
 0x19a   :  { %4516 = vsyncadd [#allocation18], 4294965248 }
 0x19b   :  { %4517 = dma.done.wait [#allocation21], 2048  }
 0x19c   :  { %4518 = vsyncadd [#allocation21], 4294965248 }
 0x19d   :  { %4519 = dma.done.wait [#allocation24], 2048  }
 0x19e   :  { %4520 = vsyncadd [#allocation24], 4294965248 }
 0x19f   :  { %4521 = dma.done.wait [#allocation27], 3072  }
 0x1a0   :  { %4522 = vsyncadd [#allocation27], 4294964224 }
 0x1a1   :  { %4523 = dma.done.wait [#allocation30], 6144  }
 0x1a2   :  { %4524 = vsyncadd [#allocation30], 4294961152 }
 0x1a3   :  { %4525 = dma.done.wait [#allocation33], 6144  }
 0x1a4   :  { %4526 = vsyncadd [#allocation33], 4294961152  ;;  %v4554_v0 = vmov 0.0   ;;  %vm4555_vm0 = vmmov 0   ;;  %v3748_v1 = vld [vmem:[#allocation7] sm:$0xff]   ;;  %v3749_v2 = vld [vmem:[#allocation7 + $0x8] sm:$0xff]  }
 0x1a5   :  { %3403 = vmatprep.subr.bf16.mxu0 %v4554_v0  ;;  %3419 = vmatprep.mubr.msk.bf16.mxu0 %vm4555_vm0, %v4554_v0  ;;  %v3750_v3 = vld [vmem:[#allocation7 + $0x10] sm:$0xff]   ;;  %v3757_v4 = vld [vmem:[#allocation8] sm:$0xff]   ;;  %v3751_v5 = vld [vmem:[#allocation7 + $0x18] sm:$0xff]   ;;  %s4557_s26 = smov [#allocation35]  }
 0x1a6   :  { %3423 = vmatprep.subr.bf16.mxu1 %v4554_v0  ;;  %3439 = vmatprep.mubr.msk.bf16.mxu1 %vm4555_vm0, %v4554_v0  ;;  %v3758_v6 = vld [vmem:[#allocation8 + $0x8] sm:$0xff]   ;;  %v3752_v7 = vld [vmem:[#allocation7 + $0x20] sm:$0xff]   ;;  %v3759_v8 = vld [vmem:[#allocation8 + $0x10] sm:$0xff]   ;;  %s2984_s11 = sshll.u32 %s4557_s26, 4  ;;  %s2985_s11 = int_to_ptr.vmem [resolvable:$true] %s2984_s11 }
 0x1a7   :  { %3404 = vmatpush3.bf16.msra.mxu0 %v3748_v1  ;;  %3424 = vmatpush3.bf16.msra.mxu1 %v3757_v4  ;;  %v3753_v9 = vld [vmem:[#allocation7 + $0x28] sm:$0xff]   ;;  %v3760_v10 = vld [vmem:[#allocation8 + $0x18] sm:$0xff]   ;;  %v3754_v11 = vld [vmem:[#allocation7 + $0x30] sm:$0xff]   ;;  %s4483_s10 = scalar_lea.vmem %s2985_s11, 128  ;;  %p4488_p1 = scmp.lt.s32.totalorder %s2985_s11, %s2985_s11 }
 0x1a8   :  { %3405 = vmatprep.subr.bf16.mxu0 %v4554_v0  ;;  %3425 = vmatprep.subr.bf16.mxu1 %v4554_v0  ;;  %v3761_v12 = vld [vmem:[#allocation8 + $0x20] sm:$0xff]   ;;  %v3755_v13 = vld [vmem:[#allocation7 + $0x38] sm:$0xff]   ;;  %v3762_v14 = vld [vmem:[#allocation8 + $0x28] sm:$0xff]   ;;  %p4484_p0 = scmp.ne.s32.totalorder %s2985_s11, %s4483_s10  ;;  %p4489_p2 = scmp.lt.s32.totalorder %s4483_s10, %s4483_s10 }
 0x1a9   :  { %v5039_v15 = vld [vmem:[#allocation2] sm:$0xff]   ;;  %v3763_v16 = vld [vmem:[#allocation8 + $0x30] sm:$0xff]   ;;  %v3764_v17 = vld [vmem:[#allocation8 + $0x38] sm:$0xff]  }
 0x1aa   :  { %v3773_v18 = vld [vmem:[#allocation11] sm:$0xff]   ;;  %v3774_v19 = vld [vmem:[#allocation11 + $0x8] sm:$0xff]   ;;  %v3775_v20 = vld [vmem:[#allocation11 + $0x10] sm:$0xff]   ;;  %p4490_p3 = por %p4489_p2, %p4488_p1 }
 0x1ab   :  { %3406 = vmatpush3.bf16.msra.mxu0 %v3749_v2  ;;  %3426 = vmatpush3.bf16.msra.mxu1 %v3758_v6  ;;  %v3776_v21 = vld [vmem:[#allocation11 + $0x18] sm:$0xff]   ;;  %v3777_v22 = vld [vmem:[#allocation11 + $0x20] sm:$0xff]   ;;  %v3778_v23 = vld [vmem:[#allocation11 + $0x28] sm:$0xff]  }
 0x1ac   :  { %3407 = vmatprep.subr.bf16.mxu0 %v4554_v0  ;;  %3427 = vmatprep.subr.bf16.mxu1 %v4554_v0  ;;  %v3006_v24 = vld [vmem:[#allocation5] ss:$0 sm:$0xff]  ;;  %v3765_v33 = vld [vmem:[#allocation10] sm:$0xff]   ;;  %v3767_v36 = vld [vmem:[#allocation10 + $0x10] sm:$0xff]   ;;  %p4491_p4 = pnand %p4490_p3, %p4484_p0 }
 0x1ad   :  { %v3766_v35 = vld [vmem:[#allocation10 + $0x8] sm:$0xff]   ;;  %v3768_v37 = vld [vmem:[#allocation10 + $0x18] sm:$0xff]   ;;  %v3769_v38 = vld [vmem:[#allocation10 + $0x20] sm:$0xff]  }
 0x1ae   :  { %v3770_v39 = vld [vmem:[#allocation10 + $0x28] sm:$0xff]   ;;  %v3771_v40 = vld [vmem:[#allocation10 + $0x30] sm:$0xff]   ;;  %v3772_v41 = vld [vmem:[#allocation10 + $0x38] sm:$0xff]  }
 0x1af   :  { %3408 = vmatpush3.bf16.msra.mxu0 %v3750_v3  ;;  %3428 = vmatpush3.bf16.msra.mxu1 %v3759_v8  ;;  %v3779_v42 = vld [vmem:[#allocation11 + $0x30] sm:$0xff]   ;;  %v3780_v43 = vld [vmem:[#allocation11 + $0x38] sm:$0xff]   ;;  %v3016_v44 = vld [vmem:[#allocation5 + $0x1] ss:$0 sm:$0xff] }
 0x1b0   :  { %3409 = vmatprep.subr.bf16.mxu0 %v4554_v0  ;;  %3429 = vmatprep.subr.bf16.mxu1 %v4554_v0  ;;  %v3025_v45 = vld [vmem:[#allocation5 + $0x2] ss:$0 sm:$0xff]  ;;  %v3781_v55 = vld [vmem:[#allocation13] sm:$0xff]   ;;  %v3783_v58 = vld [vmem:[#allocation13 + $0x10] sm:$0xff]  }
 0x1b1   :  { %v3683_v46 = vadd.f32 %v3025_v45, %v3016_v44  ;;  %v3782_v57 = vld [vmem:[#allocation13 + $0x8] sm:$0xff]   ;;  %v3784_v59 = vld [vmem:[#allocation13 + $0x18] sm:$0xff]   ;;  %v3785_v60 = vld [vmem:[#allocation13 + $0x20] sm:$0xff]  }
 0x1b2   :  { %v3786_v61 = vld [vmem:[#allocation13 + $0x28] sm:$0xff]   ;;  %v3787_v62 = vld [vmem:[#allocation13 + $0x30] sm:$0xff]   ;;  %v3788_v63 = vld [vmem:[#allocation13 + $0x38] sm:$0xff]  }
 0x1b3   :  { %3410 = vmatpush3.bf16.msra.mxu0 %v3751_v5  ;;  %3430 = vmatpush3.bf16.msra.mxu1 %v3760_v10  ;;  %v3797_v1 = vld [vmem:[#allocation16] sm:$0xff]   ;;  %v3798_v2 = vld [vmem:[#allocation16 + $0x8] sm:$0xff]   ;;  %v3799_v3 = vld [vmem:[#allocation16 + $0x10] sm:$0xff]  }
 0x1b4   :  { %3411 = vmatprep.subr.bf16.mxu0 %v4554_v0  ;;  %3431 = vmatprep.subr.bf16.mxu1 %v4554_v0  ;;  %v3800_v4 = vld [vmem:[#allocation16 + $0x18] sm:$0xff]   ;;  %v3801_v5 = vld [vmem:[#allocation16 + $0x20] sm:$0xff]   ;;  %v3802_v6 = vld [vmem:[#allocation16 + $0x28] sm:$0xff]  }
 0x1b5   :  { %v3810_v44 = vld [vmem:[#allocation17 + $0x28] sm:$0xff]   ;;  %v3811_v45 = vld [vmem:[#allocation17 + $0x30] sm:$0xff]  }
 0x1b7   :  { %3412 = vmatpush3.bf16.msra.mxu0 %v3752_v7  ;;  %3432 = vmatpush3.bf16.msra.mxu1 %v3761_v12  ;;  %v3034_v7 = vld [vmem:[#allocation5 + $0x3] ss:$0 sm:$0xff] }
 0x1b8   :  { %3413 = vmatprep.subr.bf16.mxu0 %v4554_v0  ;;  %3433 = vmatprep.subr.bf16.mxu1 %v4554_v0 }
 0x1bb   :  { %3414 = vmatpush3.bf16.msra.mxu0 %v3753_v9  ;;  %3434 = vmatpush3.bf16.msra.mxu1 %v3762_v14 }
 0x1bc   :  { %3415 = vmatprep.subr.bf16.mxu0 %v4554_v0  ;;  %3435 = vmatprep.subr.bf16.mxu1 %v4554_v0 }
 0x1bf   :  { %3416 = vmatpush3.bf16.msra.mxu0 %v3754_v11  ;;  %3436 = vmatpush3.bf16.msra.mxu1 %v3763_v16  ;;  %v3789_v16 = vld [vmem:[#allocation14] sm:$0xff]  }
 0x1c0   :  { %3417 = vmatprep.subr.bf16.mxu0 %v4554_v0  ;;  %3437 = vmatprep.subr.bf16.mxu1 %v4554_v0 }
 0x1c3   :  { %3418 = vmatpush3.bf16.msra.mxu0 %v3755_v13  ;;  %3438 = vmatpush3.bf16.msra.mxu1 %v3764_v17 }
 0x1c4   :  { %3463 = vmatprep.subr.bf16.mxu0 %v4554_v0  ;;  %3443 = vmatprep.subr.bf16.mxu1 %v4554_v0 }
 0x1c6   :  { %3420 = vmatmul.mubr.bf16.vlgmr.msra.gmra.mrb[0].mxu0 %v5039_v15 }
 0x1c7   :  { %3479 = vmatprep.mubr.msk.bf16.mxu0 %vm4555_vm0, %v4554_v0  ;;  %3464 = vmatpush3.bf16.msra.mxu0 %v3773_v18  ;;  %v3790_v18 = vld [vmem:[#allocation14 + $0x8] sm:$0xff]  }
 0x1c8   :  { %3465 = vmatprep.subr.bf16.mxu0 %v4554_v0 }
 0x1cb   :  { %3466 = vmatpush3.bf16.msra.mxu0 %v3774_v19  ;;  %v3791_v19 = vld [vmem:[#allocation14 + $0x10] sm:$0xff]  }
 0x1cc   :  { %3467 = vmatprep.subr.bf16.mxu0 %v4554_v0 }
 0x1cf   :  { %3468 = vmatpush3.bf16.msra.mxu0 %v3775_v20  ;;  %v3792_v20 = vld [vmem:[#allocation14 + $0x18] sm:$0xff]  }
 0x1d0   :  { %3469 = vmatprep.subr.bf16.mxu0 %v4554_v0 }
 0x1d3   :  { %3470 = vmatpush3.bf16.msra.mxu0 %v3776_v21  ;;  %v3793_v21 = vld [vmem:[#allocation14 + $0x20] sm:$0xff]  }
 0x1d4   :  { %3471 = vmatprep.subr.bf16.mxu0 %v4554_v0 }
 0x1d7   :  { %3472 = vmatpush3.bf16.msra.mxu0 %v3777_v22  ;;  %v3794_v22 = vld [vmem:[#allocation14 + $0x28] sm:$0xff]  }
 0x1d8   :  { %3473 = vmatprep.subr.bf16.mxu0 %v4554_v0 }
 0x1db   :  { %3474 = vmatpush3.bf16.msra.mxu0 %v3778_v23  ;;  %v3795_v23 = vld [vmem:[#allocation14 + $0x30] sm:$0xff]  }
 0x1dc   :  { %3475 = vmatprep.subr.bf16.mxu0 %v4554_v0 }
 0x1df   :  { %3476 = vmatpush3.bf16.msra.mxu0 %v3779_v42  ;;  %v3808_v42 = vld [vmem:[#allocation17 + $0x18] sm:$0xff]  }
 0x1e0   :  { %3477 = vmatprep.subr.bf16.mxu0 %v4554_v0 }
 0x1e3   :  { %3478 = vmatpush3.bf16.msra.mxu0 %v3780_v43  ;;  %v3809_v43 = vld [vmem:[#allocation17 + $0x20] sm:$0xff]  }
 0x1e4   :  { %3483 = vmatprep.subr.bf16.mxu0 %v4554_v0 }
 0x299   :  { %v465_v25 = vpop.f32.mrb[0].mxu0 }
 0x29a   :  { %v466_v26 = vadd.f32 %v3006_v24, %v465_v25  ;;  %v3421_v27 = vpop.f32.mrb[1].mxu0  ;;  %v3803_v25 = vld [vmem:[#allocation16 + $0x30] sm:$0xff]  }
 0x29b   :  { %v468_v28 = vpop.f32.mrb[2].mxu0  ;;  %v3043_v27 = vld [vmem:[#allocation5 + $0x4] ss:$0 sm:$0xff] }
 0x29c   :  { %v469_v29 = vadd.f32 %v3006_v24, %v468_v28  ;;  %v3422_v30 = vpop.f32.mrb[3].mxu0  ;;  %v472_v31 = vmax.f32 %v466_v26, 0.0  ;;  %v3796_v24 = vld [vmem:[#allocation14 + $0x38] sm:$0xff]   ;;  %v3052_v28 = vld [vmem:[#allocation5 + $0x5] ss:$0 sm:$0xff] }
 0x29d   :  { %v3804_v26 = vld [vmem:[#allocation16 + $0x38] sm:$0xff]  }
 0x29e   :  { %v473_v32 = vmax.f32 %v469_v29, 0.0  ;;  %v3687_v29 = vadd.f32 %v3052_v28, %v3043_v27  ;;  %v3842_v27 = vld [vmem:[#allocation23 + $0x28] sm:$0xff]   ;;  %v3079_v28 = vld [vmem:[#allocation5 + $0x8] ss:$0 sm:$0xff] }
 0x2a0   :  { %v474_v34 = vpack.c.bf16 %v473_v32, %v472_v31 }
 0x2a2   :  { %3440 = vmatmul.mubr.bf16.vlgmr.msra.gmra.mrb[0].mxu1 %v474_v34 }
 0x2a3   :  { %3444 = vmatpush3.bf16.msra.mxu1 %v3765_v33  ;;  %3459 = vmatprep.mubr.msk.bf16.mxu1 %vm4555_vm0, %v4554_v0 }
 0x2a4   :  { %3445 = vmatprep.subr.bf16.mxu1 %v4554_v0 }
 0x2a7   :  { %3446 = vmatpush3.bf16.msra.mxu1 %v3766_v35 }
 0x2a8   :  { %3447 = vmatprep.subr.bf16.mxu1 %v4554_v0 }
 0x2ab   :  { %3448 = vmatpush3.bf16.msra.mxu1 %v3767_v36 }
 0x2ac   :  { %3449 = vmatprep.subr.bf16.mxu1 %v4554_v0 }
 0x2af   :  { %3450 = vmatpush3.bf16.msra.mxu1 %v3768_v37 }
 0x2b0   :  { %3451 = vmatprep.subr.bf16.mxu1 %v4554_v0 }
 0x2b3   :  { %3452 = vmatpush3.bf16.msra.mxu1 %v3769_v38  ;;  %v3805_v38 = vld [vmem:[#allocation17] sm:$0xff]  }
 0x2b4   :  { %3453 = vmatprep.subr.bf16.mxu1 %v4554_v0 }
 0x2b7   :  { %3454 = vmatpush3.bf16.msra.mxu1 %v3770_v39 }
 0x2b8   :  { %3455 = vmatprep.subr.bf16.mxu1 %v4554_v0 }
 0x2bb   :  { %3456 = vmatpush3.bf16.msra.mxu1 %v3771_v40  ;;  %v3806_v40 = vld [vmem:[#allocation17 + $0x8] sm:$0xff]  }
 0x2bc   :  { %3457 = vmatprep.subr.bf16.mxu1 %v4554_v0 }
 0x2bf   :  { %3458 = vmatpush3.bf16.msra.mxu1 %v3772_v41  ;;  %v3807_v41 = vld [vmem:[#allocation17 + $0x10] sm:$0xff]  }
 0x2c0   :  { %3523 = vmatprep.subr.bf16.mxu1 %v4554_v0 }
 0x2c2   :  { %3460 = vmatmul.mubr.bf16.vlgmr.msra.gmra.mrb[0].mxu1 %v5039_v15 }
 0x2c3   :  { %3539 = vmatprep.mubr.msk.bf16.mxu1 %vm4555_vm0, %v4554_v0  ;;  %3524 = vmatpush3.bf16.msra.mxu1 %v3797_v1  ;;  %v3820_v1 = vld [vmem:[#allocation19 + $0x38] sm:$0xff]  }
 0x2c4   :  { %3525 = vmatprep.subr.bf16.mxu1 %v4554_v0 }
 0x2c7   :  { %3526 = vmatpush3.bf16.msra.mxu1 %v3798_v2  ;;  %v3821_v2 = vld [vmem:[#allocation20] sm:$0xff]  }
 0x2c8   :  { %3527 = vmatprep.subr.bf16.mxu1 %v4554_v0 }
 0x2cb   :  { %3528 = vmatpush3.bf16.msra.mxu1 %v3799_v3  ;;  %v3822_v3 = vld [vmem:[#allocation20 + $0x8] sm:$0xff]  }
 0x2cc   :  { %3529 = vmatprep.subr.bf16.mxu1 %v4554_v0 }
 0x2cf   :  { %3530 = vmatpush3.bf16.msra.mxu1 %v3800_v4  ;;  %v3823_v4 = vld [vmem:[#allocation20 + $0x10] sm:$0xff]  }
 0x2d0   :  { %3531 = vmatprep.subr.bf16.mxu1 %v4554_v0 }
 0x2d3   :  { %3532 = vmatpush3.bf16.msra.mxu1 %v3801_v5  ;;  %v3824_v5 = vld [vmem:[#allocation20 + $0x18] sm:$0xff]  }
 0x2d4   :  { %3533 = vmatprep.subr.bf16.mxu1 %v4554_v0 }
 0x2d7   :  { %3534 = vmatpush3.bf16.msra.mxu1 %v3802_v6  ;;  %v3825_v6 = vld [vmem:[#allocation20 + $0x20] sm:$0xff]  }
 0x2d8   :  { %3535 = vmatprep.subr.bf16.mxu1 %v4554_v0 }
 0x2db   :  { %3536 = vmatpush3.bf16.msra.mxu1 %v3803_v25  ;;  %v3840_v25 = vld [vmem:[#allocation23 + $0x18] sm:$0xff]  }
 0x2dc   :  { %3537 = vmatprep.subr.bf16.mxu1 %v4554_v0 }
 0x2df   :  { %3538 = vmatpush3.bf16.msra.mxu1 %v3804_v26  ;;  %v3841_v26 = vld [vmem:[#allocation23 + $0x20] sm:$0xff]  }
 0x2e0   :  { %3543 = vmatprep.subr.bf16.mxu1 %v4554_v0 }
 0x395   :  { %v692_v47 = vpop.f32.mrb[0].mxu1 }
 0x396   :  { %v3684_v48 = vadd.f32 %v3683_v46, %v692_v47  ;;  %v3461_v49 = vpop.f32.mrb[1].mxu1  ;;  %v3813_v47 = vld [vmem:[#allocation19] sm:$0xff]  }
 0x397   :  { %v695_v50 = vpop.f32.mrb[2].mxu1  ;;  %v3815_v49 = vld [vmem:[#allocation19 + $0x10] sm:$0xff]  }
 0x398   :  { %v3686_v51 = vadd.f32 %v3683_v46, %v695_v50  ;;  %v3462_v52 = vpop.f32.mrb[3].mxu1  ;;  %v701_v53 = vmax.f32 %v3684_v48, 0.0  ;;  %v3812_v46 = vld [vmem:[#allocation17 + $0x38] sm:$0xff]   ;;  %v3814_v48 = vld [vmem:[#allocation19 + $0x8] sm:$0xff]  }
 0x399   :  { %v3816_v50 = vld [vmem:[#allocation19 + $0x18] sm:$0xff]   ;;  %v3061_v52 = vld [vmem:[#allocation5 + $0x6] ss:$0 sm:$0xff] }
 0x39a   :  { %v702_v54 = vmax.f32 %v3686_v51, 0.0  ;;  %v3817_v51 = vld [vmem:[#allocation19 + $0x20] sm:$0xff]  }
 0x39c   :  { %v5070_v56 = vpack.c.bf16 %v702_v54, %v701_v53 }
 0x39e   :  { %3480 = vmatmul.mubr.bf16.vlgmr.msra.gmra.mrb[4].mxu0 %v5070_v56 }
 0x39f   :  { %3484 = vmatpush3.bf16.msra.mxu0 %v3781_v55  ;;  %3499 = vmatprep.mubr.msk.bf16.mxu0 %vm4555_vm0, %v4554_v0 }
 0x3a0   :  { %3485 = vmatprep.subr.bf16.mxu0 %v4554_v0 }
 0x3a3   :  { %3486 = vmatpush3.bf16.msra.mxu0 %v3782_v57 }
 0x3a4   :  { %3487 = vmatprep.subr.bf16.mxu0 %v4554_v0 }
 0x3a7   :  { %3488 = vmatpush3.bf16.msra.mxu0 %v3783_v58 }
 0x3a8   :  { %3489 = vmatprep.subr.bf16.mxu0 %v4554_v0 }
 0x3ab   :  { %3490 = vmatpush3.bf16.msra.mxu0 %v3784_v59 }
 0x3ac   :  { %3491 = vmatprep.subr.bf16.mxu0 %v4554_v0 }
 0x3af   :  { %3492 = vmatpush3.bf16.msra.mxu0 %v3785_v60 }
 0x3b0   :  { %3493 = vmatprep.subr.bf16.mxu0 %v4554_v0 }
 0x3b3   :  { %3494 = vmatpush3.bf16.msra.mxu0 %v3786_v61 }
 0x3b4   :  { %3495 = vmatprep.subr.bf16.mxu0 %v4554_v0 }
 0x3b7   :  { %3496 = vmatpush3.bf16.msra.mxu0 %v3787_v62  ;;  %v3818_v62 = vld [vmem:[#allocation19 + $0x28] sm:$0xff]  }
 0x3b8   :  { %3497 = vmatprep.subr.bf16.mxu0 %v4554_v0 }
 0x3bb   :  { %3498 = vmatpush3.bf16.msra.mxu0 %v3788_v63  ;;  %v3819_v63 = vld [vmem:[#allocation19 + $0x30] sm:$0xff]  }
 0x3bc   :  { %3503 = vmatprep.subr.bf16.mxu0 %v4554_v0 }
 0x471   :  { %v809_v8 = vpop.f32.mrb[4].mxu0 }
 0x472   :  { %v810_v9 = vadd.f32 %v3034_v7, %v809_v8  ;;  %v3481_v10 = vpop.f32.mrb[5].mxu0  ;;  %v3070_v8 = vld [vmem:[#allocation5 + $0x7] ss:$0 sm:$0xff] }
 0x473   :  { %v812_v11 = vpop.f32.mrb[6].mxu0 }
 0x474   :  { %v813_v12 = vadd.f32 %v3034_v7, %v812_v11  ;;  %v3482_v13 = vpop.f32.mrb[7].mxu0  ;;  %v816_v14 = vmax.f32 %v810_v9, 0.0  ;;  %v3826_v7 = vld [vmem:[#allocation20 + $0x28] sm:$0xff]  }
 0x476   :  { %v817_v15 = vmax.f32 %v813_v12, 0.0 }
 0x478   :  { %v818_v17 = vpack.c.bf16 %v817_v15, %v816_v14 }
 0x47a   :  { %3500 = vmatmul.mubr.bf16.vlgmr.msra.gmra.mrb[8].mxu0 %v818_v17 }
 0x47b   :  { %3504 = vmatpush3.bf16.msra.mxu0 %v3789_v16  ;;  %3519 = vmatprep.mubr.msk.bf16.mxu0 %vm4555_vm0, %v4554_v0 }
 0x47c   :  { %3505 = vmatprep.subr.bf16.mxu0 %v4554_v0 }
 0x47f   :  { %3506 = vmatpush3.bf16.msra.mxu0 %v3790_v18 }
 0x480   :  { %3507 = vmatprep.subr.bf16.mxu0 %v4554_v0 }
 0x483   :  { %3508 = vmatpush3.bf16.msra.mxu0 %v3791_v19 }
 0x484   :  { %3509 = vmatprep.subr.bf16.mxu0 %v4554_v0 }
 0x487   :  { %3510 = vmatpush3.bf16.msra.mxu0 %v3792_v20  ;;  %v3827_v20 = vld [vmem:[#allocation20 + $0x30] sm:$0xff]  }
 0x488   :  { %3511 = vmatprep.subr.bf16.mxu0 %v4554_v0 }
 0x48b   :  { %3512 = vmatpush3.bf16.msra.mxu0 %v3793_v21  ;;  %v3828_v21 = vld [vmem:[#allocation20 + $0x38] sm:$0xff]  }
 0x48c   :  { %3513 = vmatprep.subr.bf16.mxu0 %v4554_v0 }
 0x48f   :  { %3514 = vmatpush3.bf16.msra.mxu0 %v3794_v22  ;;  %v3837_v22 = vld [vmem:[#allocation23] sm:$0xff]  }
 0x490   :  { %3515 = vmatprep.subr.bf16.mxu0 %v4554_v0 }
 0x493   :  { %3516 = vmatpush3.bf16.msra.mxu0 %v3795_v23  ;;  %v3838_v23 = vld [vmem:[#allocation23 + $0x8] sm:$0xff]  }
 0x494   :  { %3517 = vmatprep.subr.bf16.mxu0 %v4554_v0 }
 0x497   :  { %3518 = vmatpush3.bf16.msra.mxu0 %v3796_v24  ;;  %v3839_v24 = vld [vmem:[#allocation23 + $0x10] sm:$0xff]  }
 0x498   :  { %3563 = vmatprep.subr.bf16.mxu0 %v4554_v0 }
 0x49a   :  { %3520 = vmatmul.mubr.bf16.vlgmr.msra.gmra.mrb[8].mxu0 %v5070_v56 }
 0x49b   :  { %3579 = vmatprep.mubr.msk.bf16.mxu0 %vm4555_vm0, %v4554_v0  ;;  %3564 = vmatpush3.bf16.msra.mxu0 %v3813_v47  ;;  %v3844_v47 = vld [vmem:[#allocation23 + $0x38] sm:$0xff]  }
 0x49c   :  { %3565 = vmatprep.subr.bf16.mxu0 %v4554_v0 }
 0x49f   :  { %3566 = vmatpush3.bf16.msra.mxu0 %v3814_v48  ;;  %v3088_v48 = vld [vmem:[#allocation5 + $0x9] ss:$0 sm:$0xff] }
 0x4a0   :  { %3567 = vmatprep.subr.bf16.mxu0 %v4554_v0 }
 0x4a3   :  { %3568 = vmatpush3.bf16.msra.mxu0 %v3815_v49  ;;  %v3097_v49 = vld [vmem:[#allocation5 + $0xa] ss:$0 sm:$0xff] }
 0x4a4   :  { %3569 = vmatprep.subr.bf16.mxu0 %v4554_v0 }
 0x4a7   :  { %3570 = vmatpush3.bf16.msra.mxu0 %v3816_v50  ;;  %v3691_v50 = vadd.f32 %v3097_v49, %v3088_v48  ;;  %v3884_v48 = vld [vmem:[#allocation28 + $0x74] ss:$8 sps:$4 sm:$0xff]   ;;  %v3882_v49 = vld [vmem:[#allocation28 + $0x70] ss:$8 sps:$4 sm:$0xff]  }
 0x4a8   :  { %3571 = vmatprep.subr.bf16.mxu0 %v4554_v0 }
 0x4ab   :  { %3572 = vmatpush3.bf16.msra.mxu0 %v3817_v51 }
 0x4ac   :  { %3573 = vmatprep.subr.bf16.mxu0 %v4554_v0 }
 0x4af   :  { %3574 = vmatpush3.bf16.msra.mxu0 %v3818_v62  ;;  %v3847_v62 = vld [vmem:[#allocation25 + $0x10] sm:$0xff]  }
 0x4b0   :  { %3575 = vmatprep.subr.bf16.mxu0 %v4554_v0 }
 0x4b3   :  { %3576 = vmatpush3.bf16.msra.mxu0 %v3819_v63  ;;  %v3848_v63 = vld [vmem:[#allocation25 + $0x18] sm:$0xff]  }
 0x4b4   :  { %3577 = vmatprep.subr.bf16.mxu0 %v4554_v0 }
 0x4b7   :  { %3578 = vmatpush3.bf16.msra.mxu0 %v3820_v1  ;;  %v3849_v1 = vld [vmem:[#allocation25 + $0x20] sm:$0xff]  }
 0x4b8   :  { %3623 = vmatprep.subr.bf16.mxu0 %v4554_v0 }
 0x56d   :  { %v1036_v30 = vpop.f32.mrb[8].mxu0 }
 0x56e   :  { %v5104_v31 = vadd.f32 %v3687_v29, %v1036_v30  ;;  %v3521_v32 = vpop.f32.mrb[9].mxu0 }
 0x56f   :  { %v1039_v33 = vpop.f32.mrb[10].mxu0 }
 0x570   :  { %v5106_v34 = vadd.f32 %v3687_v29, %v1039_v33  ;;  %v3522_v35 = vpop.f32.mrb[11].mxu0  ;;  %v1045_v36 = vmax.f32 %v5104_v31, 0.0 }
 0x572   :  { %v1046_v37 = vmax.f32 %v5106_v34, 0.0 }
 0x574   :  { %v1047_v39 = vpack.c.bf16 %v1046_v37, %v1045_v36 }
 0x576   :  { %3540 = vmatmul.mubr.bf16.vlgmr.msra.gmra.mrb[4].mxu1 %v1047_v39  ;;  %v3830_v39 = vld [vmem:[#allocation22 + $0x8] sm:$0xff]  }
 0x577   :  { %3544 = vmatpush3.bf16.msra.mxu1 %v3805_v38  ;;  %3559 = vmatprep.mubr.msk.bf16.mxu1 %vm4555_vm0, %v4554_v0 }
 0x578   :  { %3545 = vmatprep.subr.bf16.mxu1 %v4554_v0 }
 0x57b   :  { %3546 = vmatpush3.bf16.msra.mxu1 %v3806_v40  ;;  %v3831_v40 = vld [vmem:[#allocation22 + $0x10] sm:$0xff]  }
 0x57c   :  { %3547 = vmatprep.subr.bf16.mxu1 %v4554_v0 }
 0x57f   :  { %3548 = vmatpush3.bf16.msra.mxu1 %v3807_v41  ;;  %v3832_v41 = vld [vmem:[#allocation22 + $0x18] sm:$0xff]  }
 0x580   :  { %3549 = vmatprep.subr.bf16.mxu1 %v4554_v0 }
 0x583   :  { %3550 = vmatpush3.bf16.msra.mxu1 %v3808_v42  ;;  %v3833_v42 = vld [vmem:[#allocation22 + $0x20] sm:$0xff]  }
 0x584   :  { %3551 = vmatprep.subr.bf16.mxu1 %v4554_v0 }
 0x587   :  { %3552 = vmatpush3.bf16.msra.mxu1 %v3809_v43  ;;  %v3834_v43 = vld [vmem:[#allocation22 + $0x28] sm:$0xff]  }
 0x588   :  { %3553 = vmatprep.subr.bf16.mxu1 %v4554_v0 }
 0x58b   :  { %3554 = vmatpush3.bf16.msra.mxu1 %v3810_v44  ;;  %v3835_v44 = vld [vmem:[#allocation22 + $0x30] sm:$0xff]  }
 0x58c   :  { %3555 = vmatprep.subr.bf16.mxu1 %v4554_v0 }
 0x58f   :  { %3556 = vmatpush3.bf16.msra.mxu1 %v3811_v45  ;;  %v3836_v45 = vld [vmem:[#allocation22 + $0x38] sm:$0xff]  }
 0x590   :  { %3557 = vmatprep.subr.bf16.mxu1 %v4554_v0 }
 0x593   :  { %3558 = vmatpush3.bf16.msra.mxu1 %v3812_v46  ;;  %v3843_v46 = vld [vmem:[#allocation23 + $0x30] sm:$0xff]  }
 0x594   :  { %3583 = vmatprep.subr.bf16.mxu1 %v4554_v0 }
 0x649   :  { %v1153_v53 = vpop.f32.mrb[4].mxu1 }
 0x64a   :  { %v1154_v54 = vadd.f32 %v3061_v52, %v1153_v53  ;;  %v3541_v55 = vpop.f32.mrb[5].mxu1 }
 0x64b   :  { %v1156_v56 = vpop.f32.mrb[6].mxu1 }
 0x64c   :  { %v1157_v57 = vadd.f32 %v3061_v52, %v1156_v56  ;;  %v3542_v58 = vpop.f32.mrb[7].mxu1  ;;  %v1160_v59 = vmax.f32 %v1154_v54, 0.0 }
 0x64e   :  { %v1161_v60 = vmax.f32 %v1157_v57, 0.0 }
 0x650   :  { %v1162_v61 = vpack.c.bf16 %v1161_v60, %v1160_v59  ;;  %v3845_v59 = vld [vmem:[#allocation25] sm:$0xff]  }
 0x652   :  { %3560 = vmatmul.mubr.bf16.vlgmr.msra.gmra.mrb[8].mxu1 %v1162_v61  ;;  %v3846_v61 = vld [vmem:[#allocation25 + $0x8] sm:$0xff]  }
 0x653   :  { %3599 = vmatprep.mubr.msk.bf16.mxu1 %vm4555_vm0, %v4554_v0  ;;  %3584 = vmatpush3.bf16.msra.mxu1 %v3821_v2  ;;  %v3850_v2 = vld [vmem:[#allocation25 + $0x28] sm:$0xff]  }
 0x654   :  { %3585 = vmatprep.subr.bf16.mxu1 %v4554_v0 }
 0x657   :  { %3586 = vmatpush3.bf16.msra.mxu1 %v3822_v3  ;;  %v3851_v3 = vld [vmem:[#allocation25 + $0x30] sm:$0xff]  }
 0x658   :  { %3587 = vmatprep.subr.bf16.mxu1 %v4554_v0 }
 0x65b   :  { %3588 = vmatpush3.bf16.msra.mxu1 %v3823_v4  ;;  %v3852_v4 = vld [vmem:[#allocation25 + $0x38] sm:$0xff]  }
 0x65c   :  { %3589 = vmatprep.subr.bf16.mxu1 %v4554_v0 }
 0x65f   :  { %3590 = vmatpush3.bf16.msra.mxu1 %v3824_v5  ;;  %v3853_v5 = vld [vmem:[#allocation26] sm:$0xff]  }
 0x660   :  { %3591 = vmatprep.subr.bf16.mxu1 %v4554_v0 }
 0x663   :  { %3592 = vmatpush3.bf16.msra.mxu1 %v3825_v6  ;;  %v3854_v6 = vld [vmem:[#allocation26 + $0x8] sm:$0xff]  }
 0x664   :  { %3593 = vmatprep.subr.bf16.mxu1 %v4554_v0 }
 0x667   :  { %3594 = vmatpush3.bf16.msra.mxu1 %v3826_v7  ;;  %v3855_v7 = vld [vmem:[#allocation26 + $0x10] sm:$0xff]  }
 0x668   :  { %3595 = vmatprep.subr.bf16.mxu1 %v4554_v0 }
 0x66b   :  { %3596 = vmatpush3.bf16.msra.mxu1 %v3827_v20  ;;  %v3858_v20 = vld [vmem:[#allocation26 + $0x28] sm:$0xff]  }
 0x66c   :  { %3597 = vmatprep.subr.bf16.mxu1 %v4554_v0 }
 0x66f   :  { %3598 = vmatpush3.bf16.msra.mxu1 %v3828_v21  ;;  %v3859_v21 = vld [vmem:[#allocation26 + $0x30] sm:$0xff]  }
 0x670   :  { %3603 = vmatprep.subr.bf16.mxu1 %v4554_v0 }
 0x725   :  { %v1268_v9 = vpop.f32.mrb[8].mxu1 }
 0x726   :  { %v1269_v10 = vadd.f32 %v3070_v8, %v1268_v9  ;;  %v3561_v11 = vpop.f32.mrb[9].mxu1  ;;  %v3857_v9 = vld [vmem:[#allocation26 + $0x20] sm:$0xff]  }
 0x727   :  { %v1271_v12 = vpop.f32.mrb[10].mxu1 }
 0x728   :  { %v1275_v13 = vadd.f32 %v1269_v10, %v1045_v36  ;;  %v1272_v14 = vadd.f32 %v3070_v8, %v1271_v12  ;;  %v3562_v15 = vpop.f32.mrb[11].mxu1  ;;  %v3856_v8 = vld [vmem:[#allocation26 + $0x18] sm:$0xff]   ;;  %v3106_v10 = vld [vmem:[#allocation5 + $0xb] ss:$0 sm:$0xff] }
 0x72a   :  { %v1276_v16 = vadd.f32 %v1272_v14, %v1046_v37  ;;  %v1277_v17 = vmax.f32 %v1275_v13, 0.0  ;;  %v3829_v37 = vld [vmem:[#allocation22] sm:$0xff]  }
 0x72c   :  { %v1278_v18 = vmax.f32 %v1276_v16, 0.0 }
 0x72e   :  { %v1279_v19 = vpack.c.bf16 %v1278_v18, %v1277_v17 }
 0x730   :  { %3580 = vmatmul.mubr.bf16.vlgmr.msra.gmra.mrb[12].mxu0 %v1279_v19 }
 0x731   :  { %3639 = vmatprep.mubr.msk.bf16.mxu0 %vm4555_vm0, %v4554_v0  ;;  %3624 = vmatpush3.bf16.msra.mxu0 %v3837_v22  ;;  %v3860_v22 = vld [vmem:[#allocation26 + $0x38] sm:$0xff]  }
 0x732   :  { %3625 = vmatprep.subr.bf16.mxu0 %v4554_v0 }
 0x735   :  { %3626 = vmatpush3.bf16.msra.mxu0 %v3838_v23  ;;  %v3861_v23 = vld [vmem:[#allocation28] ss:$8 sps:$4 sm:$0xff]  }
 0x736   :  { %3627 = vmatprep.subr.bf16.mxu0 %v4554_v0 }
 0x739   :  { %3628 = vmatpush3.bf16.msra.mxu0 %v3839_v24  ;;  %v3863_v24 = vld [vmem:[#allocation28 + $0x4] ss:$8 sps:$4 sm:$0xff]  }
 0x73a   :  { %3629 = vmatprep.subr.bf16.mxu0 %v4554_v0 }
 0x73d   :  { %3630 = vmatpush3.bf16.msra.mxu0 %v3840_v25  ;;  %v3866_v25 = vld [vmem:[#allocation28 + $0x14] ss:$8 sps:$4 sm:$0xff]  }
 0x73e   :  { %3631 = vmatprep.subr.bf16.mxu0 %v4554_v0 }
 0x741   :  { %3632 = vmatpush3.bf16.msra.mxu0 %v3841_v26  ;;  %v3864_v26 = vld [vmem:[#allocation28 + $0x10] ss:$8 sps:$4 sm:$0xff]  }
 0x742   :  { %3633 = vmatprep.subr.bf16.mxu0 %v4554_v0 }
 0x745   :  { %3634 = vmatpush3.bf16.msra.mxu0 %v3842_v27  ;;  %v3869_v27 = vld [vmem:[#allocation28 + $0x24] ss:$8 sps:$4 sm:$0xff]  }
 0x746   :  { %3635 = vmatprep.subr.bf16.mxu0 %v4554_v0 }
 0x749   :  { %3636 = vmatpush3.bf16.msra.mxu0 %v3843_v46  ;;  %v3881_v46 = vld [vmem:[#allocation28 + $0x64] ss:$8 sps:$4 sm:$0xff]  }
 0x74a   :  { %3637 = vmatprep.subr.bf16.mxu0 %v4554_v0 }
 0x74d   :  { %3638 = vmatpush3.bf16.msra.mxu0 %v3844_v47  ;;  %v3879_v47 = vld [vmem:[#allocation28 + $0x60] ss:$8 sps:$4 sm:$0xff]  }
 0x74e   :  { %3643 = vmatprep.subr.bf16.mxu0 %v4554_v0 }
 0x803   :  { %v1385_v29 = vpop.f32.mrb[12].mxu0 }
 0x804   :  { %v1386_v30 = vadd.f32 %v3079_v28, %v1385_v29  ;;  %v3581_v31 = vpop.f32.mrb[13].mxu0  ;;  %v3872_v29 = vld [vmem:[#allocation28 + $0x34] ss:$8 sps:$4 sm:$0xff]  }
 0x805   :  { %v1388_v32 = vpop.f32.mrb[14].mxu0  ;;  %v3875_v31 = vld [vmem:[#allocation28 + $0x44] ss:$8 sps:$4 sm:$0xff]  }
 0x806   :  { %v1389_v33 = vadd.f32 %v3079_v28, %v1388_v32  ;;  %v3582_v34 = vpop.f32.mrb[15].mxu0  ;;  %v1392_v35 = vmax.f32 %v1386_v30, 0.0  ;;  %v3867_v28 = vld [vmem:[#allocation28 + $0x20] ss:$8 sps:$4 sm:$0xff]   ;;  %v3870_v30 = vld [vmem:[#allocation28 + $0x30] ss:$8 sps:$4 sm:$0xff]  }
 0x807   :  { %v3878_v32 = vld [vmem:[#allocation28 + $0x54] ss:$8 sps:$4 sm:$0xff]  }
 0x808   :  { %v1393_v36 = vmax.f32 %v1389_v33, 0.0  ;;  %v3876_v33 = vld [vmem:[#allocation28 + $0x50] ss:$8 sps:$4 sm:$0xff]   ;;  %v3115_v34 = vld [vmem:[#allocation5 + $0xc] ss:$0 sm:$0xff] }
 0x80a   :  { %v1394_v38 = vpack.c.bf16 %v1393_v36, %v1392_v35 }
 0x80c   :  { %3600 = vmatmul.mubr.bf16.vlgmr.msra.gmra.mrb[12].mxu1 %v1394_v38 }
 0x80d   :  { %3604 = vmatpush3.bf16.msra.mxu1 %v3829_v37  ;;  %3619 = vmatprep.mubr.msk.bf16.mxu1 %vm4555_vm0, %v4554_v0 }
 0x80e   :  { %3605 = vmatprep.subr.bf16.mxu1 %v4554_v0 }
 0x811   :  { %3606 = vmatpush3.bf16.msra.mxu1 %v3830_v39 }
 0x812   :  { %3607 = vmatprep.subr.bf16.mxu1 %v4554_v0 }
 0x815   :  { %3608 = vmatpush3.bf16.msra.mxu1 %v3831_v40 }
 0x816   :  { %3609 = vmatprep.subr.bf16.mxu1 %v4554_v0 }
 0x819   :  { %3610 = vmatpush3.bf16.msra.mxu1 %v3832_v41 }
 0x81a   :  { %3611 = vmatprep.subr.bf16.mxu1 %v4554_v0 }
 0x81d   :  { %3612 = vmatpush3.bf16.msra.mxu1 %v3833_v42 }
 0x81e   :  { %3613 = vmatprep.subr.bf16.mxu1 %v4554_v0 }
 0x821   :  { %3614 = vmatpush3.bf16.msra.mxu1 %v3834_v43 }
 0x822   :  { %3615 = vmatprep.subr.bf16.mxu1 %v4554_v0 }
 0x825   :  { %3616 = vmatpush3.bf16.msra.mxu1 %v3835_v44 }
 0x826   :  { %3617 = vmatprep.subr.bf16.mxu1 %v4554_v0 }
 0x829   :  { %3618 = vmatpush3.bf16.msra.mxu1 %v3836_v45 }
 0x82a   :  { %3663 = vmatprep.subr.bf16.mxu1 %v4554_v0 }
 0x82c   :  { %3620 = vmatmul.mubr.bf16.vlgmr.msra.gmra.mrb[12].mxu1 %v1279_v19 }
 0x82d   :  { %3679 = vmatprep.mubr.msk.bf16.mxu1 %vm4555_vm0, %v4554_v0  ;;  %3664 = vmatpush3.bf16.msra.mxu1 %v3853_v5  ;;  %v3935_v5 = vld [vmem:[#allocation31 + $0x84] ss:$8 sps:$4 sm:$0xff]  }
 0x82e   :  { %3665 = vmatprep.subr.bf16.mxu1 %v4554_v0 }
 0x831   :  { %3666 = vmatpush3.bf16.msra.mxu1 %v3854_v6  ;;  %v3933_v6 = vld [vmem:[#allocation31 + $0x80] ss:$8 sps:$4 sm:$0xff]  }
 0x832   :  { %3667 = vmatprep.subr.bf16.mxu1 %v4554_v0 }
 0x835   :  { %3668 = vmatpush3.bf16.msra.mxu1 %v3855_v7  ;;  %v3938_v7 = vld [vmem:[#allocation31 + $0x94] ss:$8 sps:$4 sm:$0xff]  }
 0x836   :  { %3669 = vmatprep.subr.bf16.mxu1 %v4554_v0 }
 0x839   :  { %3670 = vmatpush3.bf16.msra.mxu1 %v3856_v8  ;;  %v3936_v8 = vld [vmem:[#allocation31 + $0x90] ss:$8 sps:$4 sm:$0xff]  }
 0x83a   :  { %3671 = vmatprep.subr.bf16.mxu1 %v4554_v0 }
 0x83d   :  { %3672 = vmatpush3.bf16.msra.mxu1 %v3857_v9  ;;  %v3941_v9 = vld [vmem:[#allocation31 + $0xa4] ss:$8 sps:$4 sm:$0xff]  }
 0x83e   :  { %3673 = vmatprep.subr.bf16.mxu1 %v4554_v0 }
 0x841   :  { %3674 = vmatpush3.bf16.msra.mxu1 %v3858_v20 }
 0x842   :  { %3675 = vmatprep.subr.bf16.mxu1 %v4554_v0 }
 0x845   :  { %3676 = vmatpush3.bf16.msra.mxu1 %v3859_v21 }
 0x846   :  { %3677 = vmatprep.subr.bf16.mxu1 %v4554_v0 }
 0x849   :  { %3678 = vmatpush3.bf16.msra.mxu1 %v3860_v22 }
 0x8ff   :  { %v1612_v51 = vpop.f32.mrb[12].mxu1 }
 0x900   :  { %v5168_v52 = vadd.f32 %v3691_v50, %v1612_v51  ;;  %v3621_v53 = vpop.f32.mrb[13].mxu1  ;;  %v4556_v51 = vmov 0  }
 0x901   :  { %v1615_v54 = vpop.f32.mrb[14].mxu1  ;;  %v3911_v53 = vld [vmem:[#allocation31 + $0x4] ss:$8 sps:$4 sm:$0xff]  }
 0x902   :  { %v5170_v55 = vadd.f32 %v3691_v50, %v1615_v54  ;;  %v3622_v56 = vpop.f32.mrb[15].mxu1  ;;  %v1621_v57 = vmax.f32 %v5168_v52, 0.0  ;;  %v3887_v50 = vld [vmem:[#allocation29 + $0x4] ss:$8 sps:$4 sm:$0xff]   ;;  %v3909_v52 = vld [vmem:[#allocation31] ss:$8 sps:$4 sm:$0xff]   ;;  %2487 = vmatprep.subr.bf16.mxu1 %v3911_v53 }
 0x903   :  { %v3914_v54 = vld [vmem:[#allocation31 + $0x14] ss:$8 sps:$4 sm:$0xff]   ;;  %v3917_v56 = vld [vmem:[#allocation31 + $0x24] ss:$8 sps:$4 sm:$0xff]  }
 0x904   :  { %v1622_v58 = vmax.f32 %v5170_v55, 0.0  ;;  %v3912_v55 = vld [vmem:[#allocation31 + $0x10] ss:$8 sps:$4 sm:$0xff]   ;;  %v3971_v53 = vld [vmem:[#allocation32 + $0x44] ss:$8 sps:$4 sm:$0xff]  }
 0x906   :  { %v1623_v60 = vpack.c.bf16 %v1622_v58, %v1621_v57 }
 0x908   :  { %3640 = vmatmul.mubr.bf16.vlgmr.msra.gmra.mrb[16].mxu0 %v1623_v60  ;;  %v3923_v60 = vld [vmem:[#allocation31 + $0x44] ss:$8 sps:$4 sm:$0xff]  }
 0x909   :  { %3644 = vmatpush3.bf16.msra.mxu0 %v3845_v59  ;;  %3659 = vmatprep.mubr.msk.bf16.mxu0 %vm4555_vm0, %v4554_v0  ;;  %v3918_v59 = vld [vmem:[#allocation31 + $0x30] ss:$8 sps:$4 sm:$0xff]  }
 0x90a   :  { %3645 = vmatprep.subr.bf16.mxu0 %v4554_v0 }
 0x90d   :  { %3646 = vmatpush3.bf16.msra.mxu0 %v3846_v61  ;;  %v3921_v61 = vld [vmem:[#allocation31 + $0x40] ss:$8 sps:$4 sm:$0xff]  }
 0x90e   :  { %3647 = vmatprep.subr.bf16.mxu0 %v4554_v0 }
 0x911   :  { %3648 = vmatpush3.bf16.msra.mxu0 %v3847_v62  ;;  %v3926_v62 = vld [vmem:[#allocation31 + $0x54] ss:$8 sps:$4 sm:$0xff]  }
 0x912   :  { %3649 = vmatprep.subr.bf16.mxu0 %v4554_v0 }
 0x915   :  { %3650 = vmatpush3.bf16.msra.mxu0 %v3848_v63  ;;  %v3924_v63 = vld [vmem:[#allocation31 + $0x50] ss:$8 sps:$4 sm:$0xff]  }
 0x916   :  { %3651 = vmatprep.subr.bf16.mxu0 %v4554_v0 }
 0x919   :  { %3652 = vmatpush3.bf16.msra.mxu0 %v3849_v1  ;;  %v3929_v1 = vld [vmem:[#allocation31 + $0x64] ss:$8 sps:$4 sm:$0xff]  }
 0x91a   :  { %3653 = vmatprep.subr.bf16.mxu0 %v4554_v0 }
 0x91d   :  { %3654 = vmatpush3.bf16.msra.mxu0 %v3850_v2  ;;  %v3927_v2 = vld [vmem:[#allocation31 + $0x60] ss:$8 sps:$4 sm:$0xff]  }
 0x91e   :  { %3655 = vmatprep.subr.bf16.mxu0 %v4554_v0 }
 0x921   :  { %3656 = vmatpush3.bf16.msra.mxu0 %v3851_v3  ;;  %v3932_v3 = vld [vmem:[#allocation31 + $0x74] ss:$8 sps:$4 sm:$0xff]  }
 0x922   :  { %3657 = vmatprep.subr.bf16.mxu0 %v4554_v0  ;;  %v3873_v0 = vld [vmem:[#allocation28 + $0x40] ss:$8 sps:$4 sm:$0xff]  }
 0x925   :  { %3658 = vmatpush3.bf16.msra.mxu0 %v3852_v4  ;;  %v3930_v4 = vld [vmem:[#allocation31 + $0x70] ss:$8 sps:$4 sm:$0xff]  }
 0x926   :  { %2079 = vmatprep.subr.bf16.mxu0 %v3863_v24 }
 0x9db   :  { %v1729_v11 = vpop.f32.mrb[16].mxu0 }
 0x9dc   :  { %v1730_v12 = vadd.f32 %v3106_v10, %v1729_v11  ;;  %v3641_v13 = vpop.f32.mrb[17].mxu0  ;;  %v3944_v11 = vld [vmem:[#allocation31 + $0xb4] ss:$8 sps:$4 sm:$0xff]  }
 0x9dd   :  { %v1732_v14 = vpop.f32.mrb[18].mxu0  ;;  %v3947_v13 = vld [vmem:[#allocation31 + $0xc4] ss:$8 sps:$4 sm:$0xff]  }
 0x9de   :  { %v1733_v15 = vadd.f32 %v3106_v10, %v1732_v14  ;;  %v3642_v16 = vpop.f32.mrb[19].mxu0  ;;  %v1736_v17 = vmax.f32 %v1730_v12, 0.0  ;;  %v3939_v10 = vld [vmem:[#allocation31 + $0xa0] ss:$8 sps:$4 sm:$0xff]   ;;  %v3942_v12 = vld [vmem:[#allocation31 + $0xb0] ss:$8 sps:$4 sm:$0xff]  }
 0x9df   :  { %v3945_v14 = vld [vmem:[#allocation31 + $0xc0] ss:$8 sps:$4 sm:$0xff]   ;;  %v3948_v16 = vld [vmem:[#allocation31 + $0xd0] ss:$8 sps:$4 sm:$0xff]  }
 0x9e0   :  { %v1737_v18 = vmax.f32 %v1733_v15, 0.0  ;;  %v3950_v15 = vld [vmem:[#allocation31 + $0xd4] ss:$8 sps:$4 sm:$0xff]  }
 0x9e2   :  { %v1738_v19 = vpack.c.bf16 %v1737_v18, %v1736_v17  ;;  %v3124_v17 = vld [vmem:[#allocation5 + $0xd] ss:$0 sm:$0xff] }
 0x9e4   :  { %3660 = vmatmul.mubr.bf16.vlgmr.msra.gmra.mrb[20].mxu0 %v1738_v19 }
 0x9e5   :  { %2080 = vmatpush1.bf16.msra.mxu0 %v3861_v23  ;;  %2111 = vmatprep.mubr.bf16.mxu0 %v4556_v51 }
 0x9e6   :  { %2081 = vmatprep.subr.bf16.mxu0 %v3866_v25 }
 0x9e9   :  { %2082 = vmatpush1.bf16.msra.mxu0 %v3864_v26  ;;  %v3885_v26 = vld [vmem:[#allocation29] ss:$8 sps:$4 sm:$0xff]  }
 0x9ea   :  { %2083 = vmatprep.subr.bf16.mxu0 %v3869_v27 }
 0x9ed   :  { %2084 = vmatpush1.bf16.msra.mxu0 %v3867_v28  ;;  %v3890_v28 = vld [vmem:[#allocation29 + $0x14] ss:$8 sps:$4 sm:$0xff]  }
 0x9ee   :  { %2085 = vmatprep.subr.bf16.mxu0 %v3872_v29  ;;  %v3888_v29 = vld [vmem:[#allocation29 + $0x10] ss:$8 sps:$4 sm:$0xff]  }
 0x9f1   :  { %2086 = vmatpush1.bf16.msra.mxu0 %v3870_v30  ;;  %v3893_v30 = vld [vmem:[#allocation29 + $0x24] ss:$8 sps:$4 sm:$0xff]  }
 0x9f2   :  { %2087 = vmatprep.subr.bf16.mxu0 %v3875_v31  ;;  %v3891_v31 = vld [vmem:[#allocation29 + $0x20] ss:$8 sps:$4 sm:$0xff]  }
 0x9f5   :  { %2088 = vmatpush1.bf16.msra.mxu0 %v3873_v0  ;;  %v3896_v0 = vld [vmem:[#allocation29 + $0x34] ss:$8 sps:$4 sm:$0xff]  }
 0x9f6   :  { %2089 = vmatprep.subr.bf16.mxu0 %v3878_v32  ;;  %v3894_v32 = vld [vmem:[#allocation29 + $0x30] ss:$8 sps:$4 sm:$0xff]  }
 0x9f9   :  { %2090 = vmatpush1.bf16.msra.mxu0 %v3876_v33  ;;  %v3899_v33 = vld [vmem:[#allocation29 + $0x44] ss:$8 sps:$4 sm:$0xff]  }
 0x9fa   :  { %2091 = vmatprep.subr.bf16.mxu0 %v3881_v46  ;;  %v3957_v46 = vld [vmem:[#allocation32] ss:$8 sps:$4 sm:$0xff]  }
 0x9fd   :  { %2092 = vmatpush1.bf16.msra.mxu0 %v3879_v47  ;;  %v3959_v47 = vld [vmem:[#allocation32 + $0x4] ss:$8 sps:$4 sm:$0xff]  }
 0x9fe   :  { %2093 = vmatprep.subr.bf16.mxu0 %v3884_v48  ;;  %v3962_v48 = vld [vmem:[#allocation32 + $0x14] ss:$8 sps:$4 sm:$0xff]  }
 0xa01   :  { %2094 = vmatpush1.bf16.msra.mxu0 %v3882_v49  ;;  %v3960_v49 = vld [vmem:[#allocation32 + $0x10] ss:$8 sps:$4 sm:$0xff]  }
 0xa02   :  { %2230 = vmatprep.subr.bf16.mxu0 %v3887_v50  ;;  %v3965_v50 = vld [vmem:[#allocation32 + $0x24] ss:$8 sps:$4 sm:$0xff]  }
 0xab7   :  { %v1844_v35 = vpop.f32.mrb[20].mxu0 }
 0xab8   :  { %v1845_v36 = vadd.f32 %v3115_v34, %v1844_v35  ;;  %v3661_v37 = vpop.f32.mrb[21].mxu0  ;;  %v3902_v35 = vld [vmem:[#allocation29 + $0x54] ss:$8 sps:$4 sm:$0xff]  }
 0xab9   :  { %v1847_v38 = vpop.f32.mrb[22].mxu0  ;;  %v3905_v37 = vld [vmem:[#allocation29 + $0x64] ss:$8 sps:$4 sm:$0xff]  }
 0xaba   :  { %v1851_v39 = vadd.f32 %v1845_v36, %v1621_v57  ;;  %v1848_v40 = vadd.f32 %v3115_v34, %v1847_v38  ;;  %v3662_v41 = vpop.f32.mrb[23].mxu0  ;;  %v3915_v57 = vld [vmem:[#allocation31 + $0x20] ss:$8 sps:$4 sm:$0xff]   ;;  %v3900_v36 = vld [vmem:[#allocation29 + $0x50] ss:$8 sps:$4 sm:$0xff]  }
 0xabb   :  { %v3897_v34 = vld [vmem:[#allocation29 + $0x40] ss:$8 sps:$4 sm:$0xff]   ;;  %v3953_v41 = vld [vmem:[#allocation31 + $0xe4] ss:$8 sps:$4 sm:$0xff]  }
 0xabc   :  { %v1852_v42 = vadd.f32 %v1848_v40, %v1622_v58  ;;  %v1853_v43 = vmax.f32 %v1851_v39, 0.0  ;;  %v3920_v58 = vld [vmem:[#allocation31 + $0x34] ss:$8 sps:$4 sm:$0xff]   ;;  %v3903_v38 = vld [vmem:[#allocation29 + $0x60] ss:$8 sps:$4 sm:$0xff]  }
 0xabd   :  { %v3908_v39 = vld [vmem:[#allocation29 + $0x74] ss:$8 sps:$4 sm:$0xff]   ;;  %v3906_v40 = vld [vmem:[#allocation29 + $0x70] ss:$8 sps:$4 sm:$0xff]  }
 0xabe   :  { %v1854_v44 = vmax.f32 %v1852_v42, 0.0  ;;  %v3951_v42 = vld [vmem:[#allocation31 + $0xe0] ss:$8 sps:$4 sm:$0xff]  }
 0xac0   :  { %v5198_v45 = vpack.c.bf16 %v1854_v44, %v1853_v43  ;;  %v3956_v43 = vld [vmem:[#allocation31 + $0xf4] ss:$8 sps:$4 sm:$0xff]   ;;  %v3954_v44 = vld [vmem:[#allocation31 + $0xf0] ss:$8 sps:$4 sm:$0xff]  }
 0xac2   :  { %3680 = vmatmul.mubr.bf16.vlgmr.msra.gmra.mrb[16].mxu1 %v5198_v45 }
 0xac3   :  { %2488 = vmatpush1.bf16.msra.mxu1 %v3909_v52  ;;  %v3966_v52 = vld [vmem:[#allocation32 + $0x30] ss:$8 sps:$4 sm:$0xff]  }
 0xac4   :  { %2489 = vmatprep.subr.bf16.mxu1 %v3914_v54  ;;  %v3969_v54 = vld [vmem:[#allocation32 + $0x40] ss:$8 sps:$4 sm:$0xff]  }
 0xac7   :  { %2490 = vmatpush1.bf16.msra.mxu1 %v3912_v55  ;;  %v3974_v55 = vld [vmem:[#allocation32 + $0x54] ss:$8 sps:$4 sm:$0xff]  }
 0xac8   :  { %2491 = vmatprep.subr.bf16.mxu1 %v3917_v56  ;;  %v3972_v56 = vld [vmem:[#allocation32 + $0x50] ss:$8 sps:$4 sm:$0xff]  }
 0xacb   :  { %2492 = vmatpush1.bf16.msra.mxu1 %v3915_v57  ;;  %v3977_v57 = vld [vmem:[#allocation32 + $0x64] ss:$8 sps:$4 sm:$0xff]  }
 0xacc   :  { %2493 = vmatprep.subr.bf16.mxu1 %v3920_v58  ;;  %v3975_v58 = vld [vmem:[#allocation32 + $0x60] ss:$8 sps:$4 sm:$0xff]  }
 0xacf   :  { %2494 = vmatpush1.bf16.msra.mxu1 %v3918_v59  ;;  %v3980_v59 = vld [vmem:[#allocation32 + $0x74] ss:$8 sps:$4 sm:$0xff]  }
 0xad0   :  { %2495 = vmatprep.subr.bf16.mxu1 %v3923_v60  ;;  %v3978_v60 = vld [vmem:[#allocation32 + $0x70] ss:$8 sps:$4 sm:$0xff]  }
 0xad3   :  { %2496 = vmatpush1.bf16.msra.mxu1 %v3921_v61  ;;  %v3983_v61 = vld [vmem:[#allocation32 + $0x84] ss:$8 sps:$4 sm:$0xff]  }
 0xad4   :  { %2497 = vmatprep.subr.bf16.mxu1 %v3926_v62  ;;  %v3981_v62 = vld [vmem:[#allocation32 + $0x80] ss:$8 sps:$4 sm:$0xff]  }
 0xad7   :  { %2498 = vmatpush1.bf16.msra.mxu1 %v3924_v63  ;;  %v3986_v63 = vld [vmem:[#allocation32 + $0x94] ss:$8 sps:$4 sm:$0xff]  }
 0xad8   :  { %2499 = vmatprep.subr.bf16.mxu1 %v3929_v1  ;;  %v3984_v1 = vld [vmem:[#allocation32 + $0x90] ss:$8 sps:$4 sm:$0xff]  }
 0xadb   :  { %2500 = vmatpush1.bf16.msra.mxu1 %v3927_v2  ;;  %v3989_v2 = vld [vmem:[#allocation32 + $0xa4] ss:$8 sps:$4 sm:$0xff]  }
 0xadc   :  { %2501 = vmatprep.subr.bf16.mxu1 %v3932_v3  ;;  %v3987_v3 = vld [vmem:[#allocation32 + $0xa0] ss:$8 sps:$4 sm:$0xff]  }
 0xadf   :  { %2502 = vmatpush1.bf16.msra.mxu1 %v3930_v4  ;;  %v3992_v4 = vld [vmem:[#allocation32 + $0xb4] ss:$8 sps:$4 sm:$0xff]  }
 0xae0   :  { %2503 = vmatprep.subr.bf16.mxu1 %v3935_v5  ;;  %v3990_v5 = vld [vmem:[#allocation32 + $0xb0] ss:$8 sps:$4 sm:$0xff]  }
 0xae3   :  { %2504 = vmatpush1.bf16.msra.mxu1 %v3933_v6  ;;  %v3995_v6 = vld [vmem:[#allocation32 + $0xc4] ss:$8 sps:$4 sm:$0xff]  }
 0xae4   :  { %2505 = vmatprep.subr.bf16.mxu1 %v3938_v7  ;;  %v3993_v7 = vld [vmem:[#allocation32 + $0xc0] ss:$8 sps:$4 sm:$0xff]  }
 0xae7   :  { %2506 = vmatpush1.bf16.msra.mxu1 %v3936_v8  ;;  %v3998_v8 = vld [vmem:[#allocation32 + $0xd4] ss:$8 sps:$4 sm:$0xff]  }
 0xae8   :  { %2507 = vmatprep.subr.bf16.mxu1 %v3941_v9  ;;  %v3996_v9 = vld [vmem:[#allocation32 + $0xd0] ss:$8 sps:$4 sm:$0xff]  }
 0xaeb   :  { %2508 = vmatpush1.bf16.msra.mxu1 %v3939_v10  ;;  %v1989_v10 = vlaneseq }
 0xaec   :  { %2509 = vmatprep.subr.bf16.mxu1 %v3944_v11 }
 0xaed   :  { %v1990_v11 = vshrl.u32 %v1989_v10, 7 }
 0xaef   :  { %2510 = vmatpush1.bf16.msra.mxu1 %v3942_v12  ;;  %v5204_v12 = vsub.s32 1, %v1990_v11 }
 0xaf0   :  { %2511 = vmatprep.subr.bf16.mxu1 %v3947_v13  ;;  %v1987_v13 = vld [vmem:[#allocation5 + $0xe] sm:$0x3] }
 0xaf3   :  { %2512 = vmatpush1.bf16.msra.mxu1 %v3945_v14  ;;  %v5206_v14 = vsub.s32 0, %v1990_v11 }
 0xaf4   :  { %2513 = vmatprep.subr.bf16.mxu1 %v3950_v15  ;;  %v2138_v15 = vld [vmem:[#allocation5 + $0x10] sm:$0x3] }
 0xaf7   :  { %2514 = vmatpush1.bf16.msra.mxu1 %v3948_v16  ;;  %v1996_v16 = vrot.slane %v1987_v13, %v5204_v12 }
 0xaf8   :  { %2515 = vmatprep.subr.bf16.mxu1 %v3953_v41  ;;  %v4007_v41 = vld [vmem:[#allocation34 + $0x48] sm:$0xff]  }
 0xafb   :  { %2516 = vmatpush1.bf16.msra.mxu1 %v3951_v42  ;;  %v4008_v42 = vld [vmem:[#allocation34 + $0x8] sm:$0xff]  }
 0xafc   :  { %2517 = vmatprep.subr.bf16.mxu1 %v3956_v43  ;;  %v4009_v43 = vld [vmem:[#allocation34 + $0x50] sm:$0xff]  }
 0xaff   :  { %2518 = vmatpush1.bf16.msra.mxu1 %v3954_v44  ;;  %v4010_v44 = vld [vmem:[#allocation34 + $0x10] sm:$0xff]  }
 0xb95   :  { %v1961_v18 = vpop.f32.mrb[16].mxu1 }
 0xb96   :  { %v1962_v19 = vadd.f32 %v3124_v17, %v1961_v18  ;;  %v3681_v20 = vpop.f32.mrb[17].mxu1  ;;  %v1992_v18 = vrot.slane %v1987_v13, %v5206_v14 }
 0xb97   :  { %v1964_v21 = vpop.f32.mrb[18].mxu1 }
 0xb98   :  { %v1965_v22 = vadd.f32 %v3124_v17, %v1964_v21  ;;  %v3682_v23 = vpop.f32.mrb[19].mxu1  ;;  %v1968_v24 = vmax.f32 %v1962_v19, 0.0  ;;  %v2147_v17 = vrot.slane %v2138_v15, %v5204_v12  ;;  %v2143_v19 = vrot.slane %v2138_v15, %v5206_v14 }
 0xb9a   :  { %v1969_v25 = vmax.f32 %v1965_v22, 0.0  ;;  %v3697_v20 = vadd.f32 %v2147_v17, %v1996_v16  ;;  %v3695_v21 = vadd.f32 %v2143_v19, %v1992_v18 }
 0xb9c   :  { %v1970_v27 = vpack.c.bf16 %v1969_v25, %v1968_v24 }
 0xb9e   :  { %2112 = vmatmul.mubr.bf16.vlgmr.msra.gmra.mrb[24].mxu0 %v1970_v27 }
 0xb9f   :  { %2231 = vmatpush1.bf16.msra.mxu0 %v3885_v26  ;;  %2262 = vmatprep.mubr.bf16.mxu0 %v4556_v51  ;;  %v3963_v51 = vld [vmem:[#allocation32 + $0x20] ss:$8 sps:$4 sm:$0xff]  }
 0xba0   :  { %2232 = vmatprep.subr.bf16.mxu0 %v3890_v28 }
 0xba3   :  { %2233 = vmatpush1.bf16.msra.mxu0 %v3888_v29 }
 0xba4   :  { %2234 = vmatprep.subr.bf16.mxu0 %v3893_v30 }
 0xba7   :  { %2235 = vmatpush1.bf16.msra.mxu0 %v3891_v31 }
 0xba8   :  { %2236 = vmatprep.subr.bf16.mxu0 %v3896_v0 }
 0xbab   :  { %2237 = vmatpush1.bf16.msra.mxu0 %v3894_v32 }
 0xbac   :  { %2238 = vmatprep.subr.bf16.mxu0 %v3899_v33 }
 0xbaf   :  { %2239 = vmatpush1.bf16.msra.mxu0 %v3897_v34 }
 0xbb0   :  { %2240 = vmatprep.subr.bf16.mxu0 %v3902_v35  ;;  %v4001_v35 = vld [vmem:[#allocation32 + $0xe4] ss:$8 sps:$4 sm:$0xff]  }
 0xbb3   :  { %2241 = vmatpush1.bf16.msra.mxu0 %v3900_v36  ;;  %v3999_v36 = vld [vmem:[#allocation32 + $0xe0] ss:$8 sps:$4 sm:$0xff]  }
 0xbb4   :  { %2242 = vmatprep.subr.bf16.mxu0 %v3905_v37  ;;  %v4004_v37 = vld [vmem:[#allocation32 + $0xf4] ss:$8 sps:$4 sm:$0xff]  }
 0xbb7   :  { %2243 = vmatpush1.bf16.msra.mxu0 %v3903_v38  ;;  %v4002_v38 = vld [vmem:[#allocation32 + $0xf0] ss:$8 sps:$4 sm:$0xff]  }
 0xbb8   :  { %2244 = vmatprep.subr.bf16.mxu0 %v3908_v39  ;;  %v4005_v39 = vld [vmem:[#allocation34 + $0x40] sm:$0xff]  }
 0xbb9   :  { %3381 = vmatprep.subr.bf16.mxu1 %v4005_v39 }
 0xbbb   :  { %2245 = vmatpush1.bf16.msra.mxu0 %v3906_v40  ;;  %v4006_v40 = vld [vmem:[#allocation34] sm:$0xff]  }
 0xbbc   :  { %2740 = vmatprep.subr.bf16.mxu0 %v3959_v47  ;;  %v4012_v47 = vld [vmem:[#allocation34 + $0x18] sm:$0xff]  }
 0xbbe   :  { %2263 = vmatmul.mubr.bf16.vlgmr.msra.gmra.mrb[24].mxu0 %v5198_v45  ;;  %v3968_v45 = vld [vmem:[#allocation32 + $0x34] ss:$8 sps:$4 sm:$0xff]  }
 0xbbf   :  { %2741 = vmatpush1.bf16.msra.mxu0 %v3957_v46  ;;  %v4011_v46 = vld [vmem:[#allocation34 + $0x58] sm:$0xff]  }
 0xbc0   :  { %2742 = vmatprep.subr.bf16.mxu0 %v3962_v48  ;;  %v4013_v48 = vld [vmem:[#allocation34 + $0x60] sm:$0xff]  }
 0xbc3   :  { %2743 = vmatpush1.bf16.msra.mxu0 %v3960_v49  ;;  %v4014_v49 = vld [vmem:[#allocation34 + $0x20] sm:$0xff]  }
 0xbc4   :  { %2744 = vmatprep.subr.bf16.mxu0 %v3965_v50  ;;  %v2315_v50 = vld [vmem:[#allocation5 + $0x12] sm:$0x3] }
 0xbc7   :  { %2745 = vmatpush1.bf16.msra.mxu0 %v3963_v51  ;;  %v2320_v51 = vrot.slane %v2315_v50, %v5206_v14 }
 0xbc8   :  { %2746 = vmatprep.subr.bf16.mxu0 %v3968_v45  ;;  %v2324_v45 = vrot.slane %v2315_v50, %v5204_v12 }
 0xbcb   :  { %2747 = vmatpush1.bf16.msra.mxu0 %v3966_v52 }
 0xbcc   :  { %2748 = vmatprep.subr.bf16.mxu0 %v3971_v53 }
 0xbcf   :  { %2749 = vmatpush1.bf16.msra.mxu0 %v3969_v54 }
 0xbd0   :  { %2750 = vmatprep.subr.bf16.mxu0 %v3974_v55 }
 0xbd3   :  { %2751 = vmatpush1.bf16.msra.mxu0 %v3972_v56 }
 0xbd4   :  { %2752 = vmatprep.subr.bf16.mxu0 %v3977_v57 }
 0xbd7   :  { %2753 = vmatpush1.bf16.msra.mxu0 %v3975_v58 }
 0xbd8   :  { %2754 = vmatprep.subr.bf16.mxu0 %v3980_v59 }
 0xbdb   :  { %2755 = vmatpush1.bf16.msra.mxu0 %v3978_v60 }
 0xbdc   :  { %2756 = vmatprep.subr.bf16.mxu0 %v3983_v61 }
 0xbdf   :  { %2757 = vmatpush1.bf16.msra.mxu0 %v3981_v62 }
 0xbe0   :  { %2758 = vmatprep.subr.bf16.mxu0 %v3986_v63 }
 0xbe3   :  { %2759 = vmatpush1.bf16.msra.mxu0 %v3984_v1 }
 0xbe4   :  { %2760 = vmatprep.subr.bf16.mxu0 %v3989_v2 }
 0xbe7   :  { %2761 = vmatpush1.bf16.msra.mxu0 %v3987_v3  ;;  %v4015_v3 = vld [vmem:[#allocation34 + $0x68] sm:$0xff]  }
 0xbe8   :  { %2762 = vmatprep.subr.bf16.mxu0 %v3992_v4  ;;  %v4016_v4 = vld [vmem:[#allocation34 + $0x28] sm:$0xff]  }
 0xbeb   :  { %2763 = vmatpush1.bf16.msra.mxu0 %v3990_v5  ;;  %v4017_v5 = vld [vmem:[#allocation34 + $0x70] sm:$0xff]  }
 0xbec   :  { %2764 = vmatprep.subr.bf16.mxu0 %v3995_v6  ;;  %v4018_v6 = vld [vmem:[#allocation34 + $0x30] sm:$0xff]  }
 0xbef   :  { %2765 = vmatpush1.bf16.msra.mxu0 %v3993_v7  ;;  %v4019_v7 = vld [vmem:[#allocation34 + $0x78] sm:$0xff]  }
 0xbf0   :  { %2766 = vmatprep.subr.bf16.mxu0 %v3998_v8  ;;  %v4020_v8 = vld [vmem:[#allocation34 + $0x38] sm:$0xff]  }
 0xbf3   :  { %2767 = vmatpush1.bf16.msra.mxu0 %v3996_v9  ;;  %v2568_v9 = vld [vmem:[#allocation5 + $0x14] sm:$0x3] }
 0xbf4   :  { %2768 = vmatprep.subr.bf16.mxu0 %v4001_v35  ;;  %v2573_v10 = vrot.slane %v2568_v9, %v5206_v14  ;;  %v2577_v11 = vrot.slane %v2568_v9, %v5204_v12 }
 0xbf7   :  { %2769 = vmatpush1.bf16.msra.mxu0 %v3999_v36 }
 0xbf8   :  { %2770 = vmatprep.subr.bf16.mxu0 %v4004_v37 }
 0xbfb   :  { %2771 = vmatpush1.bf16.msra.mxu0 %v4002_v38 }
 0xc91   :  { %v2264_v22 = vpop.f32.mrb[24].mxu0 }
 0xc92   :  { %v2266_v23 = vpop.f32.mrb[25].mxu0  ;;  %v5214_v26 = vadd.f32 %v3695_v21, %v2264_v22 }
 0xc93   :  { %v5212_v24 = vadd.f32 %v3697_v20, %v2266_v23  ;;  %v2268_v25 = vpop.f32.mrb[26].mxu0 }
 0xc94   :  { %v5216_v27 = vadd.f32 %v3695_v21, %v2268_v25  ;;  %v2270_v28 = vpop.f32.mrb[27].mxu0  ;;  %v2277_v32 = vmax.f32 %v5214_v26, 0.0 }
 0xc95   :  { %v5218_v29 = vadd.f32 %v3697_v20, %v2270_v28  ;;  %v2278_v31 = vmax.f32 %v5212_v24, 0.0 }
 0xc96   :  { %v2279_v30 = vmax.f32 %v5216_v27, 0.0 }
 0xc97   :  { %v2280_v0 = vmax.f32 %v5218_v29, 0.0 }
 0xc98   :  { %v2281_v34 = vpack.c.bf16 %v2279_v30, %v2277_v32 }
 0xc99   :  { %v2282_v33 = vpack.c.bf16 %v2280_v0, %v2278_v31 }
 0xc9b   :  { %2519 = vmatprep.mubr.bf16.mxu1 %v2282_v33 }
 0xc9c   :  { %2520 = vmatmul.mubr.bf16.vlgmr.msra.gmra.mrb[20].mxu1 %v2281_v34 }
 0xc9d   :  { %3382 = vmatpush3.bf16.msra.mxu1 %v4006_v40 }
 0xc9e   :  { %3383 = vmatprep.subr.bf16.mxu1 %v4007_v41 }
 0xca1   :  { %3384 = vmatpush3.bf16.msra.mxu1 %v4008_v42 }
 0xca2   :  { %3385 = vmatprep.subr.bf16.mxu1 %v4009_v43 }
 0xca5   :  { %3386 = vmatpush3.bf16.msra.mxu1 %v4010_v44 }
 0xca6   :  { %3387 = vmatprep.subr.bf16.mxu1 %v4011_v46 }
 0xca9   :  { %3388 = vmatpush3.bf16.msra.mxu1 %v4012_v47 }
 0xcaa   :  { %3389 = vmatprep.subr.bf16.mxu1 %v4013_v48 }
 0xcad   :  { %3390 = vmatpush3.bf16.msra.mxu1 %v4014_v49 }
 0xcae   :  { %3391 = vmatprep.subr.bf16.mxu1 %v4015_v3 }
 0xcb1   :  { %3392 = vmatpush3.bf16.msra.mxu1 %v4016_v4 }
 0xcb2   :  { %3393 = vmatprep.subr.bf16.mxu1 %v4017_v5 }
 0xcb5   :  { %3394 = vmatpush3.bf16.msra.mxu1 %v4018_v6 }
 0xcb6   :  { %3395 = vmatprep.subr.bf16.mxu1 %v4019_v7 }
 0xcb9   :  { %3396 = vmatpush3.bf16.msra.mxu1 %v4020_v8 }
 0xd6f   :  { %v2521_v52 = vpop.f32.mrb[20].mxu1 }
 0xd70   :  { %v2522_v53 = vadd.f32 %v2521_v52, %v2320_v51  ;;  %v2523_v54 = vpop.f32.mrb[21].mxu1 }
 0xd71   :  { %v2524_v55 = vadd.f32 %v2523_v54, %v2324_v45  ;;  %v2525_v56 = vpop.f32.mrb[22].mxu1 }
 0xd72   :  { %v2526_v57 = vadd.f32 %v2525_v56, %v2320_v51  ;;  %v2527_v58 = vpop.f32.mrb[23].mxu1  ;;  %v2530_v60 = vmax.f32 %v2522_v53, 0.0 }
 0xd73   :  { %v2528_v59 = vadd.f32 %v2527_v58, %v2324_v45  ;;  %v2531_v62 = vmax.f32 %v2524_v55, 0.0 }
 0xd74   :  { %v2532_v61 = vmax.f32 %v2526_v57, 0.0 }
 0xd75   :  { %v2533_v63 = vmax.f32 %v2528_v59, 0.0 }
 0xd76   :  { %v2534_v1 = vpack.c.bf16 %v2532_v61, %v2530_v60 }
 0xd77   :  { %v2535_v2 = vpack.c.bf16 %v2533_v63, %v2531_v62 }
 0xd79   :  { %2772 = vmatprep.mubr.bf16.mxu0 %v2535_v2 }
 0xd7a   :  { %2773 = vmatmul.mubr.bf16.vlgmr.msra.gmra.mrb[28].mxu0 %v2534_v1 }
 0xe4d   :  { %v2774_v13 = vpop.f32.mrb[28].mxu0 }
 0xe4e   :  { %v2775_v15 = vadd.f32 %v2774_v13, %v2573_v10  ;;  %v2776_v16 = vpop.f32.mrb[29].mxu0 }
 0xe4f   :  { %v2777_v17 = vadd.f32 %v2776_v16, %v2577_v11  ;;  %v2778_v18 = vpop.f32.mrb[30].mxu0 }
 0xe50   :  { %v2783_v19 = vadd.f32 %v2775_v15, %v2277_v32  ;;  %v2779_v20 = vadd.f32 %v2778_v18, %v2573_v10  ;;  %v2780_v21 = vpop.f32.mrb[31].mxu0 }
 0xe51   :  { %v2784_v22 = vadd.f32 %v2777_v17, %v2278_v31  ;;  %v2781_v23 = vadd.f32 %v2780_v21, %v2577_v11  ;;  %v3229_v31 = vld [vmem:[#allocation5 + $0x16] ss:$0 sm:$0xff] }
 0xe52   :  { %v2785_v25 = vadd.f32 %v2779_v20, %v2279_v30  ;;  %v2787_v14 = vmax.f32 %v2783_v19, 0.0 }
 0xe53   :  { %v2786_v12 = vadd.f32 %v2781_v23, %v2280_v0  ;;  %v2788_v33 = vmax.f32 %v2784_v22, 0.0 }
 0xe54   :  { %v2789_v28 = vmax.f32 %v2785_v25, 0.0 }
 0xe55   :  { %v2790_v34 = vmax.f32 %v2786_v12, 0.0 }
 0xe56   :  { %v2791_v35 = vpack.c.bf16 %v2789_v28, %v2787_v14 }
 0xe57   :  { %v2792_v36 = vpack.c.bf16 %v2790_v34, %v2788_v33 }
 0xe59   :  { %2960 = vmatprep.mubr.bf16.mxu1 %v2792_v36 }
 0xe5a   :  { %2961 = vmatmul.mubr.bf16.vlgmr.msra.gmra.mrb[24].mxu1 %v2791_v35 }
 0xf2d   :  { %v3397_v26 = vpop.f32.mrb[24].mxu1 }
 0xf2e   :  { %v3398_v32 = vpop.f32.mrb[25].mxu1 }
 0xf2f   :  { %v3399_v37 = vadd.f32 %v3398_v32, %v3397_v26  ;;  %v3400_v24 = vpop.f32.mrb[26].mxu1 }
 0xf30   :  { %v3401_v38 = vpop.f32.mrb[27].mxu1 }
 0xf31   :  { %v3402_v39 = vadd.f32 %v3401_v38, %v3400_v24  ;;  %v2963_v27 = vadd.f32 %v3399_v37, %v3229_v31 }
 0xf33   :  { %v2966_v29 = vadd.f32 %v3402_v39, %v3229_v31 }
 0xf35   :  { %v3253_v30 = vpack.c.bf16 %v2966_v29, %v2963_v27 }
 0xf37   :  { %3254 = vst [vmem:[#allocation35] sm:$0xff] %v3253_v30  }
 0xf38   :  { %4494 = shalt.err (!%p4491_p4)
}
 0xf39   :  { %s5304_s20 = sld [smem:[#allocation55_spill]] }
 0xf3f   :  { %s4495_s21 = scalar_lea.hbm %s5304_s20, 128 }
 0xf40   :  { %p4496_p5 = scmp.ne.s32.totalorder %s5304_s20, %s4495_s21  ;;  %p4499_p6 = scmp.lt.u32.totalorder %s4495_s21, %s5304_s20 }
 0xf42   :  { %p4501_p7 = pnand %p4499_p6, %p4496_p5 }
 0xf44   :  { %4504 = shalt.err (!%p4501_p7)
}
 0xf45   :  { %2990 = dma.vmem_to_hbm [thread:$0]  %s2985_s11, 128, %s5304_s20, [#allocation4], %s4532_s3, %s4532_s3, %s4533_s23  }
 0xf46   :  { %4527 = dma.done.wait [#allocation4], 128  }
 0xf47   :  { %4528 = vsyncadd [#allocation4], 4294967168 }
 0xf48   :  { %2994 = vsyncpa [#allocation3], 1 }
 0xf49   :  { %2995 = vsyncpa [#allocation6], 1 }
 0xf4a   :  { %2996 = vsyncpa [#allocation9], 1 }
 0xf4b   :  { %2997 = vsyncpa [#allocation12], 1 }
 0xf4c   :  { %2998 = vsyncpa [#allocation15], 1 }
 0xf4d   :  { %2999 = vsyncpa [#allocation18], 1 }
 0xf4e   :  { %3000 = vsyncpa [#allocation21], 1 }
 0xf4f   :  { %3001 = vsyncpa [#allocation24], 1 }
 0xf50   :  { %3002 = vsyncpa [#allocation27], 1 }
 0xf51   :  { %3003 = vsyncpa [#allocation30], 1 }
 0xf52   :  { %3004 = vsyncpa [#allocation33], 1 }
 0xf53   :  { %3005 = vsyncpa [#allocation4], 1 }

// kernel: tpu_custom_call.1
= control target key start
LH: loop header
LB: loop body
LE: loop exit
PB: predicated region body
PF: predicated region fallthrough
CT: control target
= control target key end

     0   :  { %s5259_s0 = inlined_call_operand.hbm [shape: bf16[16,128], index: 0, kind: input, shape index: {}]   ;;  %s5260_s1 = inlined_call_operand.hbm [shape: f32[1,2944], index: 1, kind: input, shape index: {}]   ;;  %s5261_s2 = inlined_call_operand.hbm [shape: bf16[128,128], index: 2, kind: input, shape index: {}]   ;;  %s5262_s3 = inlined_call_operand.hbm [shape: bf16[128,128], index: 3, kind: input, shape index: {}]   ;;  %s5263_s4 = inlined_call_operand.hbm [shape: bf16[128,128], index: 4, kind: input, shape index: {}]   ;;  %s5264_s5 = inlined_call_operand.hbm [shape: bf16[128,128], index: 5, kind: input, shape index: {}]   ;;  %s5265_s6 = inlined_call_operand.hbm [shape: bf16[128,128], index: 6, kind: input, shape index: {}]   ;;  %s5266_s7 = inlined_call_operand.hbm [shape: bf16[128,128], index: 7, kind: input, shape index: {}]   ;;  %s5267_s8 = inlined_call_operand.hbm [shape: bf16[128,128], index: 8, kind: input, shape index: {}]   ;;  %s5268_s9 = inlined_call_operand.hbm [shape: bf16[128,128], index: 9, kind: input, shape index: {}]   ;;  %s5269_s10 = inlined_call_operand.hbm [shape: bf16[128,128], index: 10, kind: input, shape index: {}]   ;;  %s5270_s11 = inlined_call_operand.hbm [shape: bf16[128,128], index: 11, kind: input, shape index: {}]   ;;  %s5271_s12 = inlined_call_operand.hbm [shape: bf16[128,128], index: 12, kind: input, shape index: {}]   ;;  %s5272_s13 = inlined_call_operand.hbm [shape: bf16[128,128], index: 13, kind: input, shape index: {}]   ;;  %s5273_s14 = inlined_call_operand.hbm [shape: bf16[128,128], index: 14, kind: input, shape index: {}]   ;;  %s5274_s15 = inlined_call_operand.hbm [shape: bf16[128,128], index: 15, kind: input, shape index: {}]   ;;  %s5275_s16 = inlined_call_operand.hbm [shape: bf16[128,256], index: 16, kind: input, shape index: {}]   ;;  %s5276_s17 = inlined_call_operand.hbm [shape: bf16[128,256], index: 17, kind: input, shape index: {}]   ;;  %s5277_s18 = inlined_call_operand.hbm [shape: bf16[256,256], index: 18, kind: input, shape index: {}]   ;;  %s5278_s19 = inlined_call_operand.hbm [shape: bf16[256,256], index: 19, kind: input, shape index: {}]   ;;  %s5279_s20 = inlined_call_operand.hbm [shape: bf16[256,128], index: 20, kind: input, shape index: {}]   ;;  %s5280_s21 = inlined_call_operand.hbm [shape: bf16[16,128], index: 21, kind: output, shape index: {}]  }
   0x1   :  { %5289 = sst [smem:[#allocation48_spill]] %s5259_s0 }
   0x2   :  { %5290 = sst [smem:[#allocation49_spill]] %s5260_s1 }
   0x3   :  { %5291 = sst [smem:[#allocation50_spill]] %s5261_s2 }
   0x4   :  { %5292 = sst [smem:[#allocation51_spill]] %s5262_s3 }
   0x5   :  { %5293 = sst [smem:[#allocation52_spill]] %s5263_s4 }
   0x6   :  { %5294 = sst [smem:[#allocation53_spill]] %s5264_s5 }
   0x7   :  { %5295 = sst [smem:[#allocation54_spill]] %s5279_s20 }
   0x8   :  { %5296 = sst [smem:[#allocation55_spill]] %s5280_s21 }
   0x9   :  { %26 = vsyncpa [#allocation3], 0 }
   0xa   :  { %27 = vsyncpa [#allocation6], 0 }
   0xb   :  { %28 = vsyncpa [#allocation9], 0 }
   0xc   :  { %29 = vsyncpa [#allocation12], 0 }
   0xd   :  { %30 = vsyncpa [#allocation15], 0 }
   0xe   :  { %31 = vsyncpa [#allocation18], 0 }
   0xf   :  { %32 = vsyncpa [#allocation21], 0 }
  0x10   :  { %33 = vsyncpa [#allocation24], 0 }
  0x11   :  { %34 = vsyncpa [#allocation27], 0 }
  0x12   :  { %35 = vsyncpa [#allocation30], 0 }
  0x13   :  { %36 = vsyncpa [#allocation33], 0 }
  0x14   :  { %37 = vsyncpa [#allocation4], 0  ;;  %s4529_s2 = smov [#allocation5]   ;;  %s5297_s3 = sld [smem:[#allocation49_spill]] }
  0x15   :  { %s56_s25 = sshll.u32 %s4529_s2, 4  ;;  %s57_s25 = int_to_ptr.vmem [resolvable:$true] %s56_s25 }
  0x1a   :  { %s4021_s28 = scalar_lea.hbm %s5297_s3, 368 }
  0x1b   :  { %p4022_p0 = scmp.ne.s32.totalorder %s5297_s3, %s4021_s28  ;;  %p4025_p1 = scmp.lt.u32.totalorder %s4021_s28, %s5297_s3 }
  0x1d   :  { %p4027_p2 = pnand %p4025_p1, %p4022_p0 }
  0x1f   :  { %4030 = shalt.err (!%p4027_p2)
}
  0x20   :  { %s4031_s5 = scalar_lea.vmem %s57_s25, 368  ;;  %s4035_s22 = scalar_lea.vmem %s57_s25, 384 }
  0x21   :  { %p4032_p3 = scmp.ne.s32.totalorder %s57_s25, %s4031_s5  ;;  %p4036_p4 = scmp.lt.s32.totalorder %s57_s25, %s57_s25 }
  0x22   :  { %p4037_p5 = scmp.lt.s32.totalorder %s4035_s22, %s4031_s5 }
  0x24   :  { %p4038_p6 = por %p4037_p5, %p4036_p4 }
  0x26   :  { %p4039_p7 = pnand %p4038_p6, %p4032_p3 }
  0x28   :  { %4042 = shalt.err (!%p4039_p7)
}
  0x29   :  { %59 = dma.hbm_to_vmem [thread:$0]  %s5297_s3, 368, %s57_s25, [#allocation6]  }
  0x2a   :  { %s4530_s24 = smov [#allocation8]   ;;  %s4531_s26 = smov [#allocation11]  }
  0x2b   :  { %s77_s2 = sshll.u32 %s4530_s24, 4  ;;  %s101_s27 = sshll.u32 %s4531_s26, 4  ;;  %s78_s2 = int_to_ptr.vmem [resolvable:$true] %s77_s2  ;;  %s102_s27 = int_to_ptr.vmem [resolvable:$true] %s101_s27 }
  0x2c   :  { %s5298_s0 = sld [smem:[#allocation51_spill]] }
  0x32   :  { %s4043_s4 = scalar_lea.hbm %s5298_s0, 1024 }
  0x33   :  { %p4044_p8 = scmp.ne.s32.totalorder %s5298_s0, %s4043_s4  ;;  %p4047_p9 = scmp.lt.u32.totalorder %s4043_s4, %s5298_s0 }
  0x35   :  { %p4049_p10 = pnand %p4047_p9, %p4044_p8 }
  0x37   :  { %4052 = shalt.err (!%p4049_p10)
}
  0x38   :  { %s4053_s25 = scalar_lea.vmem %s78_s2, 1024  ;;  %p4058_p12 = scmp.lt.s32.totalorder %s78_s2, %s78_s2 }
  0x39   :  { %p4054_p11 = scmp.ne.s32.totalorder %s78_s2, %s4053_s25  ;;  %p4059_p13 = scmp.lt.s32.totalorder %s4053_s25, %s4053_s25 }
  0x3b   :  { %p4060_p0 = por %p4059_p13, %p4058_p12 }
  0x3d   :  { %p4061_p1 = pnand %p4060_p0, %p4054_p11 }
  0x3f   :  { %4064 = shalt.err (!%p4061_p1)
}
  0x40   :  { %s4532_s3 = smov 64   ;;  %s4533_s23 = smov 4  }
  0x41   :  { %83 = dma.hbm_to_vmem [thread:$0]  %s5298_s0, 1024, %s78_s2, [#allocation9], %s4532_s3, %s4532_s3, %s4533_s23  }
  0x42   :  { %s5299_s28 = sld [smem:[#allocation53_spill]] }
  0x48   :  { %s4065_s29 = scalar_lea.hbm %s5299_s28, 1024 }
  0x49   :  { %p4066_p2 = scmp.ne.s32.totalorder %s5299_s28, %s4065_s29  ;;  %p4069_p3 = scmp.lt.u32.totalorder %s4065_s29, %s5299_s28 }
  0x4b   :  { %p4071_p4 = pnand %p4069_p3, %p4066_p2 }
  0x4d   :  { %4074 = shalt.err (!%p4071_p4)
}
  0x4e   :  { %s4075_s25 = scalar_lea.vmem %s102_s27, 1024  ;;  %p4080_p6 = scmp.lt.s32.totalorder %s102_s27, %s102_s27 }
  0x4f   :  { %p4076_p5 = scmp.ne.s32.totalorder %s102_s27, %s4075_s25  ;;  %p4081_p7 = scmp.lt.s32.totalorder %s4075_s25, %s4075_s25 }
  0x51   :  { %p4082_p8 = por %p4081_p7, %p4080_p6 }
  0x53   :  { %p4083_p9 = pnand %p4082_p8, %p4076_p5 }
  0x55   :  { %4086 = shalt.err (!%p4083_p9)
}
  0x56   :  { %107 = dma.hbm_to_vmem [thread:$0]  %s5299_s28, 1024, %s102_s27, [#allocation12], %s4532_s3, %s4532_s3, %s4533_s23  }
  0x57   :  { %s4534_s21 = smov [#allocation14]   ;;  %s4535_s24 = smov [#allocation17]  }
  0x58   :  { %s125_s1 = sshll.u32 %s4534_s21, 4  ;;  %s149_s26 = sshll.u32 %s4535_s24, 4  ;;  %s126_s1 = int_to_ptr.vmem [resolvable:$true] %s125_s1  ;;  %s150_s26 = int_to_ptr.vmem [resolvable:$true] %s149_s26 }
  0x59   :  { %s4087_s30 = scalar_lea.hbm %s5266_s7, 1024 }
  0x5a   :  { %p4088_p10 = scmp.ne.s32.totalorder %s5266_s7, %s4087_s30  ;;  %p4091_p11 = scmp.lt.u32.totalorder %s4087_s30, %s5266_s7 }
  0x5c   :  { %p4093_p12 = pnand %p4091_p11, %p4088_p10 }
  0x5e   :  { %4096 = shalt.err (!%p4093_p12)
}
  0x5f   :  { %s4097_s27 = scalar_lea.vmem %s126_s1, 1024  ;;  %p4102_p0 = scmp.lt.s32.totalorder %s126_s1, %s126_s1 }
  0x60   :  { %p4098_p13 = scmp.ne.s32.totalorder %s126_s1, %s4097_s27  ;;  %p4103_p1 = scmp.lt.s32.totalorder %s4097_s27, %s4097_s27 }
  0x62   :  { %p4104_p2 = por %p4103_p1, %p4102_p0 }
  0x64   :  { %p4105_p3 = pnand %p4104_p2, %p4098_p13 }
  0x66   :  { %4108 = shalt.err (!%p4105_p3)
}
  0x67   :  { %131 = dma.hbm_to_vmem [thread:$0]  %s5266_s7, 1024, %s126_s1, [#allocation15], %s4532_s3, %s4532_s3, %s4533_s23  }
  0x68   :  { %s4109_s21 = scalar_lea.hbm %s5268_s9, 1024 }
  0x69   :  { %p4110_p4 = scmp.ne.s32.totalorder %s5268_s9, %s4109_s21  ;;  %p4113_p5 = scmp.lt.u32.totalorder %s4109_s21, %s5268_s9 }
  0x6b   :  { %p4115_p6 = pnand %p4113_p5, %p4110_p4 }
  0x6d   :  { %4118 = shalt.err (!%p4115_p6)
}
  0x6e   :  { %s4119_s5 = scalar_lea.vmem %s150_s26, 1024  ;;  %p4124_p8 = scmp.lt.s32.totalorder %s150_s26, %s150_s26 }
  0x6f   :  { %p4120_p7 = scmp.ne.s32.totalorder %s150_s26, %s4119_s5  ;;  %p4125_p9 = scmp.lt.s32.totalorder %s4119_s5, %s4119_s5 }
  0x71   :  { %p4126_p10 = por %p4125_p9, %p4124_p8 }
  0x73   :  { %p4127_p11 = pnand %p4126_p10, %p4120_p7 }
  0x75   :  { %4130 = shalt.err (!%p4127_p11)
}
  0x76   :  { %155 = dma.hbm_to_vmem [thread:$0]  %s5268_s9, 1024, %s150_s26, [#allocation18], %s4532_s3, %s4532_s3, %s4533_s23  }
  0x77   :  { %s4536_s22 = smov [#allocation20]   ;;  %s4537_s27 = smov [#allocation23]  }
  0x78   :  { %s173_s25 = sshll.u32 %s4536_s22, 4  ;;  %s197_s28 = sshll.u32 %s4537_s27, 4  ;;  %s174_s25 = int_to_ptr.vmem [resolvable:$true] %s173_s25  ;;  %s198_s28 = int_to_ptr.vmem [resolvable:$true] %s197_s28 }
  0x79   :  { %s4131_s20 = scalar_lea.hbm %s5270_s11, 1024 }
  0x7a   :  { %p4132_p12 = scmp.ne.s32.totalorder %s5270_s11, %s4131_s20  ;;  %p4135_p13 = scmp.lt.u32.totalorder %s4131_s20, %s5270_s11 }
  0x7c   :  { %p4137_p0 = pnand %p4135_p13, %p4132_p12 }
  0x7e   :  { %4140 = shalt.err (!%p4137_p0)
}
  0x7f   :  { %s4141_s9 = scalar_lea.vmem %s174_s25, 1024  ;;  %p4146_p2 = scmp.lt.s32.totalorder %s174_s25, %s174_s25 }
  0x80   :  { %p4142_p1 = scmp.ne.s32.totalorder %s174_s25, %s4141_s9  ;;  %p4147_p3 = scmp.lt.s32.totalorder %s4141_s9, %s4141_s9 }
  0x82   :  { %p4148_p4 = por %p4147_p3, %p4146_p2 }
  0x84   :  { %p4149_p5 = pnand %p4148_p4, %p4142_p1 }
  0x86   :  { %4152 = shalt.err (!%p4149_p5)
}
  0x87   :  { %179 = dma.hbm_to_vmem [thread:$0]  %s5270_s11, 1024, %s174_s25, [#allocation21], %s4532_s3, %s4532_s3, %s4533_s23  }
  0x88   :  { %s4153_s1 = scalar_lea.hbm %s5272_s13, 1024 }
  0x89   :  { %p4154_p6 = scmp.ne.s32.totalorder %s5272_s13, %s4153_s1  ;;  %p4157_p7 = scmp.lt.u32.totalorder %s4153_s1, %s5272_s13 }
  0x8b   :  { %p4159_p8 = pnand %p4157_p7, %p4154_p6 }
  0x8d   :  { %4162 = shalt.err (!%p4159_p8)
}
  0x8e   :  { %s4163_s20 = scalar_lea.vmem %s198_s28, 1024  ;;  %p4168_p10 = scmp.lt.s32.totalorder %s198_s28, %s198_s28 }
  0x8f   :  { %p4164_p9 = scmp.ne.s32.totalorder %s198_s28, %s4163_s20  ;;  %p4169_p11 = scmp.lt.s32.totalorder %s4163_s20, %s4163_s20 }
  0x91   :  { %p4170_p12 = por %p4169_p11, %p4168_p10 }
  0x93   :  { %p4171_p13 = pnand %p4170_p12, %p4164_p9 }
  0x95   :  { %4174 = shalt.err (!%p4171_p13)
}
  0x96   :  { %203 = dma.hbm_to_vmem [thread:$0]  %s5272_s13, 1024, %s198_s28, [#allocation24], %s4532_s3, %s4532_s3, %s4533_s23  }
  0x97   :  { %s4538_s21 = smov [#allocation26]   ;;  %s4175_s9 = scalar_lea.hbm %s5274_s15, 1024 }
  0x98   :  { %s221_s24 = sshll.u32 %s4538_s21, 4  ;;  %p4176_p0 = scmp.ne.s32.totalorder %s5274_s15, %s4175_s9  ;;  %s222_s24 = int_to_ptr.vmem [resolvable:$true] %s221_s24 }
  0x99   :  { %p4179_p1 = scmp.lt.u32.totalorder %s4175_s9, %s5274_s15 }
  0x9b   :  { %p4181_p2 = pnand %p4179_p1, %p4176_p0 }
  0x9d   :  { %4184 = shalt.err (!%p4181_p2)
}
  0x9e   :  { %s4185_s1 = scalar_lea.vmem %s222_s24, 1024  ;;  %p4190_p4 = scmp.lt.s32.totalorder %s222_s24, %s222_s24 }
  0x9f   :  { %p4186_p3 = scmp.ne.s32.totalorder %s222_s24, %s4185_s1  ;;  %p4191_p5 = scmp.lt.s32.totalorder %s4185_s1, %s4185_s1 }
  0xa1   :  { %p4192_p6 = por %p4191_p5, %p4190_p4 }
  0xa3   :  { %p4193_p7 = pnand %p4192_p6, %p4186_p3 }
  0xa5   :  { %4196 = shalt.err (!%p4193_p7)
}
  0xa6   :  { %227 = dma.hbm_to_vmem [thread:$0]  %s5274_s15, 1024, %s222_s24, [#allocation27], %s4532_s3, %s4532_s3, %s4533_s23  }
  0xa7   :  { %s4539_s22 = smov [#allocation29]   ;;  %s4540_s2 = smov [#allocation32]  }
  0xa8   :  { %s245_s27 = sshll.u32 %s4539_s22, 4  ;;  %s269_s0 = sshll.u32 %s4540_s2, 4  ;;  %s246_s27 = int_to_ptr.vmem [resolvable:$true] %s245_s27  ;;  %s4785_s0 = int_to_ptr.vmem [resolvable:$true] %s269_s0 }
  0xa9   :  { %s4197_s25 = scalar_lea.hbm %s5276_s17, 2048 }
  0xaa   :  { %p4198_p8 = scmp.ne.s32.totalorder %s5276_s17, %s4197_s25  ;;  %p4201_p9 = scmp.lt.u32.totalorder %s4197_s25, %s5276_s17 }
  0xac   :  { %p4203_p10 = pnand %p4201_p9, %p4198_p8 }
  0xae   :  { %4206 = shalt.err (!%p4203_p10)
}
  0xaf   :  { %s4207_s15 = scalar_lea.vmem %s246_s27, 2048  ;;  %p4212_p12 = scmp.lt.s32.totalorder %s246_s27, %s246_s27 }
  0xb0   :  { %p4208_p11 = scmp.ne.s32.totalorder %s246_s27, %s4207_s15  ;;  %p4213_p13 = scmp.lt.s32.totalorder %s4207_s15, %s4207_s15 }
  0xb2   :  { %p4214_p0 = por %p4213_p13, %p4212_p12 }
  0xb4   :  { %p4215_p1 = pnand %p4214_p0, %p4208_p11 }
  0xb6   :  { %4218 = shalt.err (!%p4215_p1)
}
  0xb7   :  { %s4541_s24 = smov 128   ;;  %s4542_s26 = smov 8  }
  0xb8   :  { %251 = dma.hbm_to_vmem [thread:$0]  %s5276_s17, 2048, %s246_s27, [#allocation30], %s4541_s24, %s4541_s24, %s4542_s26  }
  0xb9   :  { %s4219_s13 = scalar_lea.hbm %s5278_s19, 4096 }
  0xba   :  { %p4220_p2 = scmp.ne.s32.totalorder %s5278_s19, %s4219_s13  ;;  %p4223_p3 = scmp.lt.u32.totalorder %s4219_s13, %s5278_s19 }
  0xbc   :  { %p4225_p4 = pnand %p4223_p3, %p4220_p2 }
  0xbe   :  { %4228 = shalt.err (!%p4225_p4)
}
  0xbf   :  { %s4229_s11 = scalar_lea.vmem %s4785_s0, 4096  ;;  %p4234_p6 = scmp.lt.s32.totalorder %s4785_s0, %s4785_s0 }
  0xc0   :  { %p4230_p5 = scmp.ne.s32.totalorder %s4785_s0, %s4229_s11  ;;  %p4235_p7 = scmp.lt.s32.totalorder %s4229_s11, %s4229_s11 }
  0xc2   :  { %p4236_p8 = por %p4235_p7, %p4234_p6 }
  0xc4   :  { %p4237_p9 = pnand %p4236_p8, %p4230_p5 }
  0xc6   :  { %4240 = shalt.err (!%p4237_p9)
}
  0xc7   :  { %275 = dma.hbm_to_vmem [thread:$0]  %s5278_s19, 4096, %s4785_s0, [#allocation33], %s4541_s24, %s4541_s24, %s4542_s26  }
  0xc8   :  { %s4543_s25 = smov [#allocation2]   ;;  %s4544_s29 = smov [#allocation7]  }
  0xc9   :  { %s43_s21 = sshll.u32 %s4543_s25, 4  ;;  %s65_s4 = sshll.u32 %s4544_s29, 4  ;;  %s44_s21 = int_to_ptr.vmem [resolvable:$true] %s43_s21  ;;  %s4822_s4 = int_to_ptr.vmem [resolvable:$true] %s65_s4 }
  0xca   :  { %s5300_s30 = sld [smem:[#allocation48_spill]] }
  0xd0   :  { %s4241_s5 = scalar_lea.hbm %s5300_s30, 128 }
  0xd1   :  { %p4242_p10 = scmp.ne.s32.totalorder %s5300_s30, %s4241_s5  ;;  %p4245_p11 = scmp.lt.u32.totalorder %s4241_s5, %s5300_s30 }
  0xd3   :  { %p4247_p12 = pnand %p4245_p11, %p4242_p10 }
  0xd5   :  { %4250 = shalt.err (!%p4247_p12)
}
  0xd6   :  { %s4251_s19 = scalar_lea.vmem %s44_s21, 128  ;;  %p4256_p0 = scmp.lt.s32.totalorder %s44_s21, %s44_s21 }
  0xd7   :  { %p4252_p13 = scmp.ne.s32.totalorder %s44_s21, %s4251_s19  ;;  %p4257_p1 = scmp.lt.s32.totalorder %s4251_s19, %s4251_s19 }
  0xd9   :  { %p4258_p2 = por %p4257_p1, %p4256_p0 }
  0xdb   :  { %p4259_p3 = pnand %p4258_p2, %p4252_p13 }
  0xdd   :  { %4262 = shalt.err (!%p4259_p3)
}
  0xde   :  { %49 = dma.hbm_to_vmem [thread:$0]  %s5300_s30, 128, %s44_s21, [#allocation3], %s4532_s3, %s4532_s3, %s4533_s23  }
  0xdf   :  { %s5301_s11 = sld [smem:[#allocation50_spill]] }
  0xe5   :  { %s4263_s17 = scalar_lea.hbm %s5301_s11, 1024 }
  0xe6   :  { %p4264_p4 = scmp.ne.s32.totalorder %s5301_s11, %s4263_s17  ;;  %p4267_p5 = scmp.lt.u32.totalorder %s4263_s17, %s5301_s11 }
  0xe8   :  { %p4269_p6 = pnand %p4267_p5, %p4264_p4 }
  0xea   :  { %4272 = shalt.err (!%p4269_p6)
}
  0xeb   :  { %s4273_s15 = scalar_lea.vmem %s4822_s4, 1024  ;;  %p4278_p8 = scmp.lt.s32.totalorder %s4822_s4, %s4822_s4 }
  0xec   :  { %p4274_p7 = scmp.ne.s32.totalorder %s4822_s4, %s4273_s15  ;;  %p4279_p9 = scmp.lt.s32.totalorder %s4273_s15, %s4273_s15 }
  0xee   :  { %p4280_p10 = por %p4279_p9, %p4278_p8 }
  0xf0   :  { %p4281_p11 = pnand %p4280_p10, %p4274_p7 }
  0xf2   :  { %4284 = shalt.err (!%p4281_p11)
}
  0xf3   :  { %71 = dma.hbm_to_vmem [thread:$0]  %s5301_s11, 1024, %s4822_s4, [#allocation6], %s4532_s3, %s4532_s3, %s4533_s23  }
  0xf4   :  { %s4545_s5 = smov [#allocation10]   ;;  %s4546_s1 = smov [#allocation13]  }
  0xf5   :  { %s89_s7 = sshll.u32 %s4545_s5, 4  ;;  %s113_s13 = sshll.u32 %s4546_s1, 4  ;;  %s90_s7 = int_to_ptr.vmem [resolvable:$true] %s89_s7  ;;  %s4859_s13 = int_to_ptr.vmem [resolvable:$true] %s113_s13 }
  0xf6   :  { %s5302_s0 = sld [smem:[#allocation52_spill]] }
  0xfc   :  { %s4285_s22 = scalar_lea.hbm %s5302_s0, 1024 }
  0xfd   :  { %p4286_p12 = scmp.ne.s32.totalorder %s5302_s0, %s4285_s22  ;;  %p4289_p13 = scmp.lt.u32.totalorder %s4285_s22, %s5302_s0 }
  0xff   :  { %p4291_p0 = pnand %p4289_p13, %p4286_p12 }
 0x101   :  { %4294 = shalt.err (!%p4291_p0)
}
 0x102   :  { %s4295_s4 = scalar_lea.vmem %s90_s7, 1024  ;;  %p4300_p2 = scmp.lt.s32.totalorder %s90_s7, %s90_s7 }
 0x103   :  { %p4296_p1 = scmp.ne.s32.totalorder %s90_s7, %s4295_s4  ;;  %p4301_p3 = scmp.lt.s32.totalorder %s4295_s4, %s4295_s4 }
 0x105   :  { %p4302_p4 = por %p4301_p3, %p4300_p2 }
 0x107   :  { %p4303_p5 = pnand %p4302_p4, %p4296_p1 }
 0x109   :  { %4306 = shalt.err (!%p4303_p5)
}
 0x10a   :  { %95 = dma.hbm_to_vmem [thread:$0]  %s5302_s0, 1024, %s90_s7, [#allocation9], %s4532_s3, %s4532_s3, %s4533_s23  }
 0x10b   :  { %s4307_s15 = scalar_lea.hbm %s5265_s6, 1024 }
 0x10c   :  { %p4308_p6 = scmp.ne.s32.totalorder %s5265_s6, %s4307_s15  ;;  %p4311_p7 = scmp.lt.u32.totalorder %s4307_s15, %s5265_s6 }
 0x10e   :  { %p4313_p8 = pnand %p4311_p7, %p4308_p6 }
 0x110   :  { %4316 = shalt.err (!%p4313_p8)
}
 0x111   :  { %s4317_s28 = scalar_lea.vmem %s4859_s13, 1024  ;;  %p4322_p10 = scmp.lt.s32.totalorder %s4859_s13, %s4859_s13 }
 0x112   :  { %p4318_p9 = scmp.ne.s32.totalorder %s4859_s13, %s4317_s28  ;;  %p4323_p11 = scmp.lt.s32.totalorder %s4317_s28, %s4317_s28 }
 0x114   :  { %p4324_p12 = por %p4323_p11, %p4322_p10 }
 0x116   :  { %p4325_p13 = pnand %p4324_p12, %p4318_p9 }
 0x118   :  { %4328 = shalt.err (!%p4325_p13)
}
 0x119   :  { %119 = dma.hbm_to_vmem [thread:$0]  %s5265_s6, 1024, %s4859_s13, [#allocation12], %s4532_s3, %s4532_s3, %s4533_s23  }
 0x11a   :  { %s4547_s0 = smov [#allocation16]   ;;  %s4548_s2 = smov [#allocation19]  }
 0x11b   :  { %s137_s22 = sshll.u32 %s4547_s0, 4  ;;  %s161_s20 = sshll.u32 %s4548_s2, 4  ;;  %s138_s22 = int_to_ptr.vmem [resolvable:$true] %s137_s22  ;;  %s4896_s20 = int_to_ptr.vmem [resolvable:$true] %s161_s20 }
 0x11c   :  { %s4329_s4 = scalar_lea.hbm %s5267_s8, 1024 }
 0x11d   :  { %p4330_p0 = scmp.ne.s32.totalorder %s5267_s8, %s4329_s4  ;;  %p4333_p1 = scmp.lt.u32.totalorder %s4329_s4, %s5267_s8 }
 0x11f   :  { %p4335_p2 = pnand %p4333_p1, %p4330_p0 }
 0x121   :  { %4338 = shalt.err (!%p4335_p2)
}
 0x122   :  { %s4339_s6 = scalar_lea.vmem %s138_s22, 1024  ;;  %p4344_p4 = scmp.lt.s32.totalorder %s138_s22, %s138_s22 }
 0x123   :  { %p4340_p3 = scmp.ne.s32.totalorder %s138_s22, %s4339_s6  ;;  %p4345_p5 = scmp.lt.s32.totalorder %s4339_s6, %s4339_s6 }
 0x125   :  { %p4346_p6 = por %p4345_p5, %p4344_p4 }
 0x127   :  { %p4347_p7 = pnand %p4346_p6, %p4340_p3 }
 0x129   :  { %4350 = shalt.err (!%p4347_p7)
}
 0x12a   :  { %143 = dma.hbm_to_vmem [thread:$0]  %s5267_s8, 1024, %s138_s22, [#allocation15], %s4532_s3, %s4532_s3, %s4533_s23  }
 0x12b   :  { %s4351_s5 = scalar_lea.hbm %s5269_s10, 1024 }
 0x12c   :  { %p4352_p8 = scmp.ne.s32.totalorder %s5269_s10, %s4351_s5  ;;  %p4355_p9 = scmp.lt.u32.totalorder %s4351_s5, %s5269_s10 }
 0x12e   :  { %p4357_p10 = pnand %p4355_p9, %p4352_p8 }
 0x130   :  { %4360 = shalt.err (!%p4357_p10)
}
 0x131   :  { %s4361_s0 = scalar_lea.vmem %s4896_s20, 1024  ;;  %p4366_p12 = scmp.lt.s32.totalorder %s4896_s20, %s4896_s20 }
 0x132   :  { %p4362_p11 = scmp.ne.s32.totalorder %s4896_s20, %s4361_s0  ;;  %p4367_p13 = scmp.lt.s32.totalorder %s4361_s0, %s4361_s0 }
 0x134   :  { %p4368_p0 = por %p4367_p13, %p4366_p12 }
 0x136   :  { %p4369_p1 = pnand %p4368_p0, %p4362_p11 }
 0x138   :  { %4372 = shalt.err (!%p4369_p1)
}
 0x139   :  { %167 = dma.hbm_to_vmem [thread:$0]  %s5269_s10, 1024, %s4896_s20, [#allocation18], %s4532_s3, %s4532_s3, %s4533_s23  }
 0x13a   :  { %s4549_s2 = smov [#allocation22]   ;;  %s4550_s27 = smov [#allocation25]  }
 0x13b   :  { %s185_s17 = sshll.u32 %s4549_s2, 4  ;;  %s209_s4 = sshll.u32 %s4550_s27, 4  ;;  %s186_s17 = int_to_ptr.vmem [resolvable:$true] %s185_s17  ;;  %s4933_s4 = int_to_ptr.vmem [resolvable:$true] %s209_s4 }
 0x13c   :  { %s4373_s29 = scalar_lea.hbm %s5271_s12, 1024 }
 0x13d   :  { %p4374_p2 = scmp.ne.s32.totalorder %s5271_s12, %s4373_s29  ;;  %p4377_p3 = scmp.lt.u32.totalorder %s4373_s29, %s5271_s12 }
 0x13f   :  { %p4379_p4 = pnand %p4377_p3, %p4374_p2 }
 0x141   :  { %4382 = shalt.err (!%p4379_p4)
}
 0x142   :  { %s4383_s10 = scalar_lea.vmem %s186_s17, 1024  ;;  %p4388_p6 = scmp.lt.s32.totalorder %s186_s17, %s186_s17 }
 0x143   :  { %p4384_p5 = scmp.ne.s32.totalorder %s186_s17, %s4383_s10  ;;  %p4389_p7 = scmp.lt.s32.totalorder %s4383_s10, %s4383_s10 }
 0x145   :  { %p4390_p8 = por %p4389_p7, %p4388_p6 }
 0x147   :  { %p4391_p9 = pnand %p4390_p8, %p4384_p5 }
 0x149   :  { %4394 = shalt.err (!%p4391_p9)
}
 0x14a   :  { %191 = dma.hbm_to_vmem [thread:$0]  %s5271_s12, 1024, %s186_s17, [#allocation21], %s4532_s3, %s4532_s3, %s4533_s23  }
 0x14b   :  { %s4395_s1 = scalar_lea.hbm %s5273_s14, 1024 }
 0x14c   :  { %p4396_p10 = scmp.ne.s32.totalorder %s5273_s14, %s4395_s1  ;;  %p4399_p11 = scmp.lt.u32.totalorder %s4395_s1, %s5273_s14 }
 0x14e   :  { %p4401_p12 = pnand %p4399_p11, %p4396_p10 }
 0x150   :  { %4404 = shalt.err (!%p4401_p12)
}
 0x151   :  { %s4405_s8 = scalar_lea.vmem %s4933_s4, 1024  ;;  %p4410_p0 = scmp.lt.s32.totalorder %s4933_s4, %s4933_s4 }
 0x152   :  { %p4406_p13 = scmp.ne.s32.totalorder %s4933_s4, %s4405_s8  ;;  %p4411_p1 = scmp.lt.s32.totalorder %s4405_s8, %s4405_s8 }
 0x154   :  { %p4412_p2 = por %p4411_p1, %p4410_p0 }
 0x156   :  { %p4413_p3 = pnand %p4412_p2, %p4406_p13 }
 0x158   :  { %4416 = shalt.err (!%p4413_p3)
}
 0x159   :  { %215 = dma.hbm_to_vmem [thread:$0]  %s5273_s14, 1024, %s4933_s4, [#allocation24], %s4532_s3, %s4532_s3, %s4533_s23  }
 0x15a   :  { %s4551_s2 = smov [#allocation28]   ;;  %s4552_s27 = smov [#allocation31]  }
 0x15b   :  { %s233_s17 = sshll.u32 %s4551_s2, 4  ;;  %s257_s11 = sshll.u32 %s4552_s27, 4  ;;  %s234_s17 = int_to_ptr.vmem [resolvable:$true] %s233_s17  ;;  %s4970_s11 = int_to_ptr.vmem [resolvable:$true] %s257_s11 }
 0x15c   :  { %s4417_s9 = scalar_lea.hbm %s5275_s16, 2048 }
 0x15d   :  { %p4418_p4 = scmp.ne.s32.totalorder %s5275_s16, %s4417_s9  ;;  %p4421_p5 = scmp.lt.u32.totalorder %s4417_s9, %s5275_s16 }
 0x15f   :  { %p4423_p6 = pnand %p4421_p5, %p4418_p4 }
 0x161   :  { %4426 = shalt.err (!%p4423_p6)
}
 0x162   :  { %s4427_s14 = scalar_lea.vmem %s234_s17, 2048  ;;  %p4432_p8 = scmp.lt.s32.totalorder %s234_s17, %s234_s17 }
 0x163   :  { %p4428_p7 = scmp.ne.s32.totalorder %s234_s17, %s4427_s14  ;;  %p4433_p9 = scmp.lt.s32.totalorder %s4427_s14, %s4427_s14 }
 0x165   :  { %p4434_p10 = por %p4433_p9, %p4432_p8 }
 0x167   :  { %p4435_p11 = pnand %p4434_p10, %p4428_p7 }
 0x169   :  { %4438 = shalt.err (!%p4435_p11)
}
 0x16a   :  { %239 = dma.hbm_to_vmem [thread:$0]  %s5275_s16, 2048, %s234_s17, [#allocation27], %s4541_s24, %s4541_s24, %s4542_s26  }
 0x16b   :  { %s4439_s5 = scalar_lea.hbm %s5277_s18, 4096 }
 0x16c   :  { %p4440_p12 = scmp.ne.s32.totalorder %s5277_s18, %s4439_s5  ;;  %p4443_p13 = scmp.lt.u32.totalorder %s4439_s5, %s5277_s18 }
 0x16e   :  { %p4445_p0 = pnand %p4443_p13, %p4440_p12 }
 0x170   :  { %4448 = shalt.err (!%p4445_p0)
}
 0x171   :  { %s4449_s0 = scalar_lea.vmem %s4970_s11, 4096  ;;  %p4454_p2 = scmp.lt.s32.totalorder %s4970_s11, %s4970_s11 }
 0x172   :  { %p4450_p1 = scmp.ne.s32.totalorder %s4970_s11, %s4449_s0  ;;  %p4455_p3 = scmp.lt.s32.totalorder %s4449_s0, %s4449_s0 }
 0x174   :  { %p4456_p4 = por %p4455_p3, %p4454_p2 }
 0x176   :  { %p4457_p5 = pnand %p4456_p4, %p4450_p1 }
 0x178   :  { %4460 = shalt.err (!%p4457_p5)
}
 0x179   :  { %263 = dma.hbm_to_vmem [thread:$0]  %s5277_s18, 4096, %s4970_s11, [#allocation30], %s4541_s24, %s4541_s24, %s4542_s26  }
 0x17a   :  { %s4553_s12 = smov [#allocation34]   ;;  %s5303_s27 = sld [smem:[#allocation54_spill]] }
 0x17b   :  { %s281_s22 = sshll.u32 %s4553_s12, 4  ;;  %s282_s22 = int_to_ptr.vmem [resolvable:$true] %s281_s22 }
 0x180   :  { %s4461_s25 = scalar_lea.hbm %s5303_s27, 2048 }
 0x181   :  { %p4462_p6 = scmp.ne.s32.totalorder %s5303_s27, %s4461_s25  ;;  %p4465_p7 = scmp.lt.u32.totalorder %s4461_s25, %s5303_s27 }
 0x183   :  { %p4467_p8 = pnand %p4465_p7, %p4462_p6 }
 0x185   :  { %4470 = shalt.err (!%p4467_p8)
}
 0x186   :  { %s4471_s15 = scalar_lea.vmem %s282_s22, 2048  ;;  %p4476_p10 = scmp.lt.s32.totalorder %s282_s22, %s282_s22 }
 0x187   :  { %p4472_p9 = scmp.ne.s32.totalorder %s282_s22, %s4471_s15  ;;  %p4477_p11 = scmp.lt.s32.totalorder %s4471_s15, %s4471_s15 }
 0x189   :  { %p4478_p12 = por %p4477_p11, %p4476_p10 }
 0x18b   :  { %p4479_p13 = pnand %p4478_p12, %p4472_p9 }
 0x18d   :  { %4482 = shalt.err (!%p4479_p13)
}
 0x18e   :  { %287 = dma.hbm_to_vmem [thread:$0]  %s5303_s27, 2048, %s282_s22, [#allocation33], %s4532_s3, %s4532_s3, %s4533_s23  }
 0x18f   :  { %4505 = dma.done.wait [#allocation3], 128  }
 0x190   :  { %4506 = vsyncadd [#allocation3], 4294967168 }
 0x191   :  { %4507 = dma.done.wait [#allocation6], 1392  }
 0x192   :  { %4508 = vsyncadd [#allocation6], 4294965904 }
 0x193   :  { %4509 = dma.done.wait [#allocation9], 2048  }
 0x194   :  { %4510 = vsyncadd [#allocation9], 4294965248 }
 0x195   :  { %4511 = dma.done.wait [#allocation12], 2048  }
 0x196   :  { %4512 = vsyncadd [#allocation12], 4294965248 }
 0x197   :  { %4513 = dma.done.wait [#allocation15], 2048  }
 0x198   :  { %4514 = vsyncadd [#allocation15], 4294965248 }
 0x199   :  { %4515 = dma.done.wait [#allocation18], 2048  }
 0x19a   :  { %4516 = vsyncadd [#allocation18], 4294965248 }
 0x19b   :  { %4517 = dma.done.wait [#allocation21], 2048  }
 0x19c   :  { %4518 = vsyncadd [#allocation21], 4294965248 }
 0x19d   :  { %4519 = dma.done.wait [#allocation24], 2048  }
 0x19e   :  { %4520 = vsyncadd [#allocation24], 4294965248 }
 0x19f   :  { %4521 = dma.done.wait [#allocation27], 3072  }
 0x1a0   :  { %4522 = vsyncadd [#allocation27], 4294964224 }
 0x1a1   :  { %4523 = dma.done.wait [#allocation30], 6144  }
 0x1a2   :  { %4524 = vsyncadd [#allocation30], 4294961152 }
 0x1a3   :  { %4525 = dma.done.wait [#allocation33], 6144  }
 0x1a4   :  { %4526 = vsyncadd [#allocation33], 4294961152  ;;  %v4554_v0 = vmov 0.0   ;;  %vm4555_vm0 = vmmov 0   ;;  %v3748_v1 = vld [vmem:[#allocation7] sm:$0xff]   ;;  %v3749_v2 = vld [vmem:[#allocation7 + $0x8] sm:$0xff]  }
 0x1a5   :  { %3403 = vmatprep.subr.bf16.mxu0 %v4554_v0  ;;  %3419 = vmatprep.mubr.msk.bf16.mxu0 %vm4555_vm0, %v4554_v0  ;;  %v3750_v3 = vld [vmem:[#allocation7 + $0x10] sm:$0xff]   ;;  %v3757_v4 = vld [vmem:[#allocation8] sm:$0xff]   ;;  %v3751_v5 = vld [vmem:[#allocation7 + $0x18] sm:$0xff]   ;;  %s4557_s26 = smov [#allocation35]  }
 0x1a6   :  { %3423 = vmatprep.subr.bf16.mxu1 %v4554_v0  ;;  %3439 = vmatprep.mubr.msk.bf16.mxu1 %vm4555_vm0, %v4554_v0  ;;  %v3758_v6 = vld [vmem:[#allocation8 + $0x8] sm:$0xff]   ;;  %v3752_v7 = vld [vmem:[#allocation7 + $0x20] sm:$0xff]   ;;  %v3759_v8 = vld [vmem:[#allocation8 + $0x10] sm:$0xff]   ;;  %s2984_s11 = sshll.u32 %s4557_s26, 4  ;;  %s2985_s11 = int_to_ptr.vmem [resolvable:$true] %s2984_s11 }
 0x1a7   :  { %3404 = vmatpush3.bf16.msra.mxu0 %v3748_v1  ;;  %3424 = vmatpush3.bf16.msra.mxu1 %v3757_v4  ;;  %v3753_v9 = vld [vmem:[#allocation7 + $0x28] sm:$0xff]   ;;  %v3760_v10 = vld [vmem:[#allocation8 + $0x18] sm:$0xff]   ;;  %v3754_v11 = vld [vmem:[#allocation7 + $0x30] sm:$0xff]   ;;  %s4483_s10 = scalar_lea.vmem %s2985_s11, 128  ;;  %p4488_p1 = scmp.lt.s32.totalorder %s2985_s11, %s2985_s11 }
 0x1a8   :  { %3405 = vmatprep.subr.bf16.mxu0 %v4554_v0  ;;  %3425 = vmatprep.subr.bf16.mxu1 %v4554_v0  ;;  %v3761_v12 = vld [vmem:[#allocation8 + $0x20] sm:$0xff]   ;;  %v3755_v13 = vld [vmem:[#allocation7 + $0x38] sm:$0xff]   ;;  %v3762_v14 = vld [vmem:[#allocation8 + $0x28] sm:$0xff]   ;;  %p4484_p0 = scmp.ne.s32.totalorder %s2985_s11, %s4483_s10  ;;  %p4489_p2 = scmp.lt.s32.totalorder %s4483_s10, %s4483_s10 }
 0x1a9   :  { %v5039_v15 = vld [vmem:[#allocation2] sm:$0xff]   ;;  %v3763_v16 = vld [vmem:[#allocation8 + $0x30] sm:$0xff]   ;;  %v3764_v17 = vld [vmem:[#allocation8 + $0x38] sm:$0xff]  }
 0x1aa   :  { %v3773_v18 = vld [vmem:[#allocation11] sm:$0xff]   ;;  %v3774_v19 = vld [vmem:[#allocation11 + $0x8] sm:$0xff]   ;;  %v3775_v20 = vld [vmem:[#allocation11 + $0x10] sm:$0xff]   ;;  %p4490_p3 = por %p4489_p2, %p4488_p1 }
 0x1ab   :  { %3406 = vmatpush3.bf16.msra.mxu0 %v3749_v2  ;;  %3426 = vmatpush3.bf16.msra.mxu1 %v3758_v6  ;;  %v3776_v21 = vld [vmem:[#allocation11 + $0x18] sm:$0xff]   ;;  %v3777_v22 = vld [vmem:[#allocation11 + $0x20] sm:$0xff]   ;;  %v3778_v23 = vld [vmem:[#allocation11 + $0x28] sm:$0xff]  }
 0x1ac   :  { %3407 = vmatprep.subr.bf16.mxu0 %v4554_v0  ;;  %3427 = vmatprep.subr.bf16.mxu1 %v4554_v0  ;;  %v3006_v24 = vld [vmem:[#allocation5] ss:$0 sm:$0xff]  ;;  %v3765_v33 = vld [vmem:[#allocation10] sm:$0xff]   ;;  %v3767_v36 = vld [vmem:[#allocation10 + $0x10] sm:$0xff]   ;;  %p4491_p4 = pnand %p4490_p3, %p4484_p0 }
 0x1ad   :  { %v3766_v35 = vld [vmem:[#allocation10 + $0x8] sm:$0xff]   ;;  %v3768_v37 = vld [vmem:[#allocation10 + $0x18] sm:$0xff]   ;;  %v3769_v38 = vld [vmem:[#allocation10 + $0x20] sm:$0xff]  }
 0x1ae   :  { %v3770_v39 = vld [vmem:[#allocation10 + $0x28] sm:$0xff]   ;;  %v3771_v40 = vld [vmem:[#allocation10 + $0x30] sm:$0xff]   ;;  %v3772_v41 = vld [vmem:[#allocation10 + $0x38] sm:$0xff]  }
 0x1af   :  { %3408 = vmatpush3.bf16.msra.mxu0 %v3750_v3  ;;  %3428 = vmatpush3.bf16.msra.mxu1 %v3759_v8  ;;  %v3779_v42 = vld [vmem:[#allocation11 + $0x30] sm:$0xff]   ;;  %v3780_v43 = vld [vmem:[#allocation11 + $0x38] sm:$0xff]   ;;  %v3016_v44 = vld [vmem:[#allocation5 + $0x1] ss:$0 sm:$0xff] }
 0x1b0   :  { %3409 = vmatprep.subr.bf16.mxu0 %v4554_v0  ;;  %3429 = vmatprep.subr.bf16.mxu1 %v4554_v0  ;;  %v3025_v45 = vld [vmem:[#allocation5 + $0x2] ss:$0 sm:$0xff]  ;;  %v3781_v55 = vld [vmem:[#allocation13] sm:$0xff]   ;;  %v3783_v58 = vld [vmem:[#allocation13 + $0x10] sm:$0xff]  }
 0x1b1   :  { %v3683_v46 = vadd.f32 %v3025_v45, %v3016_v44  ;;  %v3782_v57 = vld [vmem:[#allocation13 + $0x8] sm:$0xff]   ;;  %v3784_v59 = vld [vmem:[#allocation13 + $0x18] sm:$0xff]   ;;  %v3785_v60 = vld [vmem:[#allocation13 + $0x20] sm:$0xff]  }
 0x1b2   :  { %v3786_v61 = vld [vmem:[#allocation13 + $0x28] sm:$0xff]   ;;  %v3787_v62 = vld [vmem:[#allocation13 + $0x30] sm:$0xff]   ;;  %v3788_v63 = vld [vmem:[#allocation13 + $0x38] sm:$0xff]  }
 0x1b3   :  { %3410 = vmatpush3.bf16.msra.mxu0 %v3751_v5  ;;  %3430 = vmatpush3.bf16.msra.mxu1 %v3760_v10  ;;  %v3797_v1 = vld [vmem:[#allocation16] sm:$0xff]   ;;  %v3798_v2 = vld [vmem:[#allocation16 + $0x8] sm:$0xff]   ;;  %v3799_v3 = vld [vmem:[#allocation16 + $0x10] sm:$0xff]  }
 0x1b4   :  { %3411 = vmatprep.subr.bf16.mxu0 %v4554_v0  ;;  %3431 = vmatprep.subr.bf16.mxu1 %v4554_v0  ;;  %v3800_v4 = vld [vmem:[#allocation16 + $0x18] sm:$0xff]   ;;  %v3801_v5 = vld [vmem:[#allocation16 + $0x20] sm:$0xff]   ;;  %v3802_v6 = vld [vmem:[#allocation16 + $0x28] sm:$0xff]  }
 0x1b5   :  { %v3810_v44 = vld [vmem:[#allocation17 + $0x28] sm:$0xff]   ;;  %v3811_v45 = vld [vmem:[#allocation17 + $0x30] sm:$0xff]  }
 0x1b7   :  { %3412 = vmatpush3.bf16.msra.mxu0 %v3752_v7  ;;  %3432 = vmatpush3.bf16.msra.mxu1 %v3761_v12  ;;  %v3034_v7 = vld [vmem:[#allocation5 + $0x3] ss:$0 sm:$0xff] }
 0x1b8   :  { %3413 = vmatprep.subr.bf16.mxu0 %v4554_v0  ;;  %3433 = vmatprep.subr.bf16.mxu1 %v4554_v0 }
 0x1bb   :  { %3414 = vmatpush3.bf16.msra.mxu0 %v3753_v9  ;;  %3434 = vmatpush3.bf16.msra.mxu1 %v3762_v14 }
 0x1bc   :  { %3415 = vmatprep.subr.bf16.mxu0 %v4554_v0  ;;  %3435 = vmatprep.subr.bf16.mxu1 %v4554_v0 }
 0x1bf   :  { %3416 = vmatpush3.bf16.msra.mxu0 %v3754_v11  ;;  %3436 = vmatpush3.bf16.msra.mxu1 %v3763_v16  ;;  %v3789_v16 = vld [vmem:[#allocation14] sm:$0xff]  }
 0x1c0   :  { %3417 = vmatprep.subr.bf16.mxu0 %v4554_v0  ;;  %3437 = vmatprep.subr.bf16.mxu1 %v4554_v0 }
 0x1c3   :  { %3418 = vmatpush3.bf16.msra.mxu0 %v3755_v13  ;;  %3438 = vmatpush3.bf16.msra.mxu1 %v3764_v17 }
 0x1c4   :  { %3463 = vmatprep.subr.bf16.mxu0 %v4554_v0  ;;  %3443 = vmatprep.subr.bf16.mxu1 %v4554_v0 }
 0x1c6   :  { %3420 = vmatmul.mubr.bf16.vlgmr.msra.gmra.mrb[0].mxu0 %v5039_v15 }
 0x1c7   :  { %3479 = vmatprep.mubr.msk.bf16.mxu0 %vm4555_vm0, %v4554_v0  ;;  %3464 = vmatpush3.bf16.msra.mxu0 %v3773_v18  ;;  %v3790_v18 = vld [vmem:[#allocation14 + $0x8] sm:$0xff]  }
 0x1c8   :  { %3465 = vmatprep.subr.bf16.mxu0 %v4554_v0 }
 0x1cb   :  { %3466 = vmatpush3.bf16.msra.mxu0 %v3774_v19  ;;  %v3791_v19 = vld [vmem:[#allocation14 + $0x10] sm:$0xff]  }
 0x1cc   :  { %3467 = vmatprep.subr.bf16.mxu0 %v4554_v0 }
 0x1cf   :  { %3468 = vmatpush3.bf16.msra.mxu0 %v3775_v20  ;;  %v3792_v20 = vld [vmem:[#allocation14 + $0x18] sm:$0xff]  }
 0x1d0   :  { %3469 = vmatprep.subr.bf16.mxu0 %v4554_v0 }
 0x1d3   :  { %3470 = vmatpush3.bf16.msra.mxu0 %v3776_v21  ;;  %v3793_v21 = vld [vmem:[#allocation14 + $0x20] sm:$0xff]  }
 0x1d4   :  { %3471 = vmatprep.subr.bf16.mxu0 %v4554_v0 }
 0x1d7   :  { %3472 = vmatpush3.bf16.msra.mxu0 %v3777_v22  ;;  %v3794_v22 = vld [vmem:[#allocation14 + $0x28] sm:$0xff]  }
 0x1d8   :  { %3473 = vmatprep.subr.bf16.mxu0 %v4554_v0 }
 0x1db   :  { %3474 = vmatpush3.bf16.msra.mxu0 %v3778_v23  ;;  %v3795_v23 = vld [vmem:[#allocation14 + $0x30] sm:$0xff]  }
 0x1dc   :  { %3475 = vmatprep.subr.bf16.mxu0 %v4554_v0 }
 0x1df   :  { %3476 = vmatpush3.bf16.msra.mxu0 %v3779_v42  ;;  %v3808_v42 = vld [vmem:[#allocation17 + $0x18] sm:$0xff]  }
 0x1e0   :  { %3477 = vmatprep.subr.bf16.mxu0 %v4554_v0 }
 0x1e3   :  { %3478 = vmatpush3.bf16.msra.mxu0 %v3780_v43  ;;  %v3809_v43 = vld [vmem:[#allocation17 + $0x20] sm:$0xff]  }
 0x1e4   :  { %3483 = vmatprep.subr.bf16.mxu0 %v4554_v0 }
 0x299   :  { %v465_v25 = vpop.f32.mrb[0].mxu0 }
 0x29a   :  { %v466_v26 = vadd.f32 %v3006_v24, %v465_v25  ;;  %v3421_v27 = vpop.f32.mrb[1].mxu0  ;;  %v3803_v25 = vld [vmem:[#allocation16 + $0x30] sm:$0xff]  }
 0x29b   :  { %v468_v28 = vpop.f32.mrb[2].mxu0  ;;  %v3043_v27 = vld [vmem:[#allocation5 + $0x4] ss:$0 sm:$0xff] }
 0x29c   :  { %v469_v29 = vadd.f32 %v3006_v24, %v468_v28  ;;  %v3422_v30 = vpop.f32.mrb[3].mxu0  ;;  %v472_v31 = vmax.f32 %v466_v26, 0.0  ;;  %v3796_v24 = vld [vmem:[#allocation14 + $0x38] sm:$0xff]   ;;  %v3052_v28 = vld [vmem:[#allocation5 + $0x5] ss:$0 sm:$0xff] }
 0x29d   :  { %v3804_v26 = vld [vmem:[#allocation16 + $0x38] sm:$0xff]  }
 0x29e   :  { %v473_v32 = vmax.f32 %v469_v29, 0.0  ;;  %v3687_v29 = vadd.f32 %v3052_v28, %v3043_v27  ;;  %v3842_v27 = vld [vmem:[#allocation23 + $0x28] sm:$0xff]   ;;  %v3079_v28 = vld [vmem:[#allocation5 + $0x8] ss:$0 sm:$0xff] }
 0x2a0   :  { %v474_v34 = vpack.c.bf16 %v473_v32, %v472_v31 }
 0x2a2   :  { %3440 = vmatmul.mubr.bf16.vlgmr.msra.gmra.mrb[0].mxu1 %v474_v34 }
 0x2a3   :  { %3444 = vmatpush3.bf16.msra.mxu1 %v3765_v33  ;;  %3459 = vmatprep.mubr.msk.bf16.mxu1 %vm4555_vm0, %v4554_v0 }
 0x2a4   :  { %3445 = vmatprep.subr.bf16.mxu1 %v4554_v0 }
 0x2a7   :  { %3446 = vmatpush3.bf16.msra.mxu1 %v3766_v35 }
 0x2a8   :  { %3447 = vmatprep.subr.bf16.mxu1 %v4554_v0 }
 0x2ab   :  { %3448 = vmatpush3.bf16.msra.mxu1 %v3767_v36 }
 0x2ac   :  { %3449 = vmatprep.subr.bf16.mxu1 %v4554_v0 }
 0x2af   :  { %3450 = vmatpush3.bf16.msra.mxu1 %v3768_v37 }
 0x2b0   :  { %3451 = vmatprep.subr.bf16.mxu1 %v4554_v0 }
 0x2b3   :  { %3452 = vmatpush3.bf16.msra.mxu1 %v3769_v38  ;;  %v3805_v38 = vld [vmem:[#allocation17] sm:$0xff]  }
 0x2b4   :  { %3453 = vmatprep.subr.bf16.mxu1 %v4554_v0 }
 0x2b7   :  { %3454 = vmatpush3.bf16.msra.mxu1 %v3770_v39 }
 0x2b8   :  { %3455 = vmatprep.subr.bf16.mxu1 %v4554_v0 }
 0x2bb   :  { %3456 = vmatpush3.bf16.msra.mxu1 %v3771_v40  ;;  %v3806_v40 = vld [vmem:[#allocation17 + $0x8] sm:$0xff]  }
 0x2bc   :  { %3457 = vmatprep.subr.bf16.mxu1 %v4554_v0 }
 0x2bf   :  { %3458 = vmatpush3.bf16.msra.mxu1 %v3772_v41  ;;  %v3807_v41 = vld [vmem:[#allocation17 + $0x10] sm:$0xff]  }
 0x2c0   :  { %3523 = vmatprep.subr.bf16.mxu1 %v4554_v0 }
 0x2c2   :  { %3460 = vmatmul.mubr.bf16.vlgmr.msra.gmra.mrb[0].mxu1 %v5039_v15 }
 0x2c3   :  { %3539 = vmatprep.mubr.msk.bf16.mxu1 %vm4555_vm0, %v4554_v0  ;;  %3524 = vmatpush3.bf16.msra.mxu1 %v3797_v1  ;;  %v3820_v1 = vld [vmem:[#allocation19 + $0x38] sm:$0xff]  }
 0x2c4   :  { %3525 = vmatprep.subr.bf16.mxu1 %v4554_v0 }
 0x2c7   :  { %3526 = vmatpush3.bf16.msra.mxu1 %v3798_v2  ;;  %v3821_v2 = vld [vmem:[#allocation20] sm:$0xff]  }
 0x2c8   :  { %3527 = vmatprep.subr.bf16.mxu1 %v4554_v0 }
 0x2cb   :  { %3528 = vmatpush3.bf16.msra.mxu1 %v3799_v3  ;;  %v3822_v3 = vld [vmem:[#allocation20 + $0x8] sm:$0xff]  }
 0x2cc   :  { %3529 = vmatprep.subr.bf16.mxu1 %v4554_v0 }
 0x2cf   :  { %3530 = vmatpush3.bf16.msra.mxu1 %v3800_v4  ;;  %v3823_v4 = vld [vmem:[#allocation20 + $0x10] sm:$0xff]  }
 0x2d0   :  { %3531 = vmatprep.subr.bf16.mxu1 %v4554_v0 }
 0x2d3   :  { %3532 = vmatpush3.bf16.msra.mxu1 %v3801_v5  ;;  %v3824_v5 = vld [vmem:[#allocation20 + $0x18] sm:$0xff]  }
 0x2d4   :  { %3533 = vmatprep.subr.bf16.mxu1 %v4554_v0 }
 0x2d7   :  { %3534 = vmatpush3.bf16.msra.mxu1 %v3802_v6  ;;  %v3825_v6 = vld [vmem:[#allocation20 + $0x20] sm:$0xff]  }
 0x2d8   :  { %3535 = vmatprep.subr.bf16.mxu1 %v4554_v0 }
 0x2db   :  { %3536 = vmatpush3.bf16.msra.mxu1 %v3803_v25  ;;  %v3840_v25 = vld [vmem:[#allocation23 + $0x18] sm:$0xff]  }
 0x2dc   :  { %3537 = vmatprep.subr.bf16.mxu1 %v4554_v0 }
 0x2df   :  { %3538 = vmatpush3.bf16.msra.mxu1 %v3804_v26  ;;  %v3841_v26 = vld [vmem:[#allocation23 + $0x20] sm:$0xff]  }
 0x2e0   :  { %3543 = vmatprep.subr.bf16.mxu1 %v4554_v0 }
 0x395   :  { %v692_v47 = vpop.f32.mrb[0].mxu1 }
 0x396   :  { %v3684_v48 = vadd.f32 %v3683_v46, %v692_v47  ;;  %v3461_v49 = vpop.f32.mrb[1].mxu1  ;;  %v3813_v47 = vld [vmem:[#allocation19] sm:$0xff]  }
 0x397   :  { %v695_v50 = vpop.f32.mrb[2].mxu1  ;;  %v3815_v49 = vld [vmem:[#allocation19 + $0x10] sm:$0xff]  }
 0x398   :  { %v3686_v51 = vadd.f32 %v3683_v46, %v695_v50  ;;  %v3462_v52 = vpop.f32.mrb[3].mxu1  ;;  %v701_v53 = vmax.f32 %v3684_v48, 0.0  ;;  %v3812_v46 = vld [vmem:[#allocation17 + $0x38] sm:$0xff]   ;;  %v3814_v48 = vld [vmem:[#allocation19 + $0x8] sm:$0xff]  }
 0x399   :  { %v3816_v50 = vld [vmem:[#allocation19 + $0x18] sm:$0xff]   ;;  %v3061_v52 = vld [vmem:[#allocation5 + $0x6] ss:$0 sm:$0xff] }
 0x39a   :  { %v702_v54 = vmax.f32 %v3686_v51, 0.0  ;;  %v3817_v51 = vld [vmem:[#allocation19 + $0x20] sm:$0xff]  }
 0x39c   :  { %v5070_v56 = vpack.c.bf16 %v702_v54, %v701_v53 }
 0x39e   :  { %3480 = vmatmul.mubr.bf16.vlgmr.msra.gmra.mrb[4].mxu0 %v5070_v56 }
 0x39f   :  { %3484 = vmatpush3.bf16.msra.mxu0 %v3781_v55  ;;  %3499 = vmatprep.mubr.msk.bf16.mxu0 %vm4555_vm0, %v4554_v0 }
 0x3a0   :  { %3485 = vmatprep.subr.bf16.mxu0 %v4554_v0 }
 0x3a3   :  { %3486 = vmatpush3.bf16.msra.mxu0 %v3782_v57 }
 0x3a4   :  { %3487 = vmatprep.subr.bf16.mxu0 %v4554_v0 }
 0x3a7   :  { %3488 = vmatpush3.bf16.msra.mxu0 %v3783_v58 }
 0x3a8   :  { %3489 = vmatprep.subr.bf16.mxu0 %v4554_v0 }
 0x3ab   :  { %3490 = vmatpush3.bf16.msra.mxu0 %v3784_v59 }
 0x3ac   :  { %3491 = vmatprep.subr.bf16.mxu0 %v4554_v0 }
 0x3af   :  { %3492 = vmatpush3.bf16.msra.mxu0 %v3785_v60 }
 0x3b0   :  { %3493 = vmatprep.subr.bf16.mxu0 %v4554_v0 }
 0x3b3   :  { %3494 = vmatpush3.bf16.msra.mxu0 %v3786_v61 }
 0x3b4   :  { %3495 = vmatprep.subr.bf16.mxu0 %v4554_v0 }
 0x3b7   :  { %3496 = vmatpush3.bf16.msra.mxu0 %v3787_v62  ;;  %v3818_v62 = vld [vmem:[#allocation19 + $0x28] sm:$0xff]  }
 0x3b8   :  { %3497 = vmatprep.subr.bf16.mxu0 %v4554_v0 }
 0x3bb   :  { %3498 = vmatpush3.bf16.msra.mxu0 %v3788_v63  ;;  %v3819_v63 = vld [vmem:[#allocation19 + $0x30] sm:$0xff]  }
 0x3bc   :  { %3503 = vmatprep.subr.bf16.mxu0 %v4554_v0 }
 0x471   :  { %v809_v8 = vpop.f32.mrb[4].mxu0 }
 0x472   :  { %v810_v9 = vadd.f32 %v3034_v7, %v809_v8  ;;  %v3481_v10 = vpop.f32.mrb[5].mxu0  ;;  %v3070_v8 = vld [vmem:[#allocation5 + $0x7] ss:$0 sm:$0xff] }
 0x473   :  { %v812_v11 = vpop.f32.mrb[6].mxu0 }
 0x474   :  { %v813_v12 = vadd.f32 %v3034_v7, %v812_v11  ;;  %v3482_v13 = vpop.f32.mrb[7].mxu0  ;;  %v816_v14 = vmax.f32 %v810_v9, 0.0  ;;  %v3826_v7 = vld [vmem:[#allocation20 + $0x28] sm:$0xff]  }
 0x476   :  { %v817_v15 = vmax.f32 %v813_v12, 0.0 }
 0x478   :  { %v818_v17 = vpack.c.bf16 %v817_v15, %v816_v14 }
 0x47a   :  { %3500 = vmatmul.mubr.bf16.vlgmr.msra.gmra.mrb[8].mxu0 %v818_v17 }
 0x47b   :  { %3504 = vmatpush3.bf16.msra.mxu0 %v3789_v16  ;;  %3519 = vmatprep.mubr.msk.bf16.mxu0 %vm4555_vm0, %v4554_v0 }
 0x47c   :  { %3505 = vmatprep.subr.bf16.mxu0 %v4554_v0 }
 0x47f   :  { %3506 = vmatpush3.bf16.msra.mxu0 %v3790_v18 }
 0x480   :  { %3507 = vmatprep.subr.bf16.mxu0 %v4554_v0 }
 0x483   :  { %3508 = vmatpush3.bf16.msra.mxu0 %v3791_v19 }
 0x484   :  { %3509 = vmatprep.subr.bf16.mxu0 %v4554_v0 }
 0x487   :  { %3510 = vmatpush3.bf16.msra.mxu0 %v3792_v20  ;;  %v3827_v20 = vld [vmem:[#allocation20 + $0x30] sm:$0xff]  }
 0x488   :  { %3511 = vmatprep.subr.bf16.mxu0 %v4554_v0 }
 0x48b   :  { %3512 = vmatpush3.bf16.msra.mxu0 %v3793_v21  ;;  %v3828_v21 = vld [vmem:[#allocation20 + $0x38] sm:$0xff]  }
 0x48c   :  { %3513 = vmatprep.subr.bf16.mxu0 %v4554_v0 }
 0x48f   :  { %3514 = vmatpush3.bf16.msra.mxu0 %v3794_v22  ;;  %v3837_v22 = vld [vmem:[#allocation23] sm:$0xff]  }
 0x490   :  { %3515 = vmatprep.subr.bf16.mxu0 %v4554_v0 }
 0x493   :  { %3516 = vmatpush3.bf16.msra.mxu0 %v3795_v23  ;;  %v3838_v23 = vld [vmem:[#allocation23 + $0x8] sm:$0xff]  }
 0x494   :  { %3517 = vmatprep.subr.bf16.mxu0 %v4554_v0 }
 0x497   :  { %3518 = vmatpush3.bf16.msra.mxu0 %v3796_v24  ;;  %v3839_v24 = vld [vmem:[#allocation23 + $0x10] sm:$0xff]  }
 0x498   :  { %3563 = vmatprep.subr.bf16.mxu0 %v4554_v0 }
 0x49a   :  { %3520 = vmatmul.mubr.bf16.vlgmr.msra.gmra.mrb[8].mxu0 %v5070_v56 }
 0x49b   :  { %3579 = vmatprep.mubr.msk.bf16.mxu0 %vm4555_vm0, %v4554_v0  ;;  %3564 = vmatpush3.bf16.msra.mxu0 %v3813_v47  ;;  %v3844_v47 = vld [vmem:[#allocation23 + $0x38] sm:$0xff]  }
 0x49c   :  { %3565 = vmatprep.subr.bf16.mxu0 %v4554_v0 }
 0x49f   :  { %3566 = vmatpush3.bf16.msra.mxu0 %v3814_v48  ;;  %v3088_v48 = vld [vmem:[#allocation5 + $0x9] ss:$0 sm:$0xff] }
 0x4a0   :  { %3567 = vmatprep.subr.bf16.mxu0 %v4554_v0 }
 0x4a3   :  { %3568 = vmatpush3.bf16.msra.mxu0 %v3815_v49  ;;  %v3097_v49 = vld [vmem:[#allocation5 + $0xa] ss:$0 sm:$0xff] }
 0x4a4   :  { %3569 = vmatprep.subr.bf16.mxu0 %v4554_v0 }
 0x4a7   :  { %3570 = vmatpush3.bf16.msra.mxu0 %v3816_v50  ;;  %v3691_v50 = vadd.f32 %v3097_v49, %v3088_v48  ;;  %v3884_v48 = vld [vmem:[#allocation28 + $0x74] ss:$8 sps:$4 sm:$0xff]   ;;  %v3882_v49 = vld [vmem:[#allocation28 + $0x70] ss:$8 sps:$4 sm:$0xff]  }
 0x4a8   :  { %3571 = vmatprep.subr.bf16.mxu0 %v4554_v0 }
 0x4ab   :  { %3572 = vmatpush3.bf16.msra.mxu0 %v3817_v51 }
 0x4ac   :  { %3573 = vmatprep.subr.bf16.mxu0 %v4554_v0 }
 0x4af   :  { %3574 = vmatpush3.bf16.msra.mxu0 %v3818_v62  ;;  %v3847_v62 = vld [vmem:[#allocation25 + $0x10] sm:$0xff]  }
 0x4b0   :  { %3575 = vmatprep.subr.bf16.mxu0 %v4554_v0 }
 0x4b3   :  { %3576 = vmatpush3.bf16.msra.mxu0 %v3819_v63  ;;  %v3848_v63 = vld [vmem:[#allocation25 + $0x18] sm:$0xff]  }
 0x4b4   :  { %3577 = vmatprep.subr.bf16.mxu0 %v4554_v0 }
 0x4b7   :  { %3578 = vmatpush3.bf16.msra.mxu0 %v3820_v1  ;;  %v3849_v1 = vld [vmem:[#allocation25 + $0x20] sm:$0xff]  }
 0x4b8   :  { %3623 = vmatprep.subr.bf16.mxu0 %v4554_v0 }
 0x56d   :  { %v1036_v30 = vpop.f32.mrb[8].mxu0 }
 0x56e   :  { %v5104_v31 = vadd.f32 %v3687_v29, %v1036_v30  ;;  %v3521_v32 = vpop.f32.mrb[9].mxu0 }
 0x56f   :  { %v1039_v33 = vpop.f32.mrb[10].mxu0 }
 0x570   :  { %v5106_v34 = vadd.f32 %v3687_v29, %v1039_v33  ;;  %v3522_v35 = vpop.f32.mrb[11].mxu0  ;;  %v1045_v36 = vmax.f32 %v5104_v31, 0.0 }
 0x572   :  { %v1046_v37 = vmax.f32 %v5106_v34, 0.0 }
 0x574   :  { %v1047_v39 = vpack.c.bf16 %v1046_v37, %v1045_v36 }
 0x576   :  { %3540 = vmatmul.mubr.bf16.vlgmr.msra.gmra.mrb[4].mxu1 %v1047_v39  ;;  %v3830_v39 = vld [vmem:[#allocation22 + $0x8] sm:$0xff]  }
 0x577   :  { %3544 = vmatpush3.bf16.msra.mxu1 %v3805_v38  ;;  %3559 = vmatprep.mubr.msk.bf16.mxu1 %vm4555_vm0, %v4554_v0 }
 0x578   :  { %3545 = vmatprep.subr.bf16.mxu1 %v4554_v0 }
 0x57b   :  { %3546 = vmatpush3.bf16.msra.mxu1 %v3806_v40  ;;  %v3831_v40 = vld [vmem:[#allocation22 + $0x10] sm:$0xff]  }
 0x57c   :  { %3547 = vmatprep.subr.bf16.mxu1 %v4554_v0 }
 0x57f   :  { %3548 = vmatpush3.bf16.msra.mxu1 %v3807_v41  ;;  %v3832_v41 = vld [vmem:[#allocation22 + $0x18] sm:$0xff]  }
 0x580   :  { %3549 = vmatprep.subr.bf16.mxu1 %v4554_v0 }
 0x583   :  { %3550 = vmatpush3.bf16.msra.mxu1 %v3808_v42  ;;  %v3833_v42 = vld [vmem:[#allocation22 + $0x20] sm:$0xff]  }
 0x584   :  { %3551 = vmatprep.subr.bf16.mxu1 %v4554_v0 }
 0x587   :  { %3552 = vmatpush3.bf16.msra.mxu1 %v3809_v43  ;;  %v3834_v43 = vld [vmem:[#allocation22 + $0x28] sm:$0xff]  }
 0x588   :  { %3553 = vmatprep.subr.bf16.mxu1 %v4554_v0 }
 0x58b   :  { %3554 = vmatpush3.bf16.msra.mxu1 %v3810_v44  ;;  %v3835_v44 = vld [vmem:[#allocation22 + $0x30] sm:$0xff]  }
 0x58c   :  { %3555 = vmatprep.subr.bf16.mxu1 %v4554_v0 }
 0x58f   :  { %3556 = vmatpush3.bf16.msra.mxu1 %v3811_v45  ;;  %v3836_v45 = vld [vmem:[#allocation22 + $0x38] sm:$0xff]  }
 0x590   :  { %3557 = vmatprep.subr.bf16.mxu1 %v4554_v0 }
 0x593   :  { %3558 = vmatpush3.bf16.msra.mxu1 %v3812_v46  ;;  %v3843_v46 = vld [vmem:[#allocation23 + $0x30] sm:$0xff]  }
 0x594   :  { %3583 = vmatprep.subr.bf16.mxu1 %v4554_v0 }
 0x649   :  { %v1153_v53 = vpop.f32.mrb[4].mxu1 }
 0x64a   :  { %v1154_v54 = vadd.f32 %v3061_v52, %v1153_v53  ;;  %v3541_v55 = vpop.f32.mrb[5].mxu1 }
 0x64b   :  { %v1156_v56 = vpop.f32.mrb[6].mxu1 }
 0x64c   :  { %v1157_v57 = vadd.f32 %v3061_v52, %v1156_v56  ;;  %v3542_v58 = vpop.f32.mrb[7].mxu1  ;;  %v1160_v59 = vmax.f32 %v1154_v54, 0.0 }
 0x64e   :  { %v1161_v60 = vmax.f32 %v1157_v57, 0.0 }
 0x650   :  { %v1162_v61 = vpack.c.bf16 %v1161_v60, %v1160_v59  ;;  %v3845_v59 = vld [vmem:[#allocation25] sm:$0xff]  }
 0x652   :  { %3560 = vmatmul.mubr.bf16.vlgmr.msra.gmra.mrb[8].mxu1 %v1162_v61  ;;  %v3846_v61 = vld [vmem:[#allocation25 + $0x8] sm:$0xff]  }
 0x653   :  { %3599 = vmatprep.mubr.msk.bf16.mxu1 %vm4555_vm0, %v4554_v0  ;;  %3584 = vmatpush3.bf16.msra.mxu1 %v3821_v2  ;;  %v3850_v2 = vld [vmem:[#allocation25 + $0x28] sm:$0xff]  }
 0x654   :  { %3585 = vmatprep.subr.bf16.mxu1 %v4554_v0 }
 0x657   :  { %3586 = vmatpush3.bf16.msra.mxu1 %v3822_v3  ;;  %v3851_v3 = vld [vmem:[#allocation25 + $0x30] sm:$0xff]  }
 0x658   :  { %3587 = vmatprep.subr.bf16.mxu1 %v4554_v0 }
 0x65b   :  { %3588 = vmatpush3.bf16.msra.mxu1 %v3823_v4  ;;  %v3852_v4 = vld [vmem:[#allocation25 + $0x38] sm:$0xff]  }
 0x65c   :  { %3589 = vmatprep.subr.bf16.mxu1 %v4554_v0 }
 0x65f   :  { %3590 = vmatpush3.bf16.msra.mxu1 %v3824_v5  ;;  %v3853_v5 = vld [vmem:[#allocation26] sm:$0xff]  }
 0x660   :  { %3591 = vmatprep.subr.bf16.mxu1 %v4554_v0 }
 0x663   :  { %3592 = vmatpush3.bf16.msra.mxu1 %v3825_v6  ;;  %v3854_v6 = vld [vmem:[#allocation26 + $0x8] sm:$0xff]  }
 0x664   :  { %3593 = vmatprep.subr.bf16.mxu1 %v4554_v0 }
 0x667   :  { %3594 = vmatpush3.bf16.msra.mxu1 %v3826_v7  ;;  %v3855_v7 = vld [vmem:[#allocation26 + $0x10] sm:$0xff]  }
 0x668   :  { %3595 = vmatprep.subr.bf16.mxu1 %v4554_v0 }
 0x66b   :  { %3596 = vmatpush3.bf16.msra.mxu1 %v3827_v20  ;;  %v3858_v20 = vld [vmem:[#allocation26 + $0x28] sm:$0xff]  }
 0x66c   :  { %3597 = vmatprep.subr.bf16.mxu1 %v4554_v0 }
 0x66f   :  { %3598 = vmatpush3.bf16.msra.mxu1 %v3828_v21  ;;  %v3859_v21 = vld [vmem:[#allocation26 + $0x30] sm:$0xff]  }
 0x670   :  { %3603 = vmatprep.subr.bf16.mxu1 %v4554_v0 }
 0x725   :  { %v1268_v9 = vpop.f32.mrb[8].mxu1 }
 0x726   :  { %v1269_v10 = vadd.f32 %v3070_v8, %v1268_v9  ;;  %v3561_v11 = vpop.f32.mrb[9].mxu1  ;;  %v3857_v9 = vld [vmem:[#allocation26 + $0x20] sm:$0xff]  }
 0x727   :  { %v1271_v12 = vpop.f32.mrb[10].mxu1 }
 0x728   :  { %v1275_v13 = vadd.f32 %v1269_v10, %v1045_v36  ;;  %v1272_v14 = vadd.f32 %v3070_v8, %v1271_v12  ;;  %v3562_v15 = vpop.f32.mrb[11].mxu1  ;;  %v3856_v8 = vld [vmem:[#allocation26 + $0x18] sm:$0xff]   ;;  %v3106_v10 = vld [vmem:[#allocation5 + $0xb] ss:$0 sm:$0xff] }
 0x72a   :  { %v1276_v16 = vadd.f32 %v1272_v14, %v1046_v37  ;;  %v1277_v17 = vmax.f32 %v1275_v13, 0.0  ;;  %v3829_v37 = vld [vmem:[#allocation22] sm:$0xff]  }
 0x72c   :  { %v1278_v18 = vmax.f32 %v1276_v16, 0.0 }
 0x72e   :  { %v1279_v19 = vpack.c.bf16 %v1278_v18, %v1277_v17 }
 0x730   :  { %3580 = vmatmul.mubr.bf16.vlgmr.msra.gmra.mrb[12].mxu0 %v1279_v19 }
 0x731   :  { %3639 = vmatprep.mubr.msk.bf16.mxu0 %vm4555_vm0, %v4554_v0  ;;  %3624 = vmatpush3.bf16.msra.mxu0 %v3837_v22  ;;  %v3860_v22 = vld [vmem:[#allocation26 + $0x38] sm:$0xff]  }
 0x732   :  { %3625 = vmatprep.subr.bf16.mxu0 %v4554_v0 }
 0x735   :  { %3626 = vmatpush3.bf16.msra.mxu0 %v3838_v23  ;;  %v3861_v23 = vld [vmem:[#allocation28] ss:$8 sps:$4 sm:$0xff]  }
 0x736   :  { %3627 = vmatprep.subr.bf16.mxu0 %v4554_v0 }
 0x739   :  { %3628 = vmatpush3.bf16.msra.mxu0 %v3839_v24  ;;  %v3863_v24 = vld [vmem:[#allocation28 + $0x4] ss:$8 sps:$4 sm:$0xff]  }
 0x73a   :  { %3629 = vmatprep.subr.bf16.mxu0 %v4554_v0 }
 0x73d   :  { %3630 = vmatpush3.bf16.msra.mxu0 %v3840_v25  ;;  %v3866_v25 = vld [vmem:[#allocation28 + $0x14] ss:$8 sps:$4 sm:$0xff]  }
 0x73e   :  { %3631 = vmatprep.subr.bf16.mxu0 %v4554_v0 }
 0x741   :  { %3632 = vmatpush3.bf16.msra.mxu0 %v3841_v26  ;;  %v3864_v26 = vld [vmem:[#allocation28 + $0x10] ss:$8 sps:$4 sm:$0xff]  }
 0x742   :  { %3633 = vmatprep.subr.bf16.mxu0 %v4554_v0 }
 0x745   :  { %3634 = vmatpush3.bf16.msra.mxu0 %v3842_v27  ;;  %v3869_v27 = vld [vmem:[#allocation28 + $0x24] ss:$8 sps:$4 sm:$0xff]  }
 0x746   :  { %3635 = vmatprep.subr.bf16.mxu0 %v4554_v0 }
 0x749   :  { %3636 = vmatpush3.bf16.msra.mxu0 %v3843_v46  ;;  %v3881_v46 = vld [vmem:[#allocation28 + $0x64] ss:$8 sps:$4 sm:$0xff]  }
 0x74a   :  { %3637 = vmatprep.subr.bf16.mxu0 %v4554_v0 }
 0x74d   :  { %3638 = vmatpush3.bf16.msra.mxu0 %v3844_v47  ;;  %v3879_v47 = vld [vmem:[#allocation28 + $0x60] ss:$8 sps:$4 sm:$0xff]  }
 0x74e   :  { %3643 = vmatprep.subr.bf16.mxu0 %v4554_v0 }
 0x803   :  { %v1385_v29 = vpop.f32.mrb[12].mxu0 }
 0x804   :  { %v1386_v30 = vadd.f32 %v3079_v28, %v1385_v29  ;;  %v3581_v31 = vpop.f32.mrb[13].mxu0  ;;  %v3872_v29 = vld [vmem:[#allocation28 + $0x34] ss:$8 sps:$4 sm:$0xff]  }
 0x805   :  { %v1388_v32 = vpop.f32.mrb[14].mxu0  ;;  %v3875_v31 = vld [vmem:[#allocation28 + $0x44] ss:$8 sps:$4 sm:$0xff]  }
 0x806   :  { %v1389_v33 = vadd.f32 %v3079_v28, %v1388_v32  ;;  %v3582_v34 = vpop.f32.mrb[15].mxu0  ;;  %v1392_v35 = vmax.f32 %v1386_v30, 0.0  ;;  %v3867_v28 = vld [vmem:[#allocation28 + $0x20] ss:$8 sps:$4 sm:$0xff]   ;;  %v3870_v30 = vld [vmem:[#allocation28 + $0x30] ss:$8 sps:$4 sm:$0xff]  }
 0x807   :  { %v3878_v32 = vld [vmem:[#allocation28 + $0x54] ss:$8 sps:$4 sm:$0xff]  }
 0x808   :  { %v1393_v36 = vmax.f32 %v1389_v33, 0.0  ;;  %v3876_v33 = vld [vmem:[#allocation28 + $0x50] ss:$8 sps:$4 sm:$0xff]   ;;  %v3115_v34 = vld [vmem:[#allocation5 + $0xc] ss:$0 sm:$0xff] }
 0x80a   :  { %v1394_v38 = vpack.c.bf16 %v1393_v36, %v1392_v35 }
 0x80c   :  { %3600 = vmatmul.mubr.bf16.vlgmr.msra.gmra.mrb[12].mxu1 %v1394_v38 }
 0x80d   :  { %3604 = vmatpush3.bf16.msra.mxu1 %v3829_v37  ;;  %3619 = vmatprep.mubr.msk.bf16.mxu1 %vm4555_vm0, %v4554_v0 }
 0x80e   :  { %3605 = vmatprep.subr.bf16.mxu1 %v4554_v0 }
 0x811   :  { %3606 = vmatpush3.bf16.msra.mxu1 %v3830_v39 }
 0x812   :  { %3607 = vmatprep.subr.bf16.mxu1 %v4554_v0 }
 0x815   :  { %3608 = vmatpush3.bf16.msra.mxu1 %v3831_v40 }
 0x816   :  { %3609 = vmatprep.subr.bf16.mxu1 %v4554_v0 }
 0x819   :  { %3610 = vmatpush3.bf16.msra.mxu1 %v3832_v41 }
 0x81a   :  { %3611 = vmatprep.subr.bf16.mxu1 %v4554_v0 }
 0x81d   :  { %3612 = vmatpush3.bf16.msra.mxu1 %v3833_v42 }
 0x81e   :  { %3613 = vmatprep.subr.bf16.mxu1 %v4554_v0 }
 0x821   :  { %3614 = vmatpush3.bf16.msra.mxu1 %v3834_v43 }
 0x822   :  { %3615 = vmatprep.subr.bf16.mxu1 %v4554_v0 }
 0x825   :  { %3616 = vmatpush3.bf16.msra.mxu1 %v3835_v44 }
 0x826   :  { %3617 = vmatprep.subr.bf16.mxu1 %v4554_v0 }
 0x829   :  { %3618 = vmatpush3.bf16.msra.mxu1 %v3836_v45 }
 0x82a   :  { %3663 = vmatprep.subr.bf16.mxu1 %v4554_v0 }
 0x82c   :  { %3620 = vmatmul.mubr.bf16.vlgmr.msra.gmra.mrb[12].mxu1 %v1279_v19 }
 0x82d   :  { %3679 = vmatprep.mubr.msk.bf16.mxu1 %vm4555_vm0, %v4554_v0  ;;  %3664 = vmatpush3.bf16.msra.mxu1 %v3853_v5  ;;  %v3935_v5 = vld [vmem:[#allocation31 + $0x84] ss:$8 sps:$4 sm:$0xff]  }
 0x82e   :  { %3665 = vmatprep.subr.bf16.mxu1 %v4554_v0 }
 0x831   :  { %3666 = vmatpush3.bf16.msra.mxu1 %v3854_v6  ;;  %v3933_v6 = vld [vmem:[#allocation31 + $0x80] ss:$8 sps:$4 sm:$0xff]  }
 0x832   :  { %3667 = vmatprep.subr.bf16.mxu1 %v4554_v0 }
 0x835   :  { %3668 = vmatpush3.bf16.msra.mxu1 %v3855_v7  ;;  %v3938_v7 = vld [vmem:[#allocation31 + $0x94] ss:$8 sps:$4 sm:$0xff]  }
 0x836   :  { %3669 = vmatprep.subr.bf16.mxu1 %v4554_v0 }
 0x839   :  { %3670 = vmatpush3.bf16.msra.mxu1 %v3856_v8  ;;  %v3936_v8 = vld [vmem:[#allocation31 + $0x90] ss:$8 sps:$4 sm:$0xff]  }
 0x83a   :  { %3671 = vmatprep.subr.bf16.mxu1 %v4554_v0 }
 0x83d   :  { %3672 = vmatpush3.bf16.msra.mxu1 %v3857_v9  ;;  %v3941_v9 = vld [vmem:[#allocation31 + $0xa4] ss:$8 sps:$4 sm:$0xff]  }
 0x83e   :  { %3673 = vmatprep.subr.bf16.mxu1 %v4554_v0 }
 0x841   :  { %3674 = vmatpush3.bf16.msra.mxu1 %v3858_v20 }
 0x842   :  { %3675 = vmatprep.subr.bf16.mxu1 %v4554_v0 }
 0x845   :  { %3676 = vmatpush3.bf16.msra.mxu1 %v3859_v21 }
 0x846   :  { %3677 = vmatprep.subr.bf16.mxu1 %v4554_v0 }
 0x849   :  { %3678 = vmatpush3.bf16.msra.mxu1 %v3860_v22 }
 0x8ff   :  { %v1612_v51 = vpop.f32.mrb[12].mxu1 }
 0x900   :  { %v5168_v52 = vadd.f32 %v3691_v50, %v1612_v51  ;;  %v3621_v53 = vpop.f32.mrb[13].mxu1  ;;  %v4556_v51 = vmov 0  }
 0x901   :  { %v1615_v54 = vpop.f32.mrb[14].mxu1  ;;  %v3911_v53 = vld [vmem:[#allocation31 + $0x4] ss:$8 sps:$4 sm:$0xff]  }
 0x902   :  { %v5170_v55 = vadd.f32 %v3691_v50, %v1615_v54  ;;  %v3622_v56 = vpop.f32.mrb[15].mxu1  ;;  %v1621_v57 = vmax.f32 %v5168_v52, 0.0  ;;  %v3887_v50 = vld [vmem:[#allocation29 + $0x4] ss:$8 sps:$4 sm:$0xff]   ;;  %v3909_v52 = vld [vmem:[#allocation31] ss:$8 sps:$4 sm:$0xff]   ;;  %2487 = vmatprep.subr.bf16.mxu1 %v3911_v53 }
 0x903   :  { %v3914_v54 = vld [vmem:[#allocation31 + $0x14] ss:$8 sps:$4 sm:$0xff]   ;;  %v3917_v56 = vld [vmem:[#allocation31 + $0x24] ss:$8 sps:$4 sm:$0xff]  }
 0x904   :  { %v1622_v58 = vmax.f32 %v5170_v55, 0.0  ;;  %v3912_v55 = vld [vmem:[#allocation31 + $0x10] ss:$8 sps:$4 sm:$0xff]   ;;  %v3971_v53 = vld [vmem:[#allocation32 + $0x44] ss:$8 sps:$4 sm:$0xff]  }
 0x906   :  { %v1623_v60 = vpack.c.bf16 %v1622_v58, %v1621_v57 }
 0x908   :  { %3640 = vmatmul.mubr.bf16.vlgmr.msra.gmra.mrb[16].mxu0 %v1623_v60  ;;  %v3923_v60 = vld [vmem:[#allocation31 + $0x44] ss:$8 sps:$4 sm:$0xff]  }
 0x909   :  { %3644 = vmatpush3.bf16.msra.mxu0 %v3845_v59  ;;  %3659 = vmatprep.mubr.msk.bf16.mxu0 %vm4555_vm0, %v4554_v0  ;;  %v3918_v59 = vld [vmem:[#allocation31 + $0x30] ss:$8 sps:$4 sm:$0xff]  }
 0x90a   :  { %3645 = vmatprep.subr.bf16.mxu0 %v4554_v0 }
 0x90d   :  { %3646 = vmatpush3.bf16.msra.mxu0 %v3846_v61  ;;  %v3921_v61 = vld [vmem:[#allocation31 + $0x40] ss:$8 sps:$4 sm:$0xff]  }
 0x90e   :  { %3647 = vmatprep.subr.bf16.mxu0 %v4554_v0 }
 0x911   :  { %3648 = vmatpush3.bf16.msra.mxu0 %v3847_v62  ;;  %v3926_v62 = vld [vmem:[#allocation31 + $0x54] ss:$8 sps:$4 sm:$0xff]  }
 0x912   :  { %3649 = vmatprep.subr.bf16.mxu0 %v4554_v0 }
 0x915   :  { %3650 = vmatpush3.bf16.msra.mxu0 %v3848_v63  ;;  %v3924_v63 = vld [vmem:[#allocation31 + $0x50] ss:$8 sps:$4 sm:$0xff]  }
 0x916   :  { %3651 = vmatprep.subr.bf16.mxu0 %v4554_v0 }
 0x919   :  { %3652 = vmatpush3.bf16.msra.mxu0 %v3849_v1  ;;  %v3929_v1 = vld [vmem:[#allocation31 + $0x64] ss:$8 sps:$4 sm:$0xff]  }
 0x91a   :  { %3653 = vmatprep.subr.bf16.mxu0 %v4554_v0 }
 0x91d   :  { %3654 = vmatpush3.bf16.msra.mxu0 %v3850_v2  ;;  %v3927_v2 = vld [vmem:[#allocation31 + $0x60] ss:$8 sps:$4 sm:$0xff]  }
 0x91e   :  { %3655 = vmatprep.subr.bf16.mxu0 %v4554_v0 }
 0x921   :  { %3656 = vmatpush3.bf16.msra.mxu0 %v3851_v3  ;;  %v3932_v3 = vld [vmem:[#allocation31 + $0x74] ss:$8 sps:$4 sm:$0xff]  }
 0x922   :  { %3657 = vmatprep.subr.bf16.mxu0 %v4554_v0  ;;  %v3873_v0 = vld [vmem:[#allocation28 + $0x40] ss:$8 sps:$4 sm:$0xff]  }
 0x925   :  { %3658 = vmatpush3.bf16.msra.mxu0 %v3852_v4  ;;  %v3930_v4 = vld [vmem:[#allocation31 + $0x70] ss:$8 sps:$4 sm:$0xff]  }
 0x926   :  { %2079 = vmatprep.subr.bf16.mxu0 %v3863_v24 }
 0x9db   :  { %v1729_v11 = vpop.f32.mrb[16].mxu0 }
 0x9dc   :  { %v1730_v12 = vadd.f32 %v3106_v10, %v1729_v11  ;;  %v3641_v13 = vpop.f32.mrb[17].mxu0  ;;  %v3944_v11 = vld [vmem:[#allocation31 + $0xb4] ss:$8 sps:$4 sm:$0xff]  }
 0x9dd   :  { %v1732_v14 = vpop.f32.mrb[18].mxu0  ;;  %v3947_v13 = vld [vmem:[#allocation31 + $0xc4] ss:$8 sps:$4 sm:$0xff]  }
 0x9de   :  { %v1733_v15 = vadd.f32 %v3106_v10, %v1732_v14  ;;  %v3642_v16 = vpop.f32.mrb[19].mxu0  ;;  %v1736_v17 = vmax.f32 %v1730_v12, 0.0  ;;  %v3939_v10 = vld [vmem:[#allocation31 + $0xa0] ss:$8 sps:$4 sm:$0xff]   ;;  %v3942_v12 = vld [vmem:[#allocation31 + $0xb0] ss:$8 sps:$4 sm:$0xff]  }
 0x9df   :  { %v3945_v14 = vld [vmem:[#allocation31 + $0xc0] ss:$8 sps:$4 sm:$0xff]   ;;  %v3948_v16 = vld [vmem:[#allocation31 + $0xd0] ss:$8 sps:$4 sm:$0xff]  }
 0x9e0   :  { %v1737_v18 = vmax.f32 %v1733_v15, 0.0  ;;  %v3950_v15 = vld [vmem:[#allocation31 + $0xd4] ss:$8 sps:$4 sm:$0xff]  }
 0x9e2   :  { %v1738_v19 = vpack.c.bf16 %v1737_v18, %v1736_v17  ;;  %v3124_v17 = vld [vmem:[#allocation5 + $0xd] ss:$0 sm:$0xff] }
 0x9e4   :  { %3660 = vmatmul.mubr.bf16.vlgmr.msra.gmra.mrb[20].mxu0 %v1738_v19 }
 0x9e5   :  { %2080 = vmatpush1.bf16.msra.mxu0 %v3861_v23  ;;  %2111 = vmatprep.mubr.bf16.mxu0 %v4556_v51 }
 0x9e6   :  { %2081 = vmatprep.subr.bf16.mxu0 %v3866_v25 }
 0x9e9   :  { %2082 = vmatpush1.bf16.msra.mxu0 %v3864_v26  ;;  %v3885_v26 = vld [vmem:[#allocation29] ss:$8 sps:$4 sm:$0xff]  }
 0x9ea   :  { %2083 = vmatprep.subr.bf16.mxu0 %v3869_v27 }
 0x9ed   :  { %2084 = vmatpush1.bf16.msra.mxu0 %v3867_v28  ;;  %v3890_v28 = vld [vmem:[#allocation29 + $0x14] ss:$8 sps:$4 sm:$0xff]  }
 0x9ee   :  { %2085 = vmatprep.subr.bf16.mxu0 %v3872_v29  ;;  %v3888_v29 = vld [vmem:[#allocation29 + $0x10] ss:$8 sps:$4 sm:$0xff]  }
 0x9f1   :  { %2086 = vmatpush1.bf16.msra.mxu0 %v3870_v30  ;;  %v3893_v30 = vld [vmem:[#allocation29 + $0x24] ss:$8 sps:$4 sm:$0xff]  }
 0x9f2   :  { %2087 = vmatprep.subr.bf16.mxu0 %v3875_v31  ;;  %v3891_v31 = vld [vmem:[#allocation29 + $0x20] ss:$8 sps:$4 sm:$0xff]  }
 0x9f5   :  { %2088 = vmatpush1.bf16.msra.mxu0 %v3873_v0  ;;  %v3896_v0 = vld [vmem:[#allocation29 + $0x34] ss:$8 sps:$4 sm:$0xff]  }
 0x9f6   :  { %2089 = vmatprep.subr.bf16.mxu0 %v3878_v32  ;;  %v3894_v32 = vld [vmem:[#allocation29 + $0x30] ss:$8 sps:$4 sm:$0xff]  }
 0x9f9   :  { %2090 = vmatpush1.bf16.msra.mxu0 %v3876_v33  ;;  %v3899_v33 = vld [vmem:[#allocation29 + $0x44] ss:$8 sps:$4 sm:$0xff]  }
 0x9fa   :  { %2091 = vmatprep.subr.bf16.mxu0 %v3881_v46  ;;  %v3957_v46 = vld [vmem:[#allocation32] ss:$8 sps:$4 sm:$0xff]  }
 0x9fd   :  { %2092 = vmatpush1.bf16.msra.mxu0 %v3879_v47  ;;  %v3959_v47 = vld [vmem:[#allocation32 + $0x4] ss:$8 sps:$4 sm:$0xff]  }
 0x9fe   :  { %2093 = vmatprep.subr.bf16.mxu0 %v3884_v48  ;;  %v3962_v48 = vld [vmem:[#allocation32 + $0x14] ss:$8 sps:$4 sm:$0xff]  }
 0xa01   :  { %2094 = vmatpush1.bf16.msra.mxu0 %v3882_v49  ;;  %v3960_v49 = vld [vmem:[#allocation32 + $0x10] ss:$8 sps:$4 sm:$0xff]  }
 0xa02   :  { %2230 = vmatprep.subr.bf16.mxu0 %v3887_v50  ;;  %v3965_v50 = vld [vmem:[#allocation32 + $0x24] ss:$8 sps:$4 sm:$0xff]  }
 0xab7   :  { %v1844_v35 = vpop.f32.mrb[20].mxu0 }
 0xab8   :  { %v1845_v36 = vadd.f32 %v3115_v34, %v1844_v35  ;;  %v3661_v37 = vpop.f32.mrb[21].mxu0  ;;  %v3902_v35 = vld [vmem:[#allocation29 + $0x54] ss:$8 sps:$4 sm:$0xff]  }
 0xab9   :  { %v1847_v38 = vpop.f32.mrb[22].mxu0  ;;  %v3905_v37 = vld [vmem:[#allocation29 + $0x64] ss:$8 sps:$4 sm:$0xff]  }
 0xaba   :  { %v1851_v39 = vadd.f32 %v1845_v36, %v1621_v57  ;;  %v1848_v40 = vadd.f32 %v3115_v34, %v1847_v38  ;;  %v3662_v41 = vpop.f32.mrb[23].mxu0  ;;  %v3915_v57 = vld [vmem:[#allocation31 + $0x20] ss:$8 sps:$4 sm:$0xff]   ;;  %v3900_v36 = vld [vmem:[#allocation29 + $0x50] ss:$8 sps:$4 sm:$0xff]  }
 0xabb   :  { %v3897_v34 = vld [vmem:[#allocation29 + $0x40] ss:$8 sps:$4 sm:$0xff]   ;;  %v3953_v41 = vld [vmem:[#allocation31 + $0xe4] ss:$8 sps:$4 sm:$0xff]  }
 0xabc   :  { %v1852_v42 = vadd.f32 %v1848_v40, %v1622_v58  ;;  %v1853_v43 = vmax.f32 %v1851_v39, 0.0  ;;  %v3920_v58 = vld [vmem:[#allocation31 + $0x34] ss:$8 sps:$4 sm:$0xff]   ;;  %v3903_v38 = vld [vmem:[#allocation29 + $0x60] ss:$8 sps:$4 sm:$0xff]  }
 0xabd   :  { %v3908_v39 = vld [vmem:[#allocation29 + $0x74] ss:$8 sps:$4 sm:$0xff]   ;;  %v3906_v40 = vld [vmem:[#allocation29 + $0x70] ss:$8 sps:$4 sm:$0xff]  }
 0xabe   :  { %v1854_v44 = vmax.f32 %v1852_v42, 0.0  ;;  %v3951_v42 = vld [vmem:[#allocation31 + $0xe0] ss:$8 sps:$4 sm:$0xff]  }
 0xac0   :  { %v5198_v45 = vpack.c.bf16 %v1854_v44, %v1853_v43  ;;  %v3956_v43 = vld [vmem:[#allocation31 + $0xf4] ss:$8 sps:$4 sm:$0xff]   ;;  %v3954_v44 = vld [vmem:[#allocation31 + $0xf0] ss:$8 sps:$4 sm:$0xff]  }
 0xac2   :  { %3680 = vmatmul.mubr.bf16.vlgmr.msra.gmra.mrb[16].mxu1 %v5198_v45 }
 0xac3   :  { %2488 = vmatpush1.bf16.msra.mxu1 %v3909_v52  ;;  %v3966_v52 = vld [vmem:[#allocation32 + $0x30] ss:$8 sps:$4 sm:$0xff]  }
 0xac4   :  { %2489 = vmatprep.subr.bf16.mxu1 %v3914_v54  ;;  %v3969_v54 = vld [vmem:[#allocation32 + $0x40] ss:$8 sps:$4 sm:$0xff]  }
 0xac7   :  { %2490 = vmatpush1.bf16.msra.mxu1 %v3912_v55  ;;  %v3974_v55 = vld [vmem:[#allocation32 + $0x54] ss:$8 sps:$4 sm:$0xff]  }
 0xac8   :  { %2491 = vmatprep.subr.bf16.mxu1 %v3917_v56  ;;  %v3972_v56 = vld [vmem:[#allocation32 + $0x50] ss:$8 sps:$4 sm:$0xff]  }
 0xacb   :  { %2492 = vmatpush1.bf16.msra.mxu1 %v3915_v57  ;;  %v3977_v57 = vld [vmem:[#allocation32 + $0x64] ss:$8 sps:$4 sm:$0xff]  }
 0xacc   :  { %2493 = vmatprep.subr.bf16.mxu1 %v3920_v58  ;;  %v3975_v58 = vld [vmem:[#allocation32 + $0x60] ss:$8 sps:$4 sm:$0xff]  }
 0xacf   :  { %2494 = vmatpush1.bf16.msra.mxu1 %v3918_v59  ;;  %v3980_v59 = vld [vmem:[#allocation32 + $0x74] ss:$8 sps:$4 sm:$0xff]  }
 0xad0   :  { %2495 = vmatprep.subr.bf16.mxu1 %v3923_v60  ;;  %v3978_v60 = vld [vmem:[#allocation32 + $0x70] ss:$8 sps:$4 sm:$0xff]  }
 0xad3   :  { %2496 = vmatpush1.bf16.msra.mxu1 %v3921_v61  ;;  %v3983_v61 = vld [vmem:[#allocation32 + $0x84] ss:$8 sps:$4 sm:$0xff]  }
 0xad4   :  { %2497 = vmatprep.subr.bf16.mxu1 %v3926_v62  ;;  %v3981_v62 = vld [vmem:[#allocation32 + $0x80] ss:$8 sps:$4 sm:$0xff]  }
 0xad7   :  { %2498 = vmatpush1.bf16.msra.mxu1 %v3924_v63  ;;  %v3986_v63 = vld [vmem:[#allocation32 + $0x94] ss:$8 sps:$4 sm:$0xff]  }
 0xad8   :  { %2499 = vmatprep.subr.bf16.mxu1 %v3929_v1  ;;  %v3984_v1 = vld [vmem:[#allocation32 + $0x90] ss:$8 sps:$4 sm:$0xff]  }
 0xadb   :  { %2500 = vmatpush1.bf16.msra.mxu1 %v3927_v2  ;;  %v3989_v2 = vld [vmem:[#allocation32 + $0xa4] ss:$8 sps:$4 sm:$0xff]  }
 0xadc   :  { %2501 = vmatprep.subr.bf16.mxu1 %v3932_v3  ;;  %v3987_v3 = vld [vmem:[#allocation32 + $0xa0] ss:$8 sps:$4 sm:$0xff]  }
 0xadf   :  { %2502 = vmatpush1.bf16.msra.mxu1 %v3930_v4  ;;  %v3992_v4 = vld [vmem:[#allocation32 + $0xb4] ss:$8 sps:$4 sm:$0xff]  }
 0xae0   :  { %2503 = vmatprep.subr.bf16.mxu1 %v3935_v5  ;;  %v3990_v5 = vld [vmem:[#allocation32 + $0xb0] ss:$8 sps:$4 sm:$0xff]  }
 0xae3   :  { %2504 = vmatpush1.bf16.msra.mxu1 %v3933_v6  ;;  %v3995_v6 = vld [vmem:[#allocation32 + $0xc4] ss:$8 sps:$4 sm:$0xff]  }
 0xae4   :  { %2505 = vmatprep.subr.bf16.mxu1 %v3938_v7  ;;  %v3993_v7 = vld [vmem:[#allocation32 + $0xc0] ss:$8 sps:$4 sm:$0xff]  }
 0xae7   :  { %2506 = vmatpush1.bf16.msra.mxu1 %v3936_v8  ;;  %v3998_v8 = vld [vmem:[#allocation32 + $0xd4] ss:$8 sps:$4 sm:$0xff]  }
 0xae8   :  { %2507 = vmatprep.subr.bf16.mxu1 %v3941_v9  ;;  %v3996_v9 = vld [vmem:[#allocation32 + $0xd0] ss:$8 sps:$4 sm:$0xff]  }
 0xaeb   :  { %2508 = vmatpush1.bf16.msra.mxu1 %v3939_v10  ;;  %v1989_v10 = vlaneseq }
 0xaec   :  { %2509 = vmatprep.subr.bf16.mxu1 %v3944_v11 }
 0xaed   :  { %v1990_v11 = vshrl.u32 %v1989_v10, 7 }
 0xaef   :  { %2510 = vmatpush1.bf16.msra.mxu1 %v3942_v12  ;;  %v5204_v12 = vsub.s32 1, %v1990_v11 }
 0xaf0   :  { %2511 = vmatprep.subr.bf16.mxu1 %v3947_v13  ;;  %v1987_v13 = vld [vmem:[#allocation5 + $0xe] sm:$0x3] }
 0xaf3   :  { %2512 = vmatpush1.bf16.msra.mxu1 %v3945_v14  ;;  %v5206_v14 = vsub.s32 0, %v1990_v11 }
 0xaf4   :  { %2513 = vmatprep.subr.bf16.mxu1 %v3950_v15  ;;  %v2138_v15 = vld [vmem:[#allocation5 + $0x10] sm:$0x3] }
 0xaf7   :  { %2514 = vmatpush1.bf16.msra.mxu1 %v3948_v16  ;;  %v1996_v16 = vrot.slane %v1987_v13, %v5204_v12 }
 0xaf8   :  { %2515 = vmatprep.subr.bf16.mxu1 %v3953_v41  ;;  %v4007_v41 = vld [vmem:[#allocation34 + $0x48] sm:$0xff]  }
 0xafb   :  { %2516 = vmatpush1.bf16.msra.mxu1 %v3951_v42  ;;  %v4008_v42 = vld [vmem:[#allocation34 + $0x8] sm:$0xff]  }
 0xafc   :  { %2517 = vmatprep.subr.bf16.mxu1 %v3956_v43  ;;  %v4009_v43 = vld [vmem:[#allocation34 + $0x50] sm:$0xff]  }
 0xaff   :  { %2518 = vmatpush1.bf16.msra.mxu1 %v3954_v44  ;;  %v4010_v44 = vld [vmem:[#allocation34 + $0x10] sm:$0xff]  }
 0xb95   :  { %v1961_v18 = vpop.f32.mrb[16].mxu1 }
 0xb96   :  { %v1962_v19 = vadd.f32 %v3124_v17, %v1961_v18  ;;  %v3681_v20 = vpop.f32.mrb[17].mxu1  ;;  %v1992_v18 = vrot.slane %v1987_v13, %v5206_v14 }
 0xb97   :  { %v1964_v21 = vpop.f32.mrb[18].mxu1 }
 0xb98   :  { %v1965_v22 = vadd.f32 %v3124_v17, %v1964_v21  ;;  %v3682_v23 = vpop.f32.mrb[19].mxu1  ;;  %v1968_v24 = vmax.f32 %v1962_v19, 0.0  ;;  %v2147_v17 = vrot.slane %v2138_v15, %v5204_v12  ;;  %v2143_v19 = vrot.slane %v2138_v15, %v5206_v14 }
 0xb9a   :  { %v1969_v25 = vmax.f32 %v1965_v22, 0.0  ;;  %v3697_v20 = vadd.f32 %v2147_v17, %v1996_v16  ;;  %v3695_v21 = vadd.f32 %v2143_v19, %v1992_v18 }
 0xb9c   :  { %v1970_v27 = vpack.c.bf16 %v1969_v25, %v1968_v24 }
 0xb9e   :  { %2112 = vmatmul.mubr.bf16.vlgmr.msra.gmra.mrb[24].mxu0 %v1970_v27 }
 0xb9f   :  { %2231 = vmatpush1.bf16.msra.mxu0 %v3885_v26  ;;  %2262 = vmatprep.mubr.bf16.mxu0 %v4556_v51  ;;  %v3963_v51 = vld [vmem:[#allocation32 + $0x20] ss:$8 sps:$4 sm:$0xff]  }
 0xba0   :  { %2232 = vmatprep.subr.bf16.mxu0 %v3890_v28 }
 0xba3   :  { %2233 = vmatpush1.bf16.msra.mxu0 %v3888_v29 }
 0xba4   :  { %2234 = vmatprep.subr.bf16.mxu0 %v3893_v30 }
 0xba7   :  { %2235 = vmatpush1.bf16.msra.mxu0 %v3891_v31 }
 0xba8   :  { %2236 = vmatprep.subr.bf16.mxu0 %v3896_v0 }
 0xbab   :  { %2237 = vmatpush1.bf16.msra.mxu0 %v3894_v32 }
 0xbac   :  { %2238 = vmatprep.subr.bf16.mxu0 %v3899_v33 }
 0xbaf   :  { %2239 = vmatpush1.bf16.msra.mxu0 %v3897_v34 }
 0xbb0   :  { %2240 = vmatprep.subr.bf16.mxu0 %v3902_v35  ;;  %v4001_v35 = vld [vmem:[#allocation32 + $0xe4] ss:$8 sps:$4 sm:$0xff]  }
 0xbb3   :  { %2241 = vmatpush1.bf16.msra.mxu0 %v3900_v36  ;;  %v3999_v36 = vld [vmem:[#allocation32 + $0xe0] ss:$8 sps:$4 sm:$0xff]  }
 0xbb4   :  { %2242 = vmatprep.subr.bf16.mxu0 %v3905_v37  ;;  %v4004_v37 = vld [vmem:[#allocation32 + $0xf4] ss:$8 sps:$4 sm:$0xff]  }
 0xbb7   :  { %2243 = vmatpush1.bf16.msra.mxu0 %v3903_v38  ;;  %v4002_v38 = vld [vmem:[#allocation32 + $0xf0] ss:$8 sps:$4 sm:$0xff]  }
 0xbb8   :  { %2244 = vmatprep.subr.bf16.mxu0 %v3908_v39  ;;  %v4005_v39 = vld [vmem:[#allocation34 + $0x40] sm:$0xff]  }
 0xbb9   :  { %3381 = vmatprep.subr.bf16.mxu1 %v4005_v39 }
 0xbbb   :  { %2245 = vmatpush1.bf16.msra.mxu0 %v3906_v40  ;;  %v4006_v40 = vld [vmem:[#allocation34] sm:$0xff]  }
 0xbbc   :  { %2740 = vmatprep.subr.bf16.mxu0 %v3959_v47  ;;  %v4012_v47 = vld [vmem:[#allocation34 + $0x18] sm:$0xff]  }
 0xbbe   :  { %2263 = vmatmul.mubr.bf16.vlgmr.msra.gmra.mrb[24].mxu0 %v5198_v45  ;;  %v3968_v45 = vld [vmem:[#allocation32 + $0x34] ss:$8 sps:$4 sm:$0xff]  }
 0xbbf   :  { %2741 = vmatpush1.bf16.msra.mxu0 %v3957_v46  ;;  %v4011_v46 = vld [vmem:[#allocation34 + $0x58] sm:$0xff]  }
 0xbc0   :  { %2742 = vmatprep.subr.bf16.mxu0 %v3962_v48  ;;  %v4013_v48 = vld [vmem:[#allocation34 + $0x60] sm:$0xff]  }
 0xbc3   :  { %2743 = vmatpush1.bf16.msra.mxu0 %v3960_v49  ;;  %v4014_v49 = vld [vmem:[#allocation34 + $0x20] sm:$0xff]  }
 0xbc4   :  { %2744 = vmatprep.subr.bf16.mxu0 %v3965_v50  ;;  %v2315_v50 = vld [vmem:[#allocation5 + $0x12] sm:$0x3] }
 0xbc7   :  { %2745 = vmatpush1.bf16.msra.mxu0 %v3963_v51  ;;  %v2320_v51 = vrot.slane %v2315_v50, %v5206_v14 }
 0xbc8   :  { %2746 = vmatprep.subr.bf16.mxu0 %v3968_v45  ;;  %v2324_v45 = vrot.slane %v2315_v50, %v5204_v12 }
 0xbcb   :  { %2747 = vmatpush1.bf16.msra.mxu0 %v3966_v52 }
 0xbcc   :  { %2748 = vmatprep.subr.bf16.mxu0 %v3971_v53 }
 0xbcf   :  { %2749 = vmatpush1.bf16.msra.mxu0 %v3969_v54 }
 0xbd0   :  { %2750 = vmatprep.subr.bf16.mxu0 %v3974_v55 }
 0xbd3   :  { %2751 = vmatpush1.bf16.msra.mxu0 %v3972_v56 }
 0xbd4   :  { %2752 = vmatprep.subr.bf16.mxu0 %v3977_v57 }
 0xbd7   :  { %2753 = vmatpush1.bf16.msra.mxu0 %v3975_v58 }
 0xbd8   :  { %2754 = vmatprep.subr.bf16.mxu0 %v3980_v59 }
 0xbdb   :  { %2755 = vmatpush1.bf16.msra.mxu0 %v3978_v60 }
 0xbdc   :  { %2756 = vmatprep.subr.bf16.mxu0 %v3983_v61 }
 0xbdf   :  { %2757 = vmatpush1.bf16.msra.mxu0 %v3981_v62 }
 0xbe0   :  { %2758 = vmatprep.subr.bf16.mxu0 %v3986_v63 }
 0xbe3   :  { %2759 = vmatpush1.bf16.msra.mxu0 %v3984_v1 }
 0xbe4   :  { %2760 = vmatprep.subr.bf16.mxu0 %v3989_v2 }
 0xbe7   :  { %2761 = vmatpush1.bf16.msra.mxu0 %v3987_v3  ;;  %v4015_v3 = vld [vmem:[#allocation34 + $0x68] sm:$0xff]  }
 0xbe8   :  { %2762 = vmatprep.subr.bf16.mxu0 %v3992_v4  ;;  %v4016_v4 = vld [vmem:[#allocation34 + $0x28] sm:$0xff]  }
 0xbeb   :  { %2763 = vmatpush1.bf16.msra.mxu0 %v3990_v5  ;;  %v4017_v5 = vld [vmem:[#allocation34 + $0x70] sm:$0xff]  }
 0xbec   :  { %2764 = vmatprep.subr.bf16.mxu0 %v3995_v6  ;;  %v4018_v6 = vld [vmem:[#allocation34 + $0x30] sm:$0xff]  }
 0xbef   :  { %2765 = vmatpush1.bf16.msra.mxu0 %v3993_v7  ;;  %v4019_v7 = vld [vmem:[#allocation34 + $0x78] sm:$0xff]  }
 0xbf0   :  { %2766 = vmatprep.subr.bf16.mxu0 %v3998_v8  ;;  %v4020_v8 = vld [vmem:[#allocation34 + $0x38] sm:$0xff]  }
 0xbf3   :  { %2767 = vmatpush1.bf16.msra.mxu0 %v3996_v9  ;;  %v2568_v9 = vld [vmem:[#allocation5 + $0x14] sm:$0x3] }
 0xbf4   :  { %2768 = vmatprep.subr.bf16.mxu0 %v4001_v35  ;;  %v2573_v10 = vrot.slane %v2568_v9, %v5206_v14  ;;  %v2577_v11 = vrot.slane %v2568_v9, %v5204_v12 }
 0xbf7   :  { %2769 = vmatpush1.bf16.msra.mxu0 %v3999_v36 }
 0xbf8   :  { %2770 = vmatprep.subr.bf16.mxu0 %v4004_v37 }
 0xbfb   :  { %2771 = vmatpush1.bf16.msra.mxu0 %v4002_v38 }
 0xc91   :  { %v2264_v22 = vpop.f32.mrb[24].mxu0 }
 0xc92   :  { %v2266_v23 = vpop.f32.mrb[25].mxu0  ;;  %v5214_v26 = vadd.f32 %v3695_v21, %v2264_v22 }
 0xc93   :  { %v5212_v24 = vadd.f32 %v3697_v20, %v2266_v23  ;;  %v2268_v25 = vpop.f32.mrb[26].mxu0 }
 0xc94   :  { %v5216_v27 = vadd.f32 %v3695_v21, %v2268_v25  ;;  %v2270_v28 = vpop.f32.mrb[27].mxu0  ;;  %v2277_v32 = vmax.f32 %v5214_v26, 0.0 }
 0xc95   :  { %v5218_v29 = vadd.f32 %v3697_v20, %v2270_v28  ;;  %v2278_v31 = vmax.f32 %v5212_v24, 0.0 }
 0xc96   :  { %v2279_v30 = vmax.f32 %v5216_v27, 0.0 }
 0xc97   :  { %v2280_v0 = vmax.f32 %v5218_v29, 0.0 }
 0xc98   :  { %v2281_v34 = vpack.c.bf16 %v2279_v30, %v2277_v32 }
 0xc99   :  { %v2282_v33 = vpack.c.bf16 %v2280_v0, %v2278_v31 }
 0xc9b   :  { %2519 = vmatprep.mubr.bf16.mxu1 %v2282_v33 }
 0xc9c   :  { %2520 = vmatmul.mubr.bf16.vlgmr.msra.gmra.mrb[20].mxu1 %v2281_v34 }
 0xc9d   :  { %3382 = vmatpush3.bf16.msra.mxu1 %v4006_v40 }
 0xc9e   :  { %3383 = vmatprep.subr.bf16.mxu1 %v4007_v41 }
 0xca1   :  { %3384 = vmatpush3.bf16.msra.mxu1 %v4008_v42 }
 0xca2   :  { %3385 = vmatprep.subr.bf16.mxu1 %v4009_v43 }
 0xca5   :  { %3386 = vmatpush3.bf16.msra.mxu1 %v4010_v44 }
 0xca6   :  { %3387 = vmatprep.subr.bf16.mxu1 %v4011_v46 }
 0xca9   :  { %3388 = vmatpush3.bf16.msra.mxu1 %v4012_v47 }
 0xcaa   :  { %3389 = vmatprep.subr.bf16.mxu1 %v4013_v48 }
 0xcad   :  { %3390 = vmatpush3.bf16.msra.mxu1 %v4014_v49 }
 0xcae   :  { %3391 = vmatprep.subr.bf16.mxu1 %v4015_v3 }
 0xcb1   :  { %3392 = vmatpush3.bf16.msra.mxu1 %v4016_v4 }
 0xcb2   :  { %3393 = vmatprep.subr.bf16.mxu1 %v4017_v5 }
 0xcb5   :  { %3394 = vmatpush3.bf16.msra.mxu1 %v4018_v6 }
 0xcb6   :  { %3395 = vmatprep.subr.bf16.mxu1 %v4019_v7 }
 0xcb9   :  { %3396 = vmatpush3.bf16.msra.mxu1 %v4020_v8 }
 0xd6f   :  { %v2521_v52 = vpop.f32.mrb[20].mxu1 }
 0xd70   :  { %v2522_v53 = vadd.f32 %v2521_v52, %v2320_v51  ;;  %v2523_v54 = vpop.f32.mrb[21].mxu1 }
 0xd71   :  { %v2524_v55 = vadd.f32 %v2523_v54, %v2324_v45  ;;  %v2525_v56 = vpop.f32.mrb[22].mxu1 }
 0xd72   :  { %v2526_v57 = vadd.f32 %v2525_v56, %v2320_v51  ;;  %v2527_v58 = vpop.f32.mrb[23].mxu1  ;;  %v2530_v60 = vmax.f32 %v2522_v53, 0.0 }
 0xd73   :  { %v2528_v59 = vadd.f32 %v2527_v58, %v2324_v45  ;;  %v2531_v62 = vmax.f32 %v2524_v55, 0.0 }
 0xd74   :  { %v2532_v61 = vmax.f32 %v2526_v57, 0.0 }
 0xd75   :  { %v2533_v63 = vmax.f32 %v2528_v59, 0.0 }
 0xd76   :  { %v2534_v1 = vpack.c.bf16 %v2532_v61, %v2530_v60 }
 0xd77   :  { %v2535_v2 = vpack.c.bf16 %v2533_v63, %v2531_v62 }
 0xd79   :  { %2772 = vmatprep.mubr.bf16.mxu0 %v2535_v2 }
 0xd7a   :  { %2773 = vmatmul.mubr.bf16.vlgmr.msra.gmra.mrb[28].mxu0 %v2534_v1 }
 0xe4d   :  { %v2774_v13 = vpop.f32.mrb[28].mxu0 }
 0xe4e   :  { %v2775_v15 = vadd.f32 %v2774_v13, %v2573_v10  ;;  %v2776_v16 = vpop.f32.mrb[29].mxu0 }
 0xe4f   :  { %v2777_v17 = vadd.f32 %v2776_v16, %v2577_v11  ;;  %v2778_v18 = vpop.f32.mrb[30].mxu0 }
 0xe50   :  { %v2783_v19 = vadd.f32 %v2775_v15, %v2277_v32  ;;  %v2779_v20 = vadd.f32 %v2778_v18, %v2573_v10  ;;  %v2780_v21 = vpop.f32.mrb[31].mxu0 }
 0xe51   :  { %v2784_v22 = vadd.f32 %v2777_v17, %v2278_v31  ;;  %v2781_v23 = vadd.f32 %v2780_v21, %v2577_v11  ;;  %v3229_v31 = vld [vmem:[#allocation5 + $0x16] ss:$0 sm:$0xff] }
 0xe52   :  { %v2785_v25 = vadd.f32 %v2779_v20, %v2279_v30  ;;  %v2787_v14 = vmax.f32 %v2783_v19, 0.0 }
 0xe53   :  { %v2786_v12 = vadd.f32 %v2781_v23, %v2280_v0  ;;  %v2788_v33 = vmax.f32 %v2784_v22, 0.0 }
 0xe54   :  { %v2789_v28 = vmax.f32 %v2785_v25, 0.0 }
 0xe55   :  { %v2790_v34 = vmax.f32 %v2786_v12, 0.0 }
 0xe56   :  { %v2791_v35 = vpack.c.bf16 %v2789_v28, %v2787_v14 }
 0xe57   :  { %v2792_v36 = vpack.c.bf16 %v2790_v34, %v2788_v33 }
 0xe59   :  { %2960 = vmatprep.mubr.bf16.mxu1 %v2792_v36 }
 0xe5a   :  { %2961 = vmatmul.mubr.bf16.vlgmr.msra.gmra.mrb[24].mxu1 %v2791_v35 }
 0xf2d   :  { %v3397_v26 = vpop.f32.mrb[24].mxu1 }
 0xf2e   :  { %v3398_v32 = vpop.f32.mrb[25].mxu1 }
 0xf2f   :  { %v3399_v37 = vadd.f32 %v3398_v32, %v3397_v26  ;;  %v3400_v24 = vpop.f32.mrb[26].mxu1 }
 0xf30   :  { %v3401_v38 = vpop.f32.mrb[27].mxu1 }
 0xf31   :  { %v3402_v39 = vadd.f32 %v3401_v38, %v3400_v24  ;;  %v2963_v27 = vadd.f32 %v3399_v37, %v3229_v31 }
 0xf33   :  { %v2966_v29 = vadd.f32 %v3402_v39, %v3229_v31 }
 0xf35   :  { %v3253_v30 = vpack.c.bf16 %v2966_v29, %v2963_v27 }
 0xf37   :  { %3254 = vst [vmem:[#allocation35] sm:$0xff] %v3253_v30  }
 0xf38   :  { %4494 = shalt.err (!%p4491_p4)
}
 0xf39   :  { %s5304_s20 = sld [smem:[#allocation55_spill]] }
 0xf3f   :  { %s4495_s21 = scalar_lea.hbm %s5304_s20, 128 }
 0xf40   :  { %p4496_p5 = scmp.ne.s32.totalorder %s5304_s20, %s4495_s21  ;;  %p4499_p6 = scmp.lt.u32.totalorder %s4495_s21, %s5304_s20 }
 0xf42   :  { %p4501_p7 = pnand %p4499_p6, %p4496_p5 }
 0xf44   :  { %4504 = shalt.err (!%p4501_p7)
}
 0xf45   :  { %2990 = dma.vmem_to_hbm [thread:$0]  %s2985_s11, 128, %s5304_s20, [#allocation4], %s4532_s3, %s4532_s3, %s4533_s23  }
 0xf46   :  { %4527 = dma.done.wait [#allocation4], 128  }
 0xf47   :  { %4528 = vsyncadd [#allocation4], 4294967168 }
 0xf48   :  { %2994 = vsyncpa [#allocation3], 1 }
 0xf49   :  { %2995 = vsyncpa [#allocation6], 1 }
 0xf4a   :  { %2996 = vsyncpa [#allocation9], 1 }
 0xf4b   :  { %2997 = vsyncpa [#allocation12], 1 }
 0xf4c   :  { %2998 = vsyncpa [#allocation15], 1 }
 0xf4d   :  { %2999 = vsyncpa [#allocation18], 1 }
 0xf4e   :  { %3000 = vsyncpa [#allocation21], 1 }
 0xf4f   :  { %3001 = vsyncpa [#allocation24], 1 }
 0xf50   :  { %3002 = vsyncpa [#allocation27], 1 }
 0xf51   :  { %3003 = vsyncpa [#allocation30], 1 }
 0xf52   :  { %3004 = vsyncpa [#allocation33], 1 }
 0xf53   :  { %3005 = vsyncpa [#allocation4], 1 }

</bundles_post_ra>
